<compile_context>
chip_gen: v7x
topology: tpu7x:2x2x1
jax: 0.10.0
libtpu: 0.0.40
codegen_flags: <defaults>
</compile_context>

<pallas_src>
import functools

import jax
import jax.numpy as jnp
from jax import lax
from jax.experimental import pallas as pl
from jax.experimental.pallas import tpu as pltpu


# -----------------------------------------------------------------------------
# helpers
# -----------------------------------------------------------------------------
def _round_up(x, m):
    return ((x + m - 1) // m) * m


def _row_tile(total, target=256):
    """Largest multiple-of-8 divisor of `total` that is <= target (else total)."""
    if total <= target:
        return total
    best = total
    t = 8
    while t <= target:
        if total % t == 0:
            best = t
        t += 8
    return best


# -----------------------------------------------------------------------------
# Kernels
# -----------------------------------------------------------------------------
def _dwconv_kernel(K, S, Ho, Wo, xp_ref, w_ref, y_ref, sum_ref, ssq_ref):
    """Depthwise KxK conv for one batch element + BN1 partial statistics.

    xp_ref : (1, Hp, Wp, Cp)  spatially padded, channel-repeated, lane-padded input
    w_ref  : (K*K, Cp)        per-tap per-output-channel weight (zeros in lane pad)
    y_ref  : (1, Ho, Wo, Cp)
    sum_ref, ssq_ref : (1, 1, Cp)  per-block partial sum / sum-of-squares
    """
    xp = xp_ref[0]                                   # (Hp, Wp, Cp)
    Cp = xp.shape[-1]
    acc = jnp.zeros((Ho, Wo, Cp), jnp.float32)
    for di in range(K):                              # K*K fully unrolled taps
        for dj in range(K):
            xs = xp[di:di + (Ho - 1) * S + 1:S,
                    dj:dj + (Wo - 1) * S + 1:S, :]   # (Ho, Wo, Cp)
            tap = w_ref[di * K + dj:di * K + dj + 1, :]   # (1, Cp)
            acc = acc + xs * tap                     # one VPU pass per tap
    y_ref[0] = acc.astype(y_ref.dtype)

    # BN1 partial statistics (per output channel) while the tile is in VMEM.
    col = jnp.sum(acc, axis=0)                       # (Wo, Cp)
    sum_ref[0] = jnp.sum(col, axis=0, keepdims=True)        # (1, Cp)
    colsq = jnp.sum(acc * acc, axis=0)
    ssq_ref[0] = jnp.sum(colsq, axis=0, keepdims=True)


def _bn_relu_pw_kernel(y_ref, s_ref, b_ref, w_ref, o_ref, sum_ref, ssq_ref):
    """Folded BN1 + ReLU + 1x1 conv (MXU matmul) + BN2 partial statistics.

    y_ref : (tp, Cp) row tile of the flattened activation
    s_ref, b_ref : (1, Cp)
    w_ref : (Cp, Cp)  pointwise weight, [in, out]
    o_ref : (tp, Cp)
    sum_ref, ssq_ref : (1, 1, Cp)
    """
    z = jnp.maximum(y_ref[...] * s_ref[...] + b_ref[...], 0.0)
    y2 = jnp.dot(z, w_ref[...], preferred_element_type=jnp.float32)
    o_ref[...] = y2.astype(o_ref.dtype)
    sum_ref[0] = jnp.sum(y2, axis=0, keepdims=True)
    ssq_ref[0] = jnp.sum(y2 * y2, axis=0, keepdims=True)


def _bn_relu_kernel(y_ref, s_ref, b_ref, o_ref):
    """Folded BN2 + ReLU on a (tp, Cp) row tile."""
    o_ref[...] = jnp.maximum(y_ref[...] * s_ref[...] + b_ref[...], 0.0
                             ).astype(o_ref.dtype)


# -----------------------------------------------------------------------------
# pallas_call wrappers
# -----------------------------------------------------------------------------
def depthwise_conv(xp, w_taps, K, S, Ho, Wo):
    N, Hp, Wp, Cp = xp.shape
    kern = functools.partial(_dwconv_kernel, K, S, Ho, Wo)
    return pl.pallas_call(
        kern,
        out_shape=(
            jax.ShapeDtypeStruct((N, Ho, Wo, Cp), jnp.float32),
            jax.ShapeDtypeStruct((N, 1, Cp), jnp.float32),
            jax.ShapeDtypeStruct((N, 1, Cp), jnp.float32),
        ),
        grid=(N,),
        in_specs=[
            pl.BlockSpec((1, Hp, Wp, Cp), lambda n: (n, 0, 0, 0)),
            pl.BlockSpec((K * K, Cp), lambda n: (0, 0)),
        ],
        out_specs=(
            pl.BlockSpec((1, Ho, Wo, Cp), lambda n: (n, 0, 0, 0)),
            pl.BlockSpec((1, 1, Cp), lambda n: (n, 0, 0)),
            pl.BlockSpec((1, 1, Cp), lambda n: (n, 0, 0)),
        ),
        compiler_params=pltpu.CompilerParams(dimension_semantics=("parallel",)),
    )(xp, w_taps)


def bn_relu_pointwise(y_rows, scale, bias, w_pw, tp):
    R, Cp = y_rows.shape
    T = R // tp
    return pl.pallas_call(
        _bn_relu_pw_kernel,
        out_shape=(
            jax.ShapeDtypeStruct((R, Cp), jnp.float32),
            jax.ShapeDtypeStruct((T, 1, Cp), jnp.float32),
            jax.ShapeDtypeStruct((T, 1, Cp), jnp.float32),
        ),
        grid=(T,),
        in_specs=[
            pl.BlockSpec((tp, Cp), lambda t: (t, 0)),
            pl.BlockSpec((1, Cp), lambda t: (0, 0)),
            pl.BlockSpec((1, Cp), lambda t: (0, 0)),
            pl.BlockSpec((Cp, Cp), lambda t: (0, 0)),
        ],
        out_specs=(
            pl.BlockSpec((tp, Cp), lambda t: (t, 0)),
            pl.BlockSpec((1, 1, Cp), lambda t: (t, 0, 0)),
            pl.BlockSpec((1, 1, Cp), lambda t: (t, 0, 0)),
        ),
        compiler_params=pltpu.CompilerParams(dimension_semantics=("parallel",)),
    )(y_rows, scale, bias, w_pw)


def bn_relu(y_rows, scale, bias, tp):
    R, Cp = y_rows.shape
    return pl.pallas_call(
        _bn_relu_kernel,
        out_shape=jax.ShapeDtypeStruct((R, Cp), jnp.float32),
        grid=(R // tp,),
        in_specs=[
            pl.BlockSpec((tp, Cp), lambda t: (t, 0)),
            pl.BlockSpec((1, Cp), lambda t: (0, 0)),
            pl.BlockSpec((1, Cp), lambda t: (0, 0)),
        ],
        out_specs=pl.BlockSpec((tp, Cp), lambda t: (t, 0)),
        compiler_params=pltpu.CompilerParams(dimension_semantics=("parallel",)),
    )(y_rows, scale, bias)


# -----------------------------------------------------------------------------
# Full module forward
# -----------------------------------------------------------------------------
def separate_conv_bn_relu(x_nchw, params, K, S, eps=1e-3):
    N, Cin, H, W = x_nchw.shape
    Cout, Cp, M = params["cout"], params["cp"], params["repeat"]
    pad = K // 2
    Ho = (H + 2 * pad - K) // S + 1
    Wo = (W + 2 * pad - K) // S + 1

    # NCHW -> NHWC, repeat input channels to Cout (grouped-conv channel gather),
    # pad channels to the 128-lane width, pad the spatial halo.  XLA fuses all
    # of this into a single producer pass over the input.
    x = jnp.transpose(x_nchw, (0, 2, 3, 1)).astype(jnp.float32)
    if M > 1:
        x = jnp.repeat(x, M, axis=-1)
    x = jnp.pad(x, ((0, 0), (pad, pad), (pad, pad), (0, Cp - Cout)))

    # Stage 1: depthwise KxK conv + BN1 partial statistics.
    y1, s1sum, s1ssq = depthwise_conv(x, params["w_taps"], K, S, Ho, Wo)

    # BN1 combine (training-mode biased variance) — tiny per-channel work.
    cnt = float(N * Ho * Wo)
    mean1 = jnp.sum(s1sum[:, 0, :], axis=0) / cnt
    var1 = jnp.maximum(jnp.sum(s1ssq[:, 0, :], axis=0) / cnt - mean1 ** 2, 0.0)
    sc1 = params["gamma1"] * lax.rsqrt(var1 + eps)
    sh1 = params["beta1"] - mean1 * sc1

    # Stage 2: BN1 + ReLU + 1x1 conv (256-row MXU tiles) + BN2 partial stats.
    R = N * Ho * Wo
    y1_rows = y1.reshape(R, Cp)                       # contiguous, free reshape
    tp = _row_tile(R, 256)
    y2, s2sum, s2ssq = bn_relu_pointwise(y1_rows, sc1[None, :], sh1[None, :],
                                         params["w_pw"], tp)

    mean2 = jnp.sum(s2sum[:, 0, :], axis=0) / float(R)
    var2 = jnp.maximum(jnp.sum(s2ssq[:, 0, :], axis=0) / float(R) - mean2 ** 2, 0.0)
    sc2 = params["gamma2"] * lax.rsqrt(var2 + eps)
    sh2 = params["beta2"] - mean2 * sc2

    # Stage 3: BN2 + ReLU (one read + one write of y2; unavoidable with
    # training-mode BN since BN2 needs y2's global statistics first).
    y3 = bn_relu(y2, sc2[None, :], sh2[None, :], tp)

    out = y3.reshape(N, Ho, Wo, Cp)[..., :Cout]
    return jnp.transpose(out, (0, 3, 1, 2))           # NHWC -> NCHW


# -----------------------------------------------------------------------------
# Pure-JAX reference (PyTorch training-mode semantics) for validation
# -----------------------------------------------------------------------------
def ref_forward(x_nchw, w_dw, w_pw, gamma1, beta1, gamma2, beta2, K, S, eps=1e-3):
    pad = K // 2
    Cin = x_nchw.shape[1]

    def _bn_relu(y, g, b):
        m = jnp.mean(y, axis=(0, 2, 3), keepdims=True)
        v = jnp.mean((y - m) ** 2, axis=(0, 2, 3), keepdims=True)
        yn = (y - m) * lax.rsqrt(v + eps)
        return jnp.maximum(yn * g[None, :, None, None] + b[None, :, None, None], 0.0)

    y1 = lax.conv_general_dilated(
        x_nchw, w_dw, window_strides=(S, S), padding=[(pad, pad), (pad, pad)],
        dimension_numbers=("NCHW", "OIHW", "NCHW"), feature_group_count=Cin)
    z = _bn_relu(y1, gamma1, beta1)
    y2 = lax.conv_general_dilated(
        z, w_pw, window_strides=(1, 1), padding=[(0, 0), (0, 0)],
        dimension_numbers=("NCHW", "OIHW", "NCHW"))
    return _bn_relu(y2, gamma2, beta2)


# -----------------------------------------------------------------------------
# Deterministic parameter construction
# -----------------------------------------------------------------------------
def make_params(key, Cin, Cout, K):
    assert Cout % Cin == 0
    M = Cout // Cin
    Cp = _round_up(Cout, 128)                         # lane-dense channel width
    ks = jax.random.split(key, 6)
    # PyTorch shapes: dw weight (Cout, 1, K, K); pw weight (Cout, Cout, 1, 1)
    w_dw = 0.3 * jax.random.normal(ks[0], (Cout, 1, K, K), jnp.float32)
    w_pw = 0.3 * jax.random.normal(ks[1], (Cout, Cout, 1, 1), jnp.float32)
    gamma1 = 1.0 + 0.1 * jax.random.normal(ks[2], (Cout,), jnp.float32)
    beta1 = 0.1 * jax.random.normal(ks[3], (Cout,), jnp.float32)
    gamma2 = 1.0 + 0.1 * jax.random.normal(ks[4], (Cout,), jnp.float32)
    beta2 = 0.1 * jax.random.normal(ks[5], (Cout,), jnp.float32)

    # Per-tap per-output-channel weight: taps[di*K+dj, o] = w_dw[o, 0, di, dj],
    # lane-padded with zeros (so padded channels stay exactly zero).
    taps = w_dw[:, 0, :, :].transpose(1, 2, 0).reshape(K * K, Cout)
    w_taps = jnp.pad(taps, ((0, 0), (0, Cp - Cout)))

    # 1x1 conv weight as [in, out], lane-padded on both sides.
    w_pw_mat = w_pw[:, :, 0, 0].T                     # (Cin=Cout, Cout)
    w_pw_p = jnp.pad(w_pw_mat, ((0, Cp - Cout), (0, Cp - Cout)))

    pad_c = (0, Cp - Cout)
    params = dict(
        w_taps=w_taps, w_pw=w_pw_p,
        gamma1=jnp.pad(gamma1, pad_c), beta1=jnp.pad(beta1, pad_c),
        gamma2=jnp.pad(gamma2, pad_c), beta2=jnp.pad(beta2, pad_c),
        cout=Cout, cin=Cin, cp=Cp, repeat=M,
    )
    torch_style = dict(w_dw=w_dw, w_pw=w_pw, gamma1=gamma1, beta1=beta1,
                       gamma2=gamma2, beta2=beta2)
    return params, torch_style


if __name__ == "__main__":
    N, Cin, H, W = 2, 4, 16, 16
    Cout, K, S = 8, 3, 1
    eps = 1e-3

    key = jax.random.PRNGKey(0)
    kx, kp = jax.random.split(key)
    x = jax.random.normal(kx, (N, Cin, H, W), jnp.float32)
    params, torch_style = make_params(kp, Cin, Cout, K)

    out = separate_conv_bn_relu(x, params, K, S, eps=eps)
    out = jax.block_until_ready(out)

    ref = ref_forward(x, torch_style["w_dw"], torch_style["w_pw"],
                      torch_style["gamma1"], torch_style["beta1"],
                      torch_style["gamma2"], torch_style["beta2"], K, S, eps=eps)
    ref = jax.block_until_ready(ref)

    assert out.shape == (N, Cout, H, W), out.shape
    assert jnp.allclose(out, ref, atol=1e-4, rtol=1e-4), \
        f"max err {jnp.max(jnp.abs(out - ref))}"
    print("KERNEL_OK")
</pallas_src>

<mosaic_0001>
module attributes {stable_mosaic.version = 11 : i64} {
  func.func @_dwconv_kernel(%arg0: i32, %arg1: memref<1x18x18x128xf32, #tpu.memory_space<vmem>>, %arg2: memref<9x128xf32, #tpu.memory_space<vmem>>, %arg3: memref<1x16x16x128xf32, #tpu.memory_space<vmem>>, %arg4: memref<1x1x128xf32, #tpu.memory_space<vmem>>, %arg5: memref<1x1x128xf32, #tpu.memory_space<vmem>>) attributes {dimension_semantics = [#tpu.dimension_semantics<parallel>], iteration_bounds = array<i64: 2>, scalar_prefetch = 0 : i64, scratch_operands = 0 : i64, tpu.core_type = #tpu.core_type<tc>, window_params = [{transform_indices = @transform_0, window_bounds = array<i64: 1, 18, 18, 128>}, {pipeline_mode = #tpu.pipeline_mode<synchronous>, transform_indices = @transform_1, window_bounds = array<i64: 9, 128>}, {transform_indices = @transform_2, window_bounds = array<i64: 1, 16, 16, 128>}, {transform_indices = @transform_3, window_bounds = array<i64: 1, 1, 128>}, {transform_indices = @transform_4, window_bounds = array<i64: 1, 1, 128>}]} {
    %c0 = arith.constant 0 : index
    %c0_0 = arith.constant 0 : index
    %c0_1 = arith.constant 0 : index
    %c0_2 = arith.constant 0 : index
    %0 = vector.load %arg1[%c0, %c0_0, %c0_1, %c0_2] : memref<1x18x18x128xf32, #tpu.memory_space<vmem>>, vector<1x18x18x128xf32>
    %1 = vector.shape_cast %0 : vector<1x18x18x128xf32> to vector<18x18x128xf32>
    %cst = arith.constant 0.000000e+00 : f32
    %2 = vector.broadcast %cst : f32 to vector<16x16x128xf32>
    %3 = vector.extract_strided_slice %1 {offsets = [0, 0, 0], sizes = [16, 16, 128], strides = [1, 1, 1]} : vector<18x18x128xf32> to vector<16x16x128xf32>
    %c0_3 = arith.constant 0 : index
    %c0_4 = arith.constant 0 : index
    %4 = vector.load %arg2[%c0_3, %c0_4] : memref<9x128xf32, #tpu.memory_space<vmem>>, vector<1x128xf32>
    %5 = vector.shape_cast %4 : vector<1x128xf32> to vector<1x1x128xf32>
    %6 = vector.broadcast %5 : vector<1x1x128xf32> to vector<16x16x128xf32>
    %7 = arith.mulf %3, %6 : vector<16x16x128xf32>
    %8 = arith.addf %2, %7 : vector<16x16x128xf32>
    %9 = vector.extract_strided_slice %1 {offsets = [0, 1, 0], sizes = [16, 16, 128], strides = [1, 1, 1]} : vector<18x18x128xf32> to vector<16x16x128xf32>
    %c1 = arith.constant 1 : index
    %c0_5 = arith.constant 0 : index
    %10 = vector.load %arg2[%c1, %c0_5] : memref<9x128xf32, #tpu.memory_space<vmem>>, vector<1x128xf32>
    %11 = vector.shape_cast %10 : vector<1x128xf32> to vector<1x1x128xf32>
    %12 = vector.broadcast %11 : vector<1x1x128xf32> to vector<16x16x128xf32>
    %13 = arith.mulf %9, %12 : vector<16x16x128xf32>
    %14 = arith.addf %8, %13 : vector<16x16x128xf32>
    %15 = vector.extract_strided_slice %1 {offsets = [0, 2, 0], sizes = [16, 16, 128], strides = [1, 1, 1]} : vector<18x18x128xf32> to vector<16x16x128xf32>
    %c2 = arith.constant 2 : index
    %c0_6 = arith.constant 0 : index
    %16 = vector.load %arg2[%c2, %c0_6] : memref<9x128xf32, #tpu.memory_space<vmem>>, vector<1x128xf32>
    %17 = vector.shape_cast %16 : vector<1x128xf32> to vector<1x1x128xf32>
    %18 = vector.broadcast %17 : vector<1x1x128xf32> to vector<16x16x128xf32>
    %19 = arith.mulf %15, %18 : vector<16x16x128xf32>
    %20 = arith.addf %14, %19 : vector<16x16x128xf32>
    %21 = vector.extract_strided_slice %1 {offsets = [1, 0, 0], sizes = [16, 16, 128], strides = [1, 1, 1]} : vector<18x18x128xf32> to vector<16x16x128xf32>
    %c3 = arith.constant 3 : index
    %c0_7 = arith.constant 0 : index
    %22 = vector.load %arg2[%c3, %c0_7] : memref<9x128xf32, #tpu.memory_space<vmem>>, vector<1x128xf32>
    %23 = vector.shape_cast %22 : vector<1x128xf32> to vector<1x1x128xf32>
    %24 = vector.broadcast %23 : vector<1x1x128xf32> to vector<16x16x128xf32>
    %25 = arith.mulf %21, %24 : vector<16x16x128xf32>
    %26 = arith.addf %20, %25 : vector<16x16x128xf32>
    %27 = vector.extract_strided_slice %1 {offsets = [1, 1, 0], sizes = [16, 16, 128], strides = [1, 1, 1]} : vector<18x18x128xf32> to vector<16x16x128xf32>
    %c4 = arith.constant 4 : index
    %c0_8 = arith.constant 0 : index
    %28 = vector.load %arg2[%c4, %c0_8] : memref<9x128xf32, #tpu.memory_space<vmem>>, vector<1x128xf32>
    %29 = vector.shape_cast %28 : vector<1x128xf32> to vector<1x1x128xf32>
    %30 = vector.broadcast %29 : vector<1x1x128xf32> to vector<16x16x128xf32>
    %31 = arith.mulf %27, %30 : vector<16x16x128xf32>
    %32 = arith.addf %26, %31 : vector<16x16x128xf32>
    %33 = vector.extract_strided_slice %1 {offsets = [1, 2, 0], sizes = [16, 16, 128], strides = [1, 1, 1]} : vector<18x18x128xf32> to vector<16x16x128xf32>
    %c5 = arith.constant 5 : index
    %c0_9 = arith.constant 0 : index
    %34 = vector.load %arg2[%c5, %c0_9] : memref<9x128xf32, #tpu.memory_space<vmem>>, vector<1x128xf32>
    %35 = vector.shape_cast %34 : vector<1x128xf32> to vector<1x1x128xf32>
    %36 = vector.broadcast %35 : vector<1x1x128xf32> to vector<16x16x128xf32>
    %37 = arith.mulf %33, %36 : vector<16x16x128xf32>
    %38 = arith.addf %32, %37 : vector<16x16x128xf32>
    %39 = vector.extract_strided_slice %1 {offsets = [2, 0, 0], sizes = [16, 16, 128], strides = [1, 1, 1]} : vector<18x18x128xf32> to vector<16x16x128xf32>
    %c6 = arith.constant 6 : index
    %c0_10 = arith.constant 0 : index
    %40 = vector.load %arg2[%c6, %c0_10] : memref<9x128xf32, #tpu.memory_space<vmem>>, vector<1x128xf32>
    %41 = vector.shape_cast %40 : vector<1x128xf32> to vector<1x1x128xf32>
    %42 = vector.broadcast %41 : vector<1x1x128xf32> to vector<16x16x128xf32>
    %43 = arith.mulf %39, %42 : vector<16x16x128xf32>
    %44 = arith.addf %38, %43 : vector<16x16x128xf32>
    %45 = vector.extract_strided_slice %1 {offsets = [2, 1, 0], sizes = [16, 16, 128], strides = [1, 1, 1]} : vector<18x18x128xf32> to vector<16x16x128xf32>
    %c7 = arith.constant 7 : index
    %c0_11 = arith.constant 0 : index
    %46 = vector.load %arg2[%c7, %c0_11] : memref<9x128xf32, #tpu.memory_space<vmem>>, vector<1x128xf32>
    %47 = vector.shape_cast %46 : vector<1x128xf32> to vector<1x1x128xf32>
    %48 = vector.broadcast %47 : vector<1x1x128xf32> to vector<16x16x128xf32>
    %49 = arith.mulf %45, %48 : vector<16x16x128xf32>
    %50 = arith.addf %44, %49 : vector<16x16x128xf32>
    %51 = vector.extract_strided_slice %1 {offsets = [2, 2, 0], sizes = [16, 16, 128], strides = [1, 1, 1]} : vector<18x18x128xf32> to vector<16x16x128xf32>
    %c8 = arith.constant 8 : index
    %c0_12 = arith.constant 0 : index
    %52 = vector.load %arg2[%c8, %c0_12] : memref<9x128xf32, #tpu.memory_space<vmem>>, vector<1x128xf32>
    %53 = vector.shape_cast %52 : vector<1x128xf32> to vector<1x1x128xf32>
    %54 = vector.broadcast %53 : vector<1x1x128xf32> to vector<16x16x128xf32>
    %55 = arith.mulf %51, %54 : vector<16x16x128xf32>
    %56 = arith.addf %50, %55 : vector<16x16x128xf32>
    %c0_13 = arith.constant 0 : index
    %c0_14 = arith.constant 0 : index
    %c0_15 = arith.constant 0 : index
    %c0_16 = arith.constant 0 : index
    %57 = vector.load %arg3[%c0_13, %c0_14, %c0_15, %c0_16] : memref<1x16x16x128xf32, #tpu.memory_space<vmem>>, vector<1x16x16x128xf32>
    %58 = vector.shape_cast %57 : vector<1x16x16x128xf32> to vector<16x16x128xf32>
    %59 = vector.shape_cast %56 : vector<16x16x128xf32> to vector<1x16x16x128xf32>
    tpu.vector_store %arg3[%c0_13, %c0_14, %c0_15, %c0_16], %59 {strides = array<i32>} : memref<1x16x16x128xf32, #tpu.memory_space<vmem>>, vector<1x16x16x128xf32>,
    %cst_17 = arith.constant dense<0.000000e+00> : vector<16x128xf32>
    %60 = vector.multi_reduction <add>, %56, %cst_17 [0] : vector<16x16x128xf32> to vector<16x128xf32>
    %cst_18 = arith.constant dense<0.000000e+00> : vector<128xf32>
    %61 = vector.multi_reduction <add>, %60, %cst_18 [0] : vector<16x128xf32> to vector<128xf32>
    %62 = vector.shape_cast %61 : vector<128xf32> to vector<1x128xf32>
    %c0_19 = arith.constant 0 : index
    %c0_20 = arith.constant 0 : index
    %c0_21 = arith.constant 0 : index
    %63 = vector.load %arg4[%c0_19, %c0_20, %c0_21] : memref<1x1x128xf32, #tpu.memory_space<vmem>>, vector<1x1x128xf32>
    %64 = vector.shape_cast %63 : vector<1x1x128xf32> to vector<1x128xf32>
    %65 = vector.shape_cast %62 : vector<1x128xf32> to vector<1x1x128xf32>
    tpu.vector_store %arg4[%c0_19, %c0_20, %c0_21], %65 {strides = array<i32>} : memref<1x1x128xf32, #tpu.memory_space<vmem>>, vector<1x1x128xf32>,
    %66 = arith.mulf %56, %56 : vector<16x16x128xf32>
    %cst_22 = arith.constant dense<0.000000e+00> : vector<16x128xf32>
    %67 = vector.multi_reduction <add>, %66, %cst_22 [0] : vector<16x16x128xf32> to vector<16x128xf32>
    %cst_23 = arith.constant dense<0.000000e+00> : vector<128xf32>
    %68 = vector.multi_reduction <add>, %67, %cst_23 [0] : vector<16x128xf32> to vector<128xf32>
    %69 = vector.shape_cast %68 : vector<128xf32> to vector<1x128xf32>
    %c0_24 = arith.constant 0 : index
    %c0_25 = arith.constant 0 : index
    %c0_26 = arith.constant 0 : index
    %70 = vector.load %arg5[%c0_24, %c0_25, %c0_26] : memref<1x1x128xf32, #tpu.memory_space<vmem>>, vector<1x1x128xf32>
    %71 = vector.shape_cast %70 : vector<1x1x128xf32> to vector<1x128xf32>
    %72 = vector.shape_cast %69 : vector<1x128xf32> to vector<1x1x128xf32>
    tpu.vector_store %arg5[%c0_24, %c0_25, %c0_26], %72 {strides = array<i32>} : memref<1x1x128xf32, #tpu.memory_space<vmem>>, vector<1x1x128xf32>,
    return
  }
  func.func @transform_0(%arg0: i32) -> (i32, i32, i32, i32) {
    %c0_i32 = arith.constant 0 : i32
    %c0_i32_0 = arith.constant 0 : i32
    %c0_i32_1 = arith.constant 0 : i32
    %c0_i32_2 = arith.constant 0 : i32
    return %arg0, %c0_i32, %c0_i32_0, %c0_i32_1 : i32, i32, i32, i32
  }
  func.func @transform_1(%arg0: i32) -> (i32, i32) {
    %c0_i32 = arith.constant 0 : i32
    %c0_i32_0 = arith.constant 0 : i32
    %c0_i32_1 = arith.constant 0 : i32
    return %c0_i32, %c0_i32_0 : i32, i32
  }
  func.func @transform_2(%arg0: i32) -> (i32, i32, i32, i32) {
    %c0_i32 = arith.constant 0 : i32
    %c0_i32_0 = arith.constant 0 : i32
    %c0_i32_1 = arith.constant 0 : i32
    %c0_i32_2 = arith.constant 0 : i32
    return %arg0, %c0_i32, %c0_i32_0, %c0_i32_1 : i32, i32, i32, i32
  }
  func.func @transform_3(%arg0: i32) -> (i32, i32, i32) {
    %c0_i32 = arith.constant 0 : i32
    %c0_i32_0 = arith.constant 0 : i32
    %c0_i32_1 = arith.constant 0 : i32
    return %arg0, %c0_i32, %c0_i32_0 : i32, i32, i32
  }
  func.func @transform_4(%arg0: i32) -> (i32, i32, i32) {
    %c0_i32 = arith.constant 0 : i32
    %c0_i32_0 = arith.constant 0 : i32
    %c0_i32_1 = arith.constant 0 : i32
    return %arg0, %c0_i32, %c0_i32_0 : i32, i32, i32
  }
}

</mosaic_0001>

<bundles_post_ra>
// kernel: tpu_custom_call.1
= control target key start
LH: loop header
LB: loop body
LE: loop exit
PB: predicated region body
PF: predicated region fallthrough
CT: control target
= control target key end

     0   :  { %10 = vsyncpa [#allocation3], 0  ;;  %s5645_s0 = inlined_call_operand.vmem [shape: f32[2,18,18,128], index: 0, kind: input, shape index: {}]   ;;  %s5646_s1 = inlined_call_operand.vmem [shape: f32[9,128], index: 1, kind: input, shape index: {}]   ;;  %s5647_s2 = inlined_call_operand.hbm [shape: f32[2,16,16,128], index: 2, kind: output, shape index: {0}]   ;;  %s5648_s3 = inlined_call_operand.hbm [shape: f32[2,1,128], index: 3, kind: output, shape index: {1}]   ;;  %s5649_s4 = inlined_call_operand.hbm [shape: f32[2,1,128], index: 4, kind: output, shape index: {2}]  }
   0x1   :  { %12 = vsyncpa [#allocation3 + $0x1], 0 }
   0x2   :  { %13 = vsyncpa [#allocation5], 0 }
   0x3   :  { %15 = vsyncpa [#allocation5 + $0x1], 0  ;;  %s2525_s15 = smov 0   ;;  %s2527_s16 = smov 0  }
   0x4   :  { %s2529_s17 = smov 0   ;;  %s2531_s18 = smov 0  }
   0x5 LB: > { %s2546_s19 = sadd.s32 4294967295, %s2493_s18   ;;  %s2248_s20 = sadd.s32 4294967294, %s2493_s18   ;;  %s2493_s18 = sphi %s2531_s18, %s6572_s18   ;;  %s2489_s17 = sphi %s2529_s17, %s6571_s17   ;;  %s2485_s16 = sphi %s2527_s16, %s6570_s16   ;;  %s2481_s15 = sphi %s2525_s15, %s6569_s15  }
   0x6   : > { %s2550_s21 = sadd.s32 1, %s2493_s18   ;;  %s75_s22 = sadd.s32 1, %s2489_s17 }
   0x7   : > { %s72_s23 = ssub.s32 %s2493_s18, %s2550_s21  ;;  %p85_p0 = scmp.ne.s32.totalorder %s2489_s17, %s2485_s16 }
   0x8   : > { %p73_p1 = scmp.eq.s32.totalorder %s72_s23, 0  ;;  %p86_p2 = scmp.eq.s32.totalorder %s2546_s19, 1 }
   0x9   : > { %p91_p3 = scmp.ne.s32.totalorder %s2485_s16, %s2481_s15  ;;  %p92_p4 = scmp.eq.s32.totalorder %s2248_s20, 1 }
   0xa   : > { %s2563_s24 = scalar_select %p73_p1, %s2489_s17, %s75_s22  }
   0xb   : > { %p2565_p5 = por %p86_p2, %p85_p0  ;;  %p2569_p6 = por %p92_p4, %p91_p3 }
   0xc   : > { %p2251_p7 = scmp.ge.s32.totalorder %s2493_s18, 1  ;;  %p173_p8 = scmp.lt.s32.totalorder %s2493_s18, 3 }
   0xe   : > { %p174_p9 = pnand %p2251_p7, %p173_p8 }
  0x10   : > { %177 = sbr.rel (%p174_p9) target bundleno = 471 (0x1d7), region = 28 }
  0x17   : > { %p207_p10 = scmp.lt.s32.totalorder %s2546_s19, 1  ;;  %v2580_v0 = vld [vmem:[%s5646_s1] ss:$0 sm:$0xff]  ;;  %v2585_v1 = vld [vmem:[%s5646_s1 + $0x1] ss:$0 sm:$0xff]  ;;  %vm436_vm0 = vcmask 1046528  }
  0x18   : > { %vm682_vm1 = vcmask 1045504   ;;  %s5224_s8 = sand.u32 1, %s2485_s16   ;;  %s2270_s11 = sshll.u32 %s2546_s19, 12 }
  0x19   : > { %s208_s27 = scalar_select %p207_p10, %s2546_s19, 1 }
  0x1a   : > { %s5405_s22 = scalar_lea.hbm %s5647_s2, %s2270_s11  ;;  %s2086_s23 = scalar_lea.sflag [#allocation3], %s5224_s8 }
  0x1b   : > { %s2271_s28 = smul.u32 432, %s208_s27 }
  0x1d   : > { %s2590_s9 = scalar_lea.vmem %s5645_s0, %s2271_s28  ;;  %s2495_s28 = smov [#allocation2]  }
  0x1e   : > { %v2593_v2 = vld [vmem:[%s2590_s9] sm:$0xff]  ;;  %v2596_v3 = vld [vmem:[%s2590_s9 + $0x8] sm:$0xff]  ;;  %v2599_v4 = vld [vmem:[%s2590_s9 + $0x10] sm:$0x3]  ;;  %s2375_s29 = sshll.u32 %s2495_s28, 4  ;;  %s2376_s29 = int_to_ptr.vmem [resolvable:$false] %s2375_s29 }
  0x1f   : > { %5837 = vst [vmem:[#allocation9_spill] sm:$0xff] %v2593_v2  ;;  %5838 = vst [vmem:[#allocation10_spill] sm:$0xff] %v2596_v3  ;;  %v2602_v5 = vld [vmem:[%s2590_s9 + $0x18] sm:$0xff]  ;;  %v2605_v6 = vld [vmem:[%s2590_s9 + $0x20] sm:$0xff]  ;;  %v2612_v8 = vmul.f32 %v2580_v0, %v2593_v2  ;;  %v2616_v9 = vmul.f32 %v2580_v0, %v2596_v3  ;;  %v2620_v10 = vmul.f32 %v2585_v1, %v2593_v2  ;;  %s2377_s30 = scalar_lea.vmem %s2376_s29, 8192 }
  0x20   : > { %5839 = vst [vmem:[#allocation11_spill] sm:$0xff] %v2599_v4  ;;  %5840 = vst [vmem:[#allocation12_spill] sm:$0xff] %v2602_v5  ;;  %v2608_v7 = vld [vmem:[%s2590_s9 + $0x28] sm:$0x3]  ;;  %v2624_v11 = vmul.f32 %v2585_v1, %v2596_v3  ;;  %v2627_v12 = vld [vmem:[%s2590_s9 + $0x30] sm:$0xff]  ;;  %v2637_v15 = vmul.f32 %v2580_v0, %v2602_v5  ;;  %v2641_v16 = vmul.f32 %v2580_v0, %v2605_v6 }
  0x21   : > { %5841 = vst [vmem:[#allocation13_spill] sm:$0xff] %v2605_v6  ;;  %5842 = vst [vmem:[#allocation14_spill] sm:$0xff] %v2608_v7  ;;  %v2630_v13 = vld [vmem:[%s2590_s9 + $0x38] sm:$0xff]  ;;  %v2633_v14 = vld [vmem:[%s2590_s9 + $0x40] sm:$0x3]  ;;  %v2645_v17 = vmul.f32 %v2585_v1, %v2599_v4  ;;  %v2649_v18 = vmul.f32 %v2585_v1, %v2602_v5  ;;  %v2662_v22 = vmul.f32 %v2580_v0, %v2627_v12 }
  0x22   : > { %5843 = vst [vmem:[#allocation15_spill] sm:$0xff] %v2627_v12  ;;  %5844 = vst [vmem:[#allocation16_spill] sm:$0xff] %v2630_v13  ;;  %v2652_v19 = vld [vmem:[%s2590_s9 + $0x48] sm:$0xff]  ;;  %v2655_v20 = vld [vmem:[%s2590_s9 + $0x50] sm:$0xff]  ;;  %v2666_v23 = vmul.f32 %v2580_v0, %v2630_v13  ;;  %v2670_v24 = vmul.f32 %v2585_v1, %v2605_v6  ;;  %v2674_v25 = vmul.f32 %v2585_v1, %v2608_v7 }
  0x23   : > { %5845 = vst [vmem:[#allocation17_spill] sm:$0xff] %v2633_v14  ;;  %5846 = vst [vmem:[#allocation18_spill] sm:$0xff] %v2652_v19  ;;  %v2658_v21 = vld [vmem:[%s2590_s9 + $0x58] sm:$0x3]  ;;  %v2677_v26 = vld [vmem:[%s2590_s9 + $0x60] sm:$0xff]  ;;  %v2684_v28 = vmul.f32 %v2580_v0, %v2652_v19  ;;  %v2688_v29 = vmul.f32 %v2580_v0, %v2655_v20  ;;  %v2692_v30 = vmul.f32 %v2585_v1, %v2627_v12 }
  0x24   : > { %5847 = vst [vmem:[#allocation19_spill] sm:$0xff] %v2655_v20  ;;  %5848 = vst [vmem:[#allocation20_spill] sm:$0xff] %v2658_v21  ;;  %v2680_v27 = vld [vmem:[%s2590_s9 + $0x68] sm:$0xff]  ;;  %v2696_v31 = vmul.f32 %v2585_v1, %v2630_v13  ;;  %v2699_v32 = vld [vmem:[%s2590_s9 + $0x70] sm:$0x3]  ;;  %v2709_v35 = vmul.f32 %v2580_v0, %v2677_v26  ;;  %v2717_v37 = vmul.f32 %v2585_v1, %v2633_v14 }
  0x25   : > { %5849 = vst [vmem:[#allocation21_spill] sm:$0xff] %v2666_v23  ;;  %5850 = vst [vmem:[#allocation22_spill] sm:$0xff] %v2677_v26  ;;  %v2702_v33 = vld [vmem:[%s2590_s9 + $0x78] sm:$0xff]  ;;  %v2705_v34 = vld [vmem:[%s2590_s9 + $0x80] sm:$0xff]  ;;  %v2713_v36 = vmul.f32 %v2580_v0, %v2680_v27  ;;  %v2721_v38 = vmul.f32 %v2585_v1, %v2652_v19  ;;  %v2742_v44 = vmul.f32 %v2585_v1, %v2655_v20 }
  0x26   : > { %5851 = vst [vmem:[#allocation23_spill] sm:$0xff] %v2680_v27  ;;  %5852 = vst [vmem:[#allocation24_spill] sm:$0xff] %v2684_v28  ;;  %v2724_v39 = vld [vmem:[%s2590_s9 + $0x88] sm:$0x3]  ;;  %v2727_v40 = vld [vmem:[%s2590_s9 + $0x90] sm:$0xff]  ;;  %v2734_v42 = vmul.f32 %v2580_v0, %v2702_v33  ;;  %v2738_v43 = vmul.f32 %v2580_v0, %v2705_v34  ;;  %v2746_v45 = vmul.f32 %v2585_v1, %v2658_v21  ;;  %v447_v28 = vrot.slane %v2692_v30, 1 }
  0x27   : > { %5853 = vst [vmem:[#allocation25_spill] sm:$0xff] %v2688_v29  ;;  %5854 = vst [vmem:[#allocation26_spill] sm:$0xff] %v2699_v32  ;;  %v2730_v41 = vld [vmem:[%s2590_s9 + $0x98] sm:$0xff]  ;;  %v2749_v46 = vld [vmem:[%s2590_s9 + $0xa8] sm:$0xff]  ;;  %v2756_v48 = vmul.f32 %v2580_v0, %v2727_v40  ;;  %v2764_v50 = vmul.f32 %v2585_v1, %v2677_v26  ;;  %v2768_v51 = vmul.f32 %v2585_v1, %v2680_v27  ;;  %v443_v29 = vrot.slane %v2670_v24, 1 }
  0x28   : > { %5855 = vst [vmem:[#allocation27_spill] sm:$0xff] %v2702_v33  ;;  %5856 = vst [vmem:[#allocation28_spill] sm:$0xff] %v2705_v34  ;;  %v2752_v47 = vld [vmem:[%s2590_s9 + $0xb0] sm:$0xff]  ;;  %v2760_v49 = vmul.f32 %v2580_v0, %v2730_v41  ;;  %v2771_v52 = vld [vmem:[%s2590_s9 + $0xa0] sm:$0x3]  ;;  %v2781_v55 = vmul.f32 %v2580_v0, %v2749_v46  ;;  %v2789_v57 = vmul.f32 %v2585_v1, %v2699_v32 }
  0x29   : > { %5857 = vst [vmem:[#allocation29_spill] sm:$0xff] %v2709_v35  ;;  %5858 = vst [vmem:[#allocation30_spill] sm:$0xff] %v2713_v36  ;;  %v2774_v53 = vld [vmem:[%s2590_s9 + $0xc0] sm:$0xff]  ;;  %v2777_v54 = vld [vmem:[%s2590_s9 + $0xc8] sm:$0xff]  ;;  %v2785_v56 = vmul.f32 %v2580_v0, %v2752_v47  ;;  %v2793_v58 = vmul.f32 %v2585_v1, %v2702_v33  ;;  %v2814_v33 = vmul.f32 %v2585_v1, %v2705_v34  ;;  %v440_v35 = vrot.slane %v2645_v17, 1 }
  0x2a   : > { %5859 = vst [vmem:[#allocation31_spill] sm:$0xff] %v2724_v39  ;;  %5860 = vst [vmem:[#allocation32_spill] sm:$0xff] %v2727_v40  ;;  %v2796_v59 = vld [vmem:[%s2590_s9 + $0xb8] sm:$0x3]  ;;  %v2802_v61 = vld [vmem:[%s2590_s9 + $0xe0] sm:$0xff]  ;;  %v2806_v62 = vmul.f32 %v2580_v0, %v2774_v53  ;;  %v2810_v63 = vmul.f32 %v2580_v0, %v2777_v54  ;;  %v2818_v32 = vmul.f32 %v2585_v1, %v2724_v39 }
  0x2b   : > { %5861 = vst [vmem:[#allocation33_spill] sm:$0xff] %v2730_v41  ;;  %5862 = vst [vmem:[#allocation34_spill] sm:$0xff] %v2734_v42  ;;  %v2799_v60 = vld [vmem:[%s2590_s9 + $0xd8] sm:$0xff]  ;;  %v2821_v27 = vld [vmem:[%s2590_s9 + $0xf0] sm:$0xff]  ;;  %v2832_v20 = vmul.f32 %v2580_v0, %v2802_v61  ;;  %v2836_v34 = vmul.f32 %v2585_v1, %v2727_v40  ;;  %v2840_v39 = vmul.f32 %v2585_v1, %v2730_v41 }
  0x2c   : > { %5863 = vst [vmem:[#allocation35_spill] sm:$0xff] %v2738_v43  ;;  %5864 = vst [vmem:[#allocation36_spill] sm:$0xff] %v2749_v46  ;;  %v2824_v26 = vld [vmem:[%s2590_s9 + $0xf8] sm:$0xff]  ;;  %v2828_v21 = vmul.f32 %v2580_v0, %v2799_v60  ;;  %v2843_v19 = vld [vmem:[%s2590_s9 + $0xd0] sm:$0x3]  ;;  %v2853_v12 = vmul.f32 %v2580_v0, %v2821_v27  ;;  %v2861_v41 = vmul.f32 %v2585_v1, %v2771_v52 }
  0x2d   : > { %5865 = vst [vmem:[#allocation37_spill] sm:$0xff] %v2752_v47  ;;  %5866 = vst [vmem:[#allocation38_spill] sm:$0xff] %v2756_v48  ;;  %v2846_v14 = vld [vmem:[%s2590_s9 + $0x108] sm:$0xff]  ;;  %v2849_v13 = vld [vmem:[%s2590_s9 + $0x110] sm:$0xff]  ;;  %v2857_v40 = vmul.f32 %v2580_v0, %v2824_v26  ;;  %v2865_v7 = vmul.f32 %v2585_v1, %v2749_v46  ;;  %v2886_v46 = vmul.f32 %v2585_v1, %v2752_v47 }
  0x2e   : > { %5867 = vst [vmem:[#allocation39_spill] sm:$0xff] %v2760_v49  ;;  %5868 = vst [vmem:[#allocation40_spill] sm:$0xff] %v2771_v52  ;;  %v2868_v6 = vld [vmem:[%s2590_s9 + $0xe8] sm:$0x3]  ;;  %v2871_v5 = vld [vmem:[%s2590_s9 + $0x120] sm:$0xff]  ;;  %v2878_v3 = vmul.f32 %v2580_v0, %v2846_v14  ;;  %v2882_v52 = vmul.f32 %v2580_v0, %v2849_v13  ;;  %v2890_v2 = vmul.f32 %v2585_v1, %v2796_v59 }
  0x2f   : > { %5869 = vst [vmem:[#allocation41_spill] sm:$0xff] %v2774_v53  ;;  %5870 = vst [vmem:[#allocation42_spill] sm:$0xff] %v2777_v54  ;;  %v2874_v4 = vld [vmem:[%s2590_s9 + $0x128] sm:$0xff]  ;;  %v2949_v49 = vld [vmem:[%s2590_s9 + $0x170] sm:$0xff] }
  0x30   : > { %5871 = vst [vmem:[#allocation43_spill] sm:$0xff] %v2781_v55  ;;  %5872 = vst [vmem:[#allocation44_spill] sm:$0xff] %v2785_v56  ;;  %v2907_v47 = vmul.f32 %v2580_v0, %v2874_v4  ;;  %v2943_v56 = vld [vmem:[%s2590_s9 + $0x130] sm:$0x3]  ;;  %v2946_v55 = vld [vmem:[%s2590_s9 + $0x168] sm:$0xff] }
  0x31   : > { %5873 = vst [vmem:[#allocation45_spill] sm:$0xff] %v2796_v59  ;;  %5874 = vst [vmem:[#allocation46_spill] sm:$0xff] %v2799_v60  ;;  %v2911_v59 = vmul.f32 %v2585_v1, %v2774_v53  ;;  %v2968_v48 = vld [vmem:[%s2590_s9 + $0x148] sm:$0x3]  ;;  %v2972_v43 = vmul.f32 %v2580_v0, %v2946_v55  ;;  %v2990_v42 = vld [vmem:[%s2590_s9 + $0x178] sm:$0x3] }
  0x32   : > { %5875 = vst [vmem:[#allocation47_spill] sm:$0xff] %v2802_v61  ;;  %5876 = vst [vmem:[#allocation48_spill] sm:$0xff] %v2806_v62  ;;  %v2924_v62 = vld [vmem:[%s2590_s9 + $0x158] sm:$0xff] }
  0x33   : > { %5877 = vst [vmem:[#allocation49_spill] sm:$0xff] %v2810_v63  ;;  %5878 = vst [vmem:[#allocation50_spill] sm:$0xff] %v2821_v27  ;;  %v2921_v63 = vld [vmem:[%s2590_s9 + $0x150] sm:$0xff] }
  0x34   : > { %5879 = vst [vmem:[#allocation51_spill] sm:$0xff] %v2824_v26  ;;  %5880 = vst [vmem:[#allocation52_spill] sm:$0xff] %v2828_v21  ;;  %v2918_v21 = vld [vmem:[%s2590_s9 + $0x118] sm:$0x3] }
  0x35   : > { %5881 = vst [vmem:[#allocation53_spill] sm:$0xff] %v2832_v20  ;;  %5882 = vst [vmem:[#allocation54_spill] sm:$0xff] %v2843_v19  ;;  %v2915_v20 = vmul.f32 %v2585_v1, %v2777_v54  ;;  %v2936_v54 = vmul.f32 %v2585_v1, %v2843_v19  ;;  %v2961_v19 = vmul.f32 %v2585_v1, %v2802_v61 }
  0x36   : > { %5883 = vst [vmem:[#allocation55_spill] sm:$0xff] %v2846_v14  ;;  %5884 = vst [vmem:[#allocation56_spill] sm:$0xff] %v2849_v13  ;;  %v2984_v61 = vmul.f32 %v2585_v1, %v2824_v26  ;;  %v3006_v26 = vmul.f32 %v2585_v1, %v2918_v21 }
  0x37   : > { %5885 = vst [vmem:[#allocation57_spill] sm:$0xff] %v2853_v12  ;;  %5886 = vst [vmem:[#allocation58_spill] sm:$0xff] %v2857_v40  ;;  %v2893_v40 = vld [vmem:[%s2590_s9 + $0x100] sm:$0x3]  ;;  %v2896_v12 = vld [vmem:[%s2590_s9 + $0x138] sm:$0xff] }
  0x38   : > { %5887 = vst [vmem:[#allocation59_spill] sm:$0xff] %v2868_v6  ;;  %5888 = vst [vmem:[#allocation60_spill] sm:$0xff] %v2871_v5  ;;  %v2994_v36 = vmul.f32 %v2585_v1, %v2893_v40 }
  0x39   : > { %5889 = vst [vmem:[#allocation61_spill] sm:$0xff] %v2874_v4  ;;  %5890 = vst [vmem:[#allocation62_spill] sm:$0xff] %v2878_v3  ;;  %v2899_v3 = vld [vmem:[%s2590_s9 + $0x140] sm:$0xff] }
  0x3a   : > { %5891 = vst [vmem:[#allocation63_spill] sm:$0xff] %v2882_v52  ;;  %5892 = vst [vmem:[#allocation64_spill] sm:$0xff] %v2893_v40  ;;  %v2903_v52 = vmul.f32 %v2580_v0, %v2871_v5  ;;  %v2932_v53 = vmul.f32 %v2580_v0, %v2899_v3  ;;  %v3014_v40 = vmul.f32 %v2585_v1, %v2874_v4 }
  0x3b   : > { %5893 = vst [vmem:[#allocation65_spill] sm:$0xff] %v2896_v12  ;;  %5894 = vst [vmem:[#allocation66_spill] sm:$0xff] %v2899_v3  ;;  %v3034_v4 = vmul.f32 %v2585_v1, %v2921_v63 }
  0x3c   : > { %5895 = vst [vmem:[#allocation67_spill] sm:$0xff] %v2903_v52  ;;  %5896 = vst [vmem:[#allocation68_spill] sm:$0xff] %v2907_v47  ;;  %v2928_v52 = vmul.f32 %v2580_v0, %v2896_v12  ;;  %v2940_v47 = vmul.f32 %v2585_v1, %v2799_v60  ;;  %v2965_v60 = vmul.f32 %v2585_v1, %v2868_v6  ;;  %v2987_v6 = vld [vmem:[%s2590_s9 + $0x160] sm:$0x3] }
  0x3d   : > { %5897 = vst [vmem:[#allocation69_spill] sm:$0xff] %v2918_v21  ;;  %5898 = vst [vmem:[#allocation70_spill] sm:$0xff] %v2921_v63  ;;  %v3026_v21 = vmul.f32 %v2585_v1, %v2899_v3  ;;  %v3046_v3 = vmul.f32 %v2585_v1, %v2946_v55 }
  0x3e   : > { %5899 = vst [vmem:[#allocation71_spill] sm:$0xff] %v2924_v62  ;;  %5900 = vst [vmem:[#allocation72_spill] sm:$0xff] %v2928_v52  ;;  %v2953_v52 = vmul.f32 %v2580_v0, %v2921_v63  ;;  %v3054_v63 = vmul.f32 %v2585_v1, %v2990_v42 }
  0x3f   : > { %5901 = vst [vmem:[#allocation73_spill] sm:$0xff] %v2932_v53  ;;  %5902 = vst [vmem:[#allocation74_spill] sm:$0xff] %v2943_v56  ;;  %v2957_v53 = vmul.f32 %v2580_v0, %v2924_v62 }
  0x40   : > { %5903 = vst [vmem:[#allocation75_spill] sm:$0xff] %v2946_v55  ;;  %5904 = vst [vmem:[#allocation76_spill] sm:$0xff] %v2949_v49  ;;  %v445_v55 = vrot.slane %v2674_v25, 1  ;;  %v453_v25 = vrot.slane %v2742_v44, 1 }
  0x41   : > { %5905 = vst [vmem:[#allocation77_spill] sm:$0xff] %v2953_v52  ;;  %5906 = vst [vmem:[#allocation78_spill] sm:$0xff] %v2957_v53  ;;  %v2976_v52 = vmul.f32 %v2580_v0, %v2949_v49  ;;  %v2980_v53 = vmul.f32 %v2585_v1, %v2821_v27  ;;  %v2998_v0 = vmul.f32 %v2585_v1, %v2846_v14 }
  0x42   : > { %5907 = vst [vmem:[#allocation79_spill] sm:$0xff] %v2968_v48  ;;  %5908 = vst [vmem:[#allocation80_spill] sm:$0xff] %v2972_v43  ;;  %v3002_v27 = vmul.f32 %v2585_v1, %v2849_v13  ;;  %v3018_v14 = vmul.f32 %v2585_v1, %v2943_v56  ;;  %v3022_v13 = vmul.f32 %v2585_v1, %v2896_v12  ;;  %v437_v43 = vrot.slane %v2620_v10, 1 }
  0x43   : > { %5909 = vst [vmem:[#allocation81_spill] sm:$0xff] %v2976_v52  ;;  %5910 = vst [vmem:[#allocation82_spill] sm:$0xff] %v2987_v6  ;;  %v3010_v52 = vmul.f32 %v2585_v1, %v2871_v5  ;;  %v3030_v5 = vmul.f32 %v2585_v1, %v2968_v48  ;;  %v3038_v56 = vmul.f32 %v2585_v1, %v2924_v62  ;;  %v438_v62 = vrot.slane %v2624_v11, 1 }
  0x44   : > { %5911 = vst [vmem:[#allocation83_spill] sm:$0xff] %v2990_v42  ;;  %v3042_v12 = vmul.f32 %v2585_v1, %v2987_v6  ;;  %v3050_v48 = vmul.f32 %v2585_v1, %v2949_v49  ;;  %v442_v6 = vrot.slane %v2649_v18, 1  ;;  %v448_v49 = vrot.slane %v2696_v31, 1 }
  0x45   : > { %v3065_v23 = vsel %vm436_vm0, %v437_v43, %v438_v62  ;;  %v3068_v1 = vsel %vm436_vm0, %v438_v62, %v440_v35  ;;  %v450_v10 = vrot.slane %v2717_v37, 1  ;;  %v452_v11 = vrot.slane %v2721_v38, 1 }
  0x46   : > { %v3073_v17 = vsel %vm436_vm0, %v442_v6, %v443_v29  ;;  %v3076_v18 = vsel %vm436_vm0, %v443_v29, %v445_v55  ;;  %v3079_v24 = vsel %vm436_vm0, %v447_v28, %v448_v49  ;;  %v455_v31 = vrot.slane %v2746_v45, 1 }
  0x47   : > { %v3083_v30 = vsel %vm436_vm0, %v448_v49, %v450_v10  ;;  %v457_v35 = vrot.slane %v2764_v50, 1  ;;  %v458_v37 = vrot.slane %v2768_v51, 1  ;;  %v3089_v6 = vsel %vm436_vm0, %v452_v11, %v453_v25 }
  0x48   : > { %v460_v29 = vrot.slane %v2789_v57, 1  ;;  %v462_v38 = vrot.slane %v2793_v58, 1  ;;  %v463_v28 = vrot.slane %v2814_v33, 1  ;;  %v3095_v43 = vsel %vm436_vm0, %v453_v25, %v455_v31 }
  0x49   : > { %v3098_v44 = vsel %vm436_vm0, %v457_v35, %v458_v37  ;;  %v465_v45 = vrot.slane %v2818_v32, 1  ;;  %v467_v49 = vrot.slane %v2836_v34, 1  ;;  %v468_v55 = vrot.slane %v2840_v39, 1 }
  0x4a   : > { %v461_v50 = vsel %vm436_vm0, %v458_v37, %v460_v29  ;;  %v464_v51 = vsel %vm436_vm0, %v462_v38, %v463_v28  ;;  %v470_v57 = vrot.slane %v2861_v41, 1  ;;  %v472_v58 = vrot.slane %v2865_v7, 1 }
  0x4b   : > { %v466_v33 = vsel %vm436_vm0, %v463_v28, %v465_v45  ;;  %v473_v62 = vrot.slane %v2886_v46, 1  ;;  %v475_v10 = vrot.slane %v2890_v2, 1  ;;  %v469_v32 = vsel %vm436_vm0, %v467_v49, %v468_v55 }
  0x4c   : > { %v471_v34 = vsel %vm436_vm0, %v468_v55, %v470_v57  ;;  %v477_v11 = vrot.slane %v2911_v59, 1  ;;  %v478_v25 = vrot.slane %v2915_v20, 1  ;;  %v480_v31 = vrot.slane %v2936_v54, 1 }
  0x4d   : > { %v474_v39 = vsel %vm436_vm0, %v472_v58, %v473_v62  ;;  %v476_v41 = vsel %vm436_vm0, %v473_v62, %v475_v10  ;;  %v482_v7 = vrot.slane %v2940_v47, 1  ;;  %v483_v2 = vrot.slane %v2961_v19, 1 }
  0x4e   : > { %v479_v46 = vsel %vm436_vm0, %v477_v11, %v478_v25  ;;  %v485_v35 = vrot.slane %v2965_v60, 1  ;;  %v487_v37 = vrot.slane %v2980_v53, 1  ;;  %v481_v59 = vsel %vm436_vm0, %v478_v25, %v480_v31 }
  0x4f   : > { %v488_v20 = vrot.slane %v2984_v61, 1  ;;  %v490_v29 = vrot.slane %v2994_v36, 1  ;;  %v492_v38 = vrot.slane %v2998_v0, 1  ;;  %v484_v54 = vsel %vm436_vm0, %v482_v7, %v483_v2  ;;  %v5920_v7 = vld [vmem:[#allocation25_spill] sm:$0xff] }
  0x50   : > { %v486_v47 = vsel %vm436_vm0, %v483_v2, %v485_v35  ;;  %v493_v28 = vrot.slane %v3002_v27, 1  ;;  %v495_v19 = vrot.slane %v3006_v26, 1  ;;  %v497_v45 = vrot.slane %v3010_v52, 1 }
  0x51   : > { %v489_v60 = vsel %vm436_vm0, %v487_v37, %v488_v20  ;;  %v491_v53 = vsel %vm436_vm0, %v488_v20, %v490_v29  ;;  %v498_v61 = vrot.slane %v3014_v40, 1  ;;  %v500_v49 = vrot.slane %v3018_v14, 1  ;;  %v5930_v37 = vld [vmem:[#allocation38_spill] sm:$0xff]  ;;  %v5932_v20 = vld [vmem:[#allocation39_spill] sm:$0xff] }
  0x52   : > { %v494_v36 = vsel %vm436_vm0, %v492_v38, %v493_v28  ;;  %v496_v0 = vsel %vm436_vm0, %v493_v28, %v495_v19  ;;  %v502_v55 = vrot.slane %v3022_v13, 1  ;;  %v503_v26 = vrot.slane %v3026_v21, 1 }
  0x53   : > { %v499_v27 = vsel %vm436_vm0, %v497_v45, %v498_v61  ;;  %v505_v57 = vrot.slane %v3030_v5, 1  ;;  %v507_v58 = vrot.slane %v3034_v4, 1  ;;  %v501_v52 = vsel %vm436_vm0, %v498_v61, %v500_v49 }
  0x54   : > { %v508_v40 = vrot.slane %v3038_v56, 1  ;;  %v510_v62 = vrot.slane %v3042_v12, 1  ;;  %v512_v10 = vrot.slane %v3046_v3, 1  ;;  %v504_v14 = vsel %vm436_vm0, %v502_v55, %v503_v26 }
  0x55   : > { %v506_v13 = vsel %vm436_vm0, %v503_v26, %v505_v57  ;;  %v513_v11 = vrot.slane %v3050_v48, 1  ;;  %v515_v21 = vrot.slane %v3054_v63, 1  ;;  %v3154_v25 = vadd.f32 %v3065_v23, %v2612_v8  ;;  %v5916_v23 = vld [vmem:[#allocation21_spill] sm:$0xff] }
  0x56   : > { %v509_v5 = vsel %vm436_vm0, %v507_v58, %v508_v40  ;;  %v511_v4 = vsel %vm436_vm0, %v508_v40, %v510_v62  ;;  %v3158_v12 = vadd.f32 %v3068_v1, %v2616_v9  ;;  %v3164_v48 = vadd.f32 %v3073_v17, %v2637_v15  ;;  %v5918_v1 = vld [vmem:[#allocation24_spill] sm:$0xff]  ;;  %v5922_v17 = vld [vmem:[#allocation29_spill] sm:$0xff] }
  0x57   : > { %v514_v3 = vsel %vm436_vm0, %v512_v10, %v513_v11  ;;  %v516_v56 = vsel %vm436_vm0, %v513_v11, %v515_v21  ;;  %v3168_v63 = vadd.f32 %v3076_v18, %v2641_v16  ;;  %v3172_v8 = vadd.f32 %v3079_v24, %v2662_v22  ;;  %v5924_v18 = vld [vmem:[#allocation30_spill] sm:$0xff] }
  0x58   : > { %5912 = vst [vmem:[#allocation84_spill] sm:$0xff] %v3158_v12  ;;  %5913 = vst [vmem:[#allocation85_spill] sm:$0xff] %v3164_v48  ;;  %v3176_v9 = vadd.f32 %v3083_v30, %v5916_v23  ;;  %v3180_v31 = vadd.f32 %v3089_v6, %v5918_v1  ;;  %v3184_v15 = vadd.f32 %v3095_v43, %v5920_v7  ;;  %v5926_v22 = vld [vmem:[#allocation34_spill] sm:$0xff]  ;;  %v5928_v30 = vld [vmem:[#allocation35_spill] sm:$0xff] }
  0x59   : > { %5914 = vst [vmem:[#allocation86_spill] sm:$0xff] %v3168_v63  ;;  %5915 = vst [vmem:[#allocation87_spill] sm:$0xff] %v3172_v8  ;;  %v3188_v16 = vadd.f32 %v3098_v44, %v5922_v17  ;;  %v3191_v2 = vadd.f32 %v461_v50, %v5924_v18  ;;  %v3194_v24 = vadd.f32 %v464_v51, %v5926_v22  ;;  %v5934_v43 = vld [vmem:[#allocation43_spill] sm:$0xff]  ;;  %v5936_v44 = vld [vmem:[#allocation44_spill] sm:$0xff] }
  0x5a   : > { %5917 = vst [vmem:[#allocation21_spill] sm:$0xff] %v3176_v9  ;;  %5919 = vst [vmem:[#allocation24_spill] sm:$0xff] %v3180_v31  ;;  %v3197_v35 = vadd.f32 %v466_v33, %v5928_v30  ;;  %v3200_v6 = vadd.f32 %v469_v32, %v5930_v37  ;;  %v3203_v29 = vadd.f32 %v471_v34, %v5932_v20  ;;  %v5938_v50 = vld [vmem:[#allocation48_spill] sm:$0xff]  ;;  %v5940_v51 = vld [vmem:[#allocation49_spill] sm:$0xff] }
  0x5b   : > { %5921 = vst [vmem:[#allocation25_spill] sm:$0xff] %v3184_v15  ;;  %5923 = vst [vmem:[#allocation29_spill] sm:$0xff] %v3188_v16  ;;  %v3206_v38 = vadd.f32 %v474_v39, %v5934_v43  ;;  %v3209_v28 = vadd.f32 %v476_v41, %v5936_v44  ;;  %v3212_v19 = vadd.f32 %v479_v46, %v5938_v50  ;;  %v5942_v33 = vld [vmem:[#allocation52_spill] sm:$0xff]  ;;  %v5944_v32 = vld [vmem:[#allocation53_spill] sm:$0xff] }
  0x5c   : > { %5925 = vst [vmem:[#allocation30_spill] sm:$0xff] %v3191_v2  ;;  %5927 = vst [vmem:[#allocation34_spill] sm:$0xff] %v3194_v24  ;;  %v3215_v45 = vadd.f32 %v481_v59, %v5940_v51  ;;  %v3218_v61 = vadd.f32 %v484_v54, %v5942_v33  ;;  %v3221_v49 = vadd.f32 %v486_v47, %v5944_v32  ;;  %v5946_v34 = vld [vmem:[#allocation57_spill] sm:$0xff]  ;;  %v5948_v39 = vld [vmem:[#allocation58_spill] sm:$0xff] }
  0x5d   : > { %5929 = vst [vmem:[#allocation35_spill] sm:$0xff] %v3197_v35  ;;  %5931 = vst [vmem:[#allocation38_spill] sm:$0xff] %v3200_v6  ;;  %v3224_v55 = vadd.f32 %v489_v60, %v5946_v34  ;;  %v3227_v26 = vadd.f32 %v491_v53, %v5948_v39  ;;  %v5950_v41 = vld [vmem:[#allocation62_spill] sm:$0xff]  ;;  %v5952_v46 = vld [vmem:[#allocation63_spill] sm:$0xff] }
  0x5e   : > { %5933 = vst [vmem:[#allocation39_spill] sm:$0xff] %v3203_v29  ;;  %5935 = vst [vmem:[#allocation43_spill] sm:$0xff] %v3206_v38  ;;  %v3230_v57 = vadd.f32 %v494_v36, %v5950_v41  ;;  %v3233_v58 = vadd.f32 %v496_v0, %v5952_v46  ;;  %v2256_v59 = vld [vmem:[%s5646_s1 + $0x2] ss:$0 sm:$0xff]  ;;  %v5954_v54 = vld [vmem:[#allocation67_spill] sm:$0xff] }
  0x5f   : > { %5937 = vst [vmem:[#allocation44_spill] sm:$0xff] %v3209_v28  ;;  %5939 = vst [vmem:[#allocation48_spill] sm:$0xff] %v3212_v19  ;;  %v3239_v40 = vadd.f32 %v499_v27, %v5954_v54  ;;  %v5956_v47 = vld [vmem:[#allocation68_spill] sm:$0xff]  ;;  %v5960_v53 = vld [vmem:[#allocation73_spill] sm:$0xff] }
  0x60   : > { %5941 = vst [vmem:[#allocation49_spill] sm:$0xff] %v3215_v45  ;;  %5943 = vst [vmem:[#allocation52_spill] sm:$0xff] %v3218_v61  ;;  %v3242_v62 = vadd.f32 %v501_v52, %v5956_v47  ;;  %v5958_v60 = vld [vmem:[#allocation72_spill] sm:$0xff]  ;;  %v3248_v11 = vadd.f32 %v506_v13, %v5960_v53  ;;  %v5962_v36 = vld [vmem:[#allocation77_spill] sm:$0xff] }
  0x61   : > { %5945 = vst [vmem:[#allocation53_spill] sm:$0xff] %v3221_v49  ;;  %5947 = vst [vmem:[#allocation57_spill] sm:$0xff] %v3224_v55  ;;  %v3245_v10 = vadd.f32 %v504_v14, %v5958_v60  ;;  %v3251_v21 = vadd.f32 %v509_v5, %v5962_v36  ;;  %v5964_v0 = vld [vmem:[#allocation78_spill] sm:$0xff]  ;;  %v5966_v1 = vld [vmem:[#allocation80_spill] sm:$0xff] }
  0x62   : > { %5949 = vst [vmem:[#allocation58_spill] sm:$0xff] %v3227_v26  ;;  %5951 = vst [vmem:[#allocation62_spill] sm:$0xff] %v3230_v57  ;;  %v3254_v23 = vadd.f32 %v511_v4, %v5964_v0  ;;  %v3257_v7 = vadd.f32 %v514_v3, %v5966_v1  ;;  %v5968_v27 = vld [vmem:[#allocation81_spill] sm:$0xff]  ;;  %v5971_v22 = vld [vmem:[#allocation10_spill] sm:$0xff] }
  0x63   : > { %5953 = vst [vmem:[#allocation63_spill] sm:$0xff] %v3233_v58  ;;  %5955 = vst [vmem:[#allocation67_spill] sm:$0xff] %v3239_v40  ;;  %v3260_v17 = vadd.f32 %v516_v56, %v5968_v27  ;;  %v5970_v52 = vld [vmem:[#allocation9_spill] sm:$0xff]  ;;  %v587_v14 = vmul.f32 %v2256_v59, %v5971_v22  ;;  %v5972_v30 = vld [vmem:[#allocation11_spill] sm:$0xff] }
  0x64   : > { %5957 = vst [vmem:[#allocation68_spill] sm:$0xff] %v3242_v62  ;;  %5959 = vst [vmem:[#allocation72_spill] sm:$0xff] %v3245_v10  ;;  %v586_v18 = vmul.f32 %v2256_v59, %v5970_v52  ;;  %v588_v37 = vmul.f32 %v2256_v59, %v5972_v30  ;;  %v5973_v13 = vld [vmem:[#allocation12_spill] sm:$0xff]  ;;  %v5974_v43 = vld [vmem:[#allocation13_spill] sm:$0xff] }
  0x65   : > { %5961 = vst [vmem:[#allocation73_spill] sm:$0xff] %v3248_v11  ;;  %5963 = vst [vmem:[#allocation77_spill] sm:$0xff] %v3251_v21  ;;  %v589_v20 = vmul.f32 %v2256_v59, %v5973_v13  ;;  %v590_v5 = vmul.f32 %v2256_v59, %v5974_v43  ;;  %v5975_v44 = vld [vmem:[#allocation14_spill] sm:$0xff]  ;;  %v5976_v4 = vld [vmem:[#allocation15_spill] sm:$0xff]  ;;  %v684_v15 = vrot.slane %v587_v14, 2 }
  0x66   : > { %5965 = vst [vmem:[#allocation78_spill] sm:$0xff] %v3254_v23  ;;  %5967 = vst [vmem:[#allocation80_spill] sm:$0xff] %v3257_v7  ;;  %v591_v50 = vmul.f32 %v2256_v59, %v5975_v44  ;;  %v592_v51 = vmul.f32 %v2256_v59, %v5976_v4  ;;  %v5977_v33 = vld [vmem:[#allocation16_spill] sm:$0xff]  ;;  %v5978_v32 = vld [vmem:[#allocation17_spill] sm:$0xff]  ;;  %v686_v31 = vrot.slane %v588_v37, 2 }
  0x67   : > { %5969 = vst [vmem:[#allocation81_spill] sm:$0xff] %v3260_v17  ;;  %v593_v3 = vmul.f32 %v2256_v59, %v5977_v33  ;;  %v594_v34 = vmul.f32 %v2256_v59, %v5978_v32  ;;  %v5979_v56 = vld [vmem:[#allocation18_spill] sm:$0xff]  ;;  %v5980_v41 = vld [vmem:[#allocation19_spill] sm:$0xff]  ;;  %v5981_v54 = vld [vmem:[#allocation20_spill] sm:$0xff]  ;;  %v689_v9 = vrot.slane %v590_v5, 2 }
  0x68   : > { %v595_v39 = vmul.f32 %v2256_v59, %v5979_v56  ;;  %v3273_v46 = vmul.f32 %v2256_v59, %v5980_v41  ;;  %v3276_v47 = vmul.f32 %v2256_v59, %v5981_v54  ;;  %v5982_v60 = vld [vmem:[#allocation22_spill] sm:$0xff]  ;;  %v5983_v36 = vld [vmem:[#allocation23_spill] sm:$0xff]  ;;  %v5986_v30 = vld [vmem:[#allocation28_spill] sm:$0xff]  ;;  %v691_v8 = vrot.slane %v591_v50, 2 }
  0x69   : > { %v3279_v53 = vmul.f32 %v2256_v59, %v5982_v60  ;;  %v3282_v0 = vmul.f32 %v2256_v59, %v5983_v36  ;;  %v5984_v1 = vld [vmem:[#allocation26_spill] sm:$0xff]  ;;  %v5985_v52 = vld [vmem:[#allocation27_spill] sm:$0xff]  ;;  %v3291_v32 = vmul.f32 %v2256_v59, %v5986_v30  ;;  %v5988_v54 = vld [vmem:[#allocation32_spill] sm:$0xff]  ;;  %v694_v63 = vrot.slane %v593_v3, 2 }
  0x6a   : > { %v3285_v27 = vmul.f32 %v2256_v59, %v5984_v1  ;;  %v3288_v22 = vmul.f32 %v2256_v59, %v5985_v52  ;;  %v5987_v44 = vld [vmem:[#allocation31_spill] sm:$0xff]  ;;  %v3297_v56 = vmul.f32 %v2256_v59, %v5988_v54  ;;  %v5989_v60 = vld [vmem:[#allocation33_spill] sm:$0xff]  ;;  %v5990_v36 = vld [vmem:[#allocation40_spill] sm:$0xff]  ;;  %v696_v48 = vrot.slane %v594_v34, 2 }
  0x6b   : > { %v3294_v41 = vmul.f32 %v2256_v59, %v5987_v44  ;;  %v3300_v33 = vmul.f32 %v2256_v59, %v5989_v60  ;;  %v3303_v4 = vmul.f32 %v2256_v59, %v5990_v36  ;;  %v5991_v1 = vld [vmem:[#allocation36_spill] sm:$0xff]  ;;  %v5992_v52 = vld [vmem:[#allocation37_spill] sm:$0xff]  ;;  %v5995_v54 = vld [vmem:[#allocation42_spill] sm:$0xff]  ;;  %v699_v14 = vrot.slane %v3273_v46, 2 }
  0x6c   : > { %v3306_v43 = vmul.f32 %v2256_v59, %v5991_v1  ;;  %v3309_v13 = vmul.f32 %v2256_v59, %v5992_v52  ;;  %v5993_v30 = vld [vmem:[#allocation45_spill] sm:$0xff]  ;;  %v3318_v23 = vmul.f32 %v2256_v59, %v5995_v54  ;;  %v5996_v60 = vld [vmem:[#allocation54_spill] sm:$0xff]  ;;  %v5998_v1 = vld [vmem:[#allocation47_spill] sm:$0xff]  ;;  %v3403_v37 = vsel %vm682_vm1, %v694_v63, %v696_v48 }
  0x6d   : > { %v3312_v17 = vmul.f32 %v2256_v59, %v5993_v30  ;;  %v5994_v44 = vld [vmem:[#allocation41_spill] sm:$0xff]  ;;  %v3321_v21 = vmul.f32 %v2256_v59, %v5996_v60  ;;  %v5997_v36 = vld [vmem:[#allocation46_spill] sm:$0xff]  ;;  %v3327_v10 = vmul.f32 %v2256_v59, %v5998_v1  ;;  %v5999_v52 = vld [vmem:[#allocation59_spill] sm:$0xff]  ;;  %v709_v50 = vrot.slane %v3291_v32, 2 }
  0x6e   : > { %v3315_v7 = vmul.f32 %v2256_v59, %v5994_v44  ;;  %v3324_v11 = vmul.f32 %v2256_v59, %v5997_v36  ;;  %v3330_v62 = vmul.f32 %v2256_v59, %v5999_v52  ;;  %v6000_v30 = vld [vmem:[#allocation50_spill] sm:$0xff]  ;;  %v6001_v44 = vld [vmem:[#allocation51_spill] sm:$0xff]  ;;  %v6002_v54 = vld [vmem:[#allocation64_spill] sm:$0xff]  ;;  %v713_v3 = vrot.slane %v3297_v56, 2 }
  0x6f   : > { %v3333_v40 = vmul.f32 %v2256_v59, %v6000_v30  ;;  %v3336_v58 = vmul.f32 %v2256_v59, %v6001_v44  ;;  %v3339_v57 = vmul.f32 %v2256_v59, %v6002_v54  ;;  %v6003_v60 = vld [vmem:[#allocation55_spill] sm:$0xff]  ;;  %v6004_v36 = vld [vmem:[#allocation56_spill] sm:$0xff]  ;;  %v6005_v1 = vld [vmem:[#allocation69_spill] sm:$0xff]  ;;  %v714_v46 = vrot.slane %v3300_v33, 2 }
  0x70   : > { %v3342_v26 = vmul.f32 %v2256_v59, %v6003_v60  ;;  %v3345_v55 = vmul.f32 %v2256_v59, %v6004_v36  ;;  %v3348_v49 = vmul.f32 %v2256_v59, %v6005_v1  ;;  %v6006_v52 = vld [vmem:[#allocation60_spill] sm:$0xff]  ;;  %v6007_v30 = vld [vmem:[#allocation61_spill] sm:$0xff]  ;;  %v6008_v44 = vld [vmem:[#allocation74_spill] sm:$0xff] }
  0x71   : > { %v3351_v61 = vmul.f32 %v2256_v59, %v6006_v52  ;;  %v3354_v45 = vmul.f32 %v2256_v59, %v6007_v30  ;;  %v3357_v19 = vmul.f32 %v2256_v59, %v6008_v44  ;;  %v6009_v54 = vld [vmem:[#allocation65_spill] sm:$0xff]  ;;  %v6010_v60 = vld [vmem:[#allocation66_spill] sm:$0xff]  ;;  %v6011_v36 = vld [vmem:[#allocation79_spill] sm:$0xff] }
  0x72   : > { %v3360_v28 = vmul.f32 %v2256_v59, %v6009_v54  ;;  %v3363_v38 = vmul.f32 %v2256_v59, %v6010_v60  ;;  %v3366_v29 = vmul.f32 %v2256_v59, %v6011_v36  ;;  %v6012_v1 = vld [vmem:[#allocation70_spill] sm:$0xff]  ;;  %v6013_v52 = vld [vmem:[#allocation71_spill] sm:$0xff]  ;;  %v6016_v54 = vld [vmem:[#allocation76_spill] sm:$0xff]  ;;  %v3384_v60 = vmul.f32 %v2256_v59, %v2990_v42 }
  0x73   : > { %v3369_v6 = vmul.f32 %v2256_v59, %v6012_v1  ;;  %v3372_v35 = vmul.f32 %v2256_v59, %v6013_v52  ;;  %v6014_v30 = vld [vmem:[#allocation82_spill] sm:$0xff]  ;;  %v6015_v44 = vld [vmem:[#allocation75_spill] sm:$0xff]  ;;  %v3381_v16 = vmul.f32 %v2256_v59, %v6016_v54  ;;  %v683_v36 = vrot.slane %v586_v18, 2 }
  0x74   : > { %v3375_v24 = vmul.f32 %v2256_v59, %v6014_v30  ;;  %v3378_v2 = vmul.f32 %v2256_v59, %v6015_v44  ;;  %v688_v1 = vrot.slane %v589_v20, 2  ;;  %v693_v52 = vrot.slane %v592_v51, 2  ;;  %v6074_v42 = vld [vmem:[#allocation42_spill] sm:$0xff] }
  0x75   : > { %v3387_v30 = vsel %vm682_vm1, %v683_v36, %v684_v15  ;;  %v3390_v44 = vsel %vm682_vm1, %v684_v15, %v686_v31  ;;  %v698_v54 = vrot.slane %v595_v39, 2  ;;  %v3396_v59 = vsel %vm682_vm1, %v689_v9, %v691_v8 }
  0x76   : > { %v3393_v12 = vsel %vm682_vm1, %v688_v1, %v689_v9  ;;  %v3399_v18 = vsel %vm682_vm1, %v693_v52, %v694_v63  ;;  %v701_v20 = vrot.slane %v3276_v47, 2  ;;  %v703_v31 = vrot.slane %v3279_v53, 2 }
  0x77   : > { %v704_v15 = vrot.slane %v3282_v0, 2  ;;  %v3409_v5 = vsel %vm682_vm1, %v698_v54, %v699_v14  ;;  %v706_v8 = vrot.slane %v3285_v27, 2  ;;  %v708_v9 = vrot.slane %v3288_v22, 2 }
  0x78   : > { %v3415_v51 = vsel %vm682_vm1, %v699_v14, %v701_v20  ;;  %v711_v63 = vrot.slane %v3294_v41, 2  ;;  %v716_v54 = vrot.slane %v3303_v4, 2  ;;  %v718_v47 = vrot.slane %v3306_v43, 2 }
  0x79   : > { %v3418_v48 = vsel %vm682_vm1, %v703_v31, %v704_v15  ;;  %v707_v34 = vsel %vm682_vm1, %v704_v15, %v706_v8  ;;  %v710_v39 = vsel %vm682_vm1, %v708_v9, %v709_v50  ;;  %v719_v53 = vrot.slane %v3309_v13, 2 }
  0x7a   : > { %v712_v32 = vsel %vm682_vm1, %v709_v50, %v711_v63  ;;  %v721_v36 = vrot.slane %v3312_v17, 2  ;;  %v715_v41 = vsel %vm682_vm1, %v713_v3, %v714_v46  ;;  %v717_v56 = vsel %vm682_vm1, %v714_v46, %v716_v54 }
  0x7b   : > { %v723_v0 = vrot.slane %v3315_v7, 2  ;;  %v724_v1 = vrot.slane %v3318_v23, 2  ;;  %v720_v33 = vsel %vm682_vm1, %v718_v47, %v719_v53  ;;  %v726_v27 = vrot.slane %v3321_v21, 2 }
  0x7c   : > { %v722_v4 = vsel %vm682_vm1, %v719_v53, %v721_v36  ;;  %v728_v43 = vrot.slane %v3324_v11, 2  ;;  %v729_v17 = vrot.slane %v3327_v10, 2  ;;  %v731_v52 = vrot.slane %v3330_v62, 2  ;;  %v6018_v36 = vld [vmem:[#allocation85_spill] sm:$0xff] }
  0x7d   : > { %v725_v13 = vsel %vm682_vm1, %v723_v0, %v724_v1  ;;  %v733_v22 = vrot.slane %v3333_v40, 2  ;;  %v727_v7 = vsel %vm682_vm1, %v724_v1, %v726_v27  ;;  %v734_v23 = vrot.slane %v3336_v58, 2  ;;  %v6020_v1 = vld [vmem:[#allocation87_spill] sm:$0xff]  ;;  %v6022_v27 = vld [vmem:[#allocation24_spill] sm:$0xff] }
  0x7e   : > { %v736_v14 = vrot.slane %v3339_v57, 2  ;;  %v738_v20 = vrot.slane %v3342_v26, 2  ;;  %v730_v21 = vsel %vm682_vm1, %v728_v43, %v729_v17  ;;  %v732_v11 = vsel %vm682_vm1, %v729_v17, %v731_v52  ;;  %v6023_v17 = vld [vmem:[#allocation25_spill] sm:$0xff] }
  0x7f   : > { %v739_v31 = vrot.slane %v3345_v55, 2  ;;  %v741_v10 = vrot.slane %v3348_v49, 2  ;;  %v735_v62 = vsel %vm682_vm1, %v733_v22, %v734_v23  ;;  %v743_v15 = vrot.slane %v3351_v61, 2  ;;  %v6024_v52 = vld [vmem:[#allocation29_spill] sm:$0xff]  ;;  %v6025_v22 = vld [vmem:[#allocation30_spill] sm:$0xff] }
  0x80   : > { %v737_v40 = vsel %vm682_vm1, %v734_v23, %v736_v14  ;;  %v744_v58 = vrot.slane %v3354_v45, 2  ;;  %v746_v8 = vrot.slane %v3357_v19, 2  ;;  %v748_v9 = vrot.slane %v3360_v28, 2 }
  0x81   : > { %v740_v57 = vsel %vm682_vm1, %v738_v20, %v739_v31  ;;  %v742_v26 = vsel %vm682_vm1, %v739_v31, %v741_v10  ;;  %v749_v49 = vrot.slane %v3363_v38, 2  ;;  %v751_v50 = vrot.slane %v3366_v29, 2  ;;  %v6028_v31 = vld [vmem:[#allocation38_spill] sm:$0xff]  ;;  %v6029_v10 = vld [vmem:[#allocation39_spill] sm:$0xff] }
  0x82   : > { %v745_v55 = vsel %vm682_vm1, %v743_v15, %v744_v58  ;;  %v753_v63 = vrot.slane %v3369_v6, 2  ;;  %v747_v61 = vsel %vm682_vm1, %v744_v58, %v746_v8  ;;  %v754_v45 = vrot.slane %v3372_v35, 2  ;;  %v6017_v35 = vld [vmem:[#allocation84_spill] sm:$0xff] }
  0x83   : > { %v756_v3 = vrot.slane %v3375_v24, 2  ;;  %v758_v46 = vrot.slane %v3378_v2, 2  ;;  %v750_v19 = vsel %vm682_vm1, %v748_v9, %v749_v49  ;;  %v752_v28 = vsel %vm682_vm1, %v749_v49, %v751_v50 }
  0x84   : > { %v759_v54 = vrot.slane %v3381_v16, 2  ;;  %v761_v38 = vrot.slane %v3384_v60, 2  ;;  %v755_v29 = vsel %vm682_vm1, %v753_v63, %v754_v45  ;;  %v3474_v47 = vadd.f32 %v3387_v30, %v3154_v25  ;;  %v6019_v60 = vld [vmem:[#allocation86_spill] sm:$0xff]  ;;  %v6021_v30 = vld [vmem:[#allocation21_spill] sm:$0xff] }
  0x85   : > { %v757_v6 = vsel %vm682_vm1, %v754_v45, %v756_v3  ;;  %v3478_v24 = vadd.f32 %v3390_v44, %v6017_v35  ;;  %v3484_v16 = vadd.f32 %v3393_v12, %v6018_v36  ;;  %v3488_v0 = vadd.f32 %v3396_v59, %v6019_v60 }
  0x86   : > { %v760_v2 = vsel %vm682_vm1, %v758_v46, %v759_v54  ;;  %v762_v53 = vsel %vm682_vm1, %v759_v54, %v761_v38  ;;  %v3492_v25 = vadd.f32 %v3399_v18, %v6020_v1  ;;  %v3496_v44 = vadd.f32 %v3403_v37, %v6021_v30  ;;  %v6026_v18 = vld [vmem:[#allocation34_spill] sm:$0xff]  ;;  %v6027_v37 = vld [vmem:[#allocation35_spill] sm:$0xff] }
  0x87   : > { %v3500_v43 = vadd.f32 %v3409_v5, %v6022_v27  ;;  %v3504_v12 = vadd.f32 %v3415_v51, %v6023_v17  ;;  %v3508_v59 = vadd.f32 %v3418_v48, %v6024_v52  ;;  %v3511_v23 = vadd.f32 %v707_v34, %v6025_v22  ;;  %v6030_v51 = vld [vmem:[#allocation43_spill] sm:$0xff]  ;;  %v6031_v48 = vld [vmem:[#allocation44_spill] sm:$0xff] }
  0x88   : > { %v3514_v14 = vadd.f32 %v710_v39, %v6026_v18  ;;  %v3517_v20 = vadd.f32 %v712_v32, %v6027_v37  ;;  %v3520_v5 = vadd.f32 %v715_v41, %v6028_v31  ;;  %v3523_v15 = vadd.f32 %v717_v56, %v6029_v10  ;;  %v6032_v34 = vld [vmem:[#allocation48_spill] sm:$0xff]  ;;  %v6033_v39 = vld [vmem:[#allocation49_spill] sm:$0xff]  ;;  %v6061_v37 = vld [vmem:[#allocation15_spill] sm:$0xff] }
  0x89   : > { %v3526_v58 = vadd.f32 %v720_v33, %v6030_v51  ;;  %v3529_v8 = vadd.f32 %v722_v4, %v6031_v48  ;;  %v3532_v9 = vadd.f32 %v725_v13, %v6032_v34  ;;  %v3535_v49 = vadd.f32 %v727_v7, %v6033_v39  ;;  %v6034_v32 = vld [vmem:[#allocation52_spill] sm:$0xff]  ;;  %v6035_v41 = vld [vmem:[#allocation53_spill] sm:$0xff]  ;;  %v6037_v33 = vld [vmem:[#allocation58_spill] sm:$0xff] }
  0x8a   : > { %v3538_v50 = vadd.f32 %v730_v21, %v6034_v32  ;;  %v3541_v63 = vadd.f32 %v732_v11, %v6035_v41  ;;  %v6036_v56 = vld [vmem:[#allocation57_spill] sm:$0xff]  ;;  %v3547_v3 = vadd.f32 %v737_v40, %v6037_v33  ;;  %v6039_v4 = vld [vmem:[#allocation62_spill] sm:$0xff]  ;;  %v6041_v13 = vld [vmem:[#allocation63_spill] sm:$0xff] }
  0x8b   : > { %v3544_v45 = vadd.f32 %v735_v62, %v6036_v56  ;;  %v3550_v46 = vadd.f32 %v740_v57, %v6039_v4  ;;  %v3553_v54 = vadd.f32 %v742_v26, %v6041_v13  ;;  %v2257_v7 = vld [vmem:[%s5646_s1 + $0x3] ss:$0 sm:$0xff]  ;;  %v6043_v21 = vld [vmem:[#allocation67_spill] sm:$0xff]  ;;  %v6049_v40 = vld [vmem:[#allocation73_spill] sm:$0xff] }
  0x8c   : > { %6038 = vst [vmem:[#allocation9_spill] sm:$0xff] %v3547_v3  ;;  %v3559_v38 = vadd.f32 %v745_v55, %v6043_v21  ;;  %v6045_v11 = vld [vmem:[#allocation68_spill] sm:$0xff]  ;;  %v3568_v60 = vadd.f32 %v752_v28, %v6049_v40  ;;  %v6051_v57 = vld [vmem:[#allocation77_spill] sm:$0xff]  ;;  %v6053_v26 = vld [vmem:[#allocation78_spill] sm:$0xff]  ;;  %v834_v28 = vmul.f32 %v2257_v7, %v6061_v37 }
  0x8d   : > { %6040 = vst [vmem:[#allocation10_spill] sm:$0xff] %v3550_v46  ;;  %6042 = vst [vmem:[#allocation11_spill] sm:$0xff] %v3553_v54  ;;  %v3562_v35 = vadd.f32 %v747_v61, %v6045_v11  ;;  %v6047_v62 = vld [vmem:[#allocation72_spill] sm:$0xff]  ;;  %v3571_v1 = vadd.f32 %v755_v29, %v6051_v57  ;;  %v3574_v30 = vadd.f32 %v757_v6, %v6053_v26  ;;  %v6057_v55 = vld [vmem:[#allocation81_spill] sm:$0xff] }
  0x8e   : > { %6044 = vst [vmem:[#allocation84_spill] sm:$0xff] %v3559_v38  ;;  %v3565_v36 = vadd.f32 %v750_v19, %v6047_v62  ;;  %6050 = vst [vmem:[#allocation87_spill] sm:$0xff] %v3568_v60  ;;  %v6055_v27 = vld [vmem:[#allocation80_spill] sm:$0xff]  ;;  %v3580_v52 = vadd.f32 %v762_v53, %v6057_v55  ;;  %v6060_v18 = vld [vmem:[#allocation13_spill] sm:$0xff] }
  0x8f   : > { %6046 = vst [vmem:[#allocation85_spill] sm:$0xff] %v3562_v35  ;;  %6052 = vst [vmem:[#allocation21_spill] sm:$0xff] %v3571_v1  ;;  %v3577_v17 = vadd.f32 %v760_v2, %v6055_v27  ;;  %v6059_v61 = vld [vmem:[#allocation12_spill] sm:$0xff]  ;;  %v833_v19 = vmul.f32 %v2257_v7, %v6060_v18  ;;  %v6063_v10 = vld [vmem:[#allocation18_spill] sm:$0xff] }
  0x90   : > { %6048 = vst [vmem:[#allocation86_spill] sm:$0xff] %v3565_v36  ;;  %6054 = vst [vmem:[#allocation24_spill] sm:$0xff] %v3574_v30  ;;  %v832_v22 = vmul.f32 %v2257_v7, %v6059_v61  ;;  %v6062_v31 = vld [vmem:[#allocation16_spill] sm:$0xff]  ;;  %v836_v51 = vmul.f32 %v2257_v7, %v6063_v10  ;;  %v6064_v6 = vld [vmem:[#allocation19_spill] sm:$0xff] }
  0x91   : > { %6056 = vst [vmem:[#allocation25_spill] sm:$0xff] %v3577_v17  ;;  %6058 = vst [vmem:[#allocation29_spill] sm:$0xff] %v3580_v52  ;;  %v835_v29 = vmul.f32 %v2257_v7, %v6062_v31  ;;  %v837_v48 = vmul.f32 %v2257_v7, %v6064_v6  ;;  %v6065_v34 = vld [vmem:[#allocation22_spill] sm:$0xff]  ;;  %v6066_v39 = vld [vmem:[#allocation23_spill] sm:$0xff]  ;;  %v847_v6 = vmul.f32 %v2257_v7, %v6074_v42 }
  0x92   : > { %v838_v2 = vmul.f32 %v2257_v7, %v6065_v34  ;;  %v839_v32 = vmul.f32 %v2257_v7, %v6066_v39  ;;  %v6067_v53 = vld [vmem:[#allocation27_spill] sm:$0xff]  ;;  %v6068_v56 = vld [vmem:[#allocation28_spill] sm:$0xff]  ;;  %v6070_v21 = vld [vmem:[#allocation33_spill] sm:$0xff] }
  0x93   : > { %v840_v41 = vmul.f32 %v2257_v7, %v6067_v53  ;;  %v841_v33 = vmul.f32 %v2257_v7, %v6068_v56  ;;  %v6069_v4 = vld [vmem:[#allocation32_spill] sm:$0xff]  ;;  %v843_v11 = vmul.f32 %v2257_v7, %v6070_v21  ;;  %v6072_v57 = vld [vmem:[#allocation37_spill] sm:$0xff]  ;;  %v6077_v39 = vld [vmem:[#allocation46_spill] sm:$0xff] }
  0x94   : > { %v842_v13 = vmul.f32 %v2257_v7, %v6069_v4  ;;  %v6071_v62 = vld [vmem:[#allocation36_spill] sm:$0xff]  ;;  %v845_v26 = vmul.f32 %v2257_v7, %v6072_v57  ;;  %v6073_v27 = vld [vmem:[#allocation41_spill] sm:$0xff]  ;;  %v848_v53 = vmul.f32 %v2257_v7, %v6077_v39  ;;  %v6078_v31 = vld [vmem:[#allocation47_spill] sm:$0xff] }
  0x95   : > { %v844_v40 = vmul.f32 %v2257_v7, %v6071_v62  ;;  %v846_v55 = vmul.f32 %v2257_v7, %v6073_v27  ;;  %v3599_v10 = vld [vmem:[%s2590_s9 + $0x180] sm:$0xff]  ;;  %v3602_v34 = vld [vmem:[%s2590_s9 + $0x188] sm:$0xff]  ;;  %v849_v56 = vmul.f32 %v2257_v7, %v6078_v31  ;;  %v6080_v18 = vld [vmem:[#allocation51_spill] sm:$0xff] }
  0x96   : > { %6075 = vst [vmem:[#allocation30_spill] sm:$0xff] %v3599_v10  ;;  %6076 = vst [vmem:[#allocation34_spill] sm:$0xff] %v3602_v34  ;;  %v6079_v37 = vld [vmem:[#allocation50_spill] sm:$0xff]  ;;  %v851_v21 = vmul.f32 %v2257_v7, %v6080_v18  ;;  %v6081_v61 = vld [vmem:[#allocation55_spill] sm:$0xff] }
  0x97   : > { %v850_v4 = vmul.f32 %v2257_v7, %v6079_v37  ;;  %v852_v62 = vmul.f32 %v2257_v7, %v6081_v61  ;;  %v6082_v52 = vld [vmem:[#allocation56_spill] sm:$0xff]  ;;  %v6084_v30 = vld [vmem:[#allocation61_spill] sm:$0xff]  ;;  %v6086_v36 = vld [vmem:[#allocation66_spill] sm:$0xff]  ;;  %v862_v61 = vmul.f32 %v2257_v7, %v3599_v10 }
  0x98   : > { %v853_v57 = vmul.f32 %v2257_v7, %v6082_v52  ;;  %v6083_v17 = vld [vmem:[#allocation60_spill] sm:$0xff]  ;;  %v855_v42 = vmul.f32 %v2257_v7, %v6084_v30  ;;  %v6085_v1 = vld [vmem:[#allocation65_spill] sm:$0xff]  ;;  %v857_v35 = vmul.f32 %v2257_v7, %v6086_v36  ;;  %v6087_v38 = vld [vmem:[#allocation70_spill] sm:$0xff]  ;;  %v863_v52 = vmul.f32 %v2257_v7, %v3602_v34 }
  0x99   : > { %v854_v27 = vmul.f32 %v2257_v7, %v6083_v17  ;;  %v856_v60 = vmul.f32 %v2257_v7, %v6085_v1  ;;  %v858_v39 = vmul.f32 %v2257_v7, %v6087_v38  ;;  %v6088_v54 = vld [vmem:[#allocation71_spill] sm:$0xff]  ;;  %v6090_v3 = vld [vmem:[#allocation76_spill] sm:$0xff]  ;;  %v3621_v17 = vadd.f32 %v832_v22, %v3474_v47 }
  0x9a   : > { %v859_v31 = vmul.f32 %v2257_v7, %v6088_v54  ;;  %v6089_v46 = vld [vmem:[#allocation75_spill] sm:$0xff]  ;;  %v861_v18 = vmul.f32 %v2257_v7, %v6090_v3  ;;  %v3624_v30 = vadd.f32 %v833_v19, %v3478_v24  ;;  %v3627_v36 = vadd.f32 %v834_v28, %v3484_v16 }
  0x9b   : > { %v860_v37 = vmul.f32 %v2257_v7, %v6089_v46  ;;  %v3630_v38 = vadd.f32 %v835_v29, %v3488_v0  ;;  %v3633_v46 = vadd.f32 %v836_v51, %v3492_v25  ;;  %v3636_v3 = vadd.f32 %v837_v48, %v3496_v44  ;;  %v6123_v48 = vld [vmem:[#allocation87_spill] sm:$0xff] }
  0x9c   : > { %6091 = vst [vmem:[#allocation35_spill] sm:$0xff] %v3624_v30  ;;  %6092 = vst [vmem:[#allocation38_spill] sm:$0xff] %v3627_v36  ;;  %v3639_v7 = vadd.f32 %v838_v2, %v3500_v43  ;;  %v3642_v47 = vadd.f32 %v839_v32, %v3504_v12  ;;  %v3645_v24 = vadd.f32 %v840_v41, %v3508_v59  ;;  %v6125_v32 = vld [vmem:[#allocation21_spill] sm:$0xff] }
  0x9d   : > { %6093 = vst [vmem:[#allocation39_spill] sm:$0xff] %v3630_v38  ;;  %6094 = vst [vmem:[#allocation43_spill] sm:$0xff] %v3633_v46  ;;  %v3648_v16 = vadd.f32 %v841_v33, %v3511_v23  ;;  %v3651_v0 = vadd.f32 %v842_v13, %v3514_v14  ;;  %v3654_v25 = vadd.f32 %v843_v11, %v3517_v20  ;;  %v6135_v11 = vld [vmem:[#allocation14_spill] sm:$0xff] }
  0x9e   : > { %6095 = vst [vmem:[#allocation44_spill] sm:$0xff] %v3636_v3  ;;  %6096 = vst [vmem:[#allocation48_spill] sm:$0xff] %v3639_v7  ;;  %v3657_v44 = vadd.f32 %v844_v40, %v3520_v5  ;;  %v3660_v43 = vadd.f32 %v845_v26, %v3523_v15  ;;  %v3663_v12 = vadd.f32 %v846_v55, %v3526_v58  ;;  %v6111_v58 = vld [vmem:[#allocation9_spill] sm:$0xff] }
  0x9f   : > { %6097 = vst [vmem:[#allocation49_spill] sm:$0xff] %v3642_v47  ;;  %6098 = vst [vmem:[#allocation52_spill] sm:$0xff] %v3645_v24  ;;  %v3666_v59 = vadd.f32 %v847_v6, %v3529_v8  ;;  %v3669_v23 = vadd.f32 %v848_v53, %v3532_v9  ;;  %v3672_v14 = vadd.f32 %v849_v56, %v3535_v49  ;;  %v6113_v8 = vld [vmem:[#allocation10_spill] sm:$0xff]  ;;  %v6115_v9 = vld [vmem:[#allocation11_spill] sm:$0xff] }
  0xa0   : > { %6099 = vst [vmem:[#allocation53_spill] sm:$0xff] %v3648_v16  ;;  %6100 = vst [vmem:[#allocation57_spill] sm:$0xff] %v3651_v0  ;;  %v3675_v20 = vadd.f32 %v850_v4, %v3538_v50  ;;  %v3678_v5 = vadd.f32 %v851_v21, %v3541_v63  ;;  %v3681_v15 = vadd.f32 %v852_v62, %v3544_v45  ;;  %v2258_v49 = vld [vmem:[%s5646_s1 + $0x4] ss:$0 sm:$0xff]  ;;  %v6117_v50 = vld [vmem:[#allocation84_spill] sm:$0xff] }
  0xa1   : > { %6101 = vst [vmem:[#allocation58_spill] sm:$0xff] %v3654_v25  ;;  %6102 = vst [vmem:[#allocation62_spill] sm:$0xff] %v3657_v44  ;;  %v3684_v22 = vadd.f32 %v853_v57, %v6111_v58  ;;  %v3687_v19 = vadd.f32 %v854_v27, %v6113_v8  ;;  %v3690_v28 = vadd.f32 %v855_v42, %v6115_v9  ;;  %v6119_v63 = vld [vmem:[#allocation85_spill] sm:$0xff]  ;;  %v6121_v45 = vld [vmem:[#allocation86_spill] sm:$0xff] }
  0xa2   : > { %6103 = vst [vmem:[#allocation63_spill] sm:$0xff] %v3660_v43  ;;  %6104 = vst [vmem:[#allocation67_spill] sm:$0xff] %v3663_v12  ;;  %v3696_v29 = vadd.f32 %v856_v60, %v6117_v50  ;;  %v3699_v51 = vadd.f32 %v857_v35, %v6119_v63  ;;  %v3702_v6 = vadd.f32 %v858_v39, %v6121_v45  ;;  %v6127_v42 = vld [vmem:[#allocation24_spill] sm:$0xff]  ;;  %v6129_v56 = vld [vmem:[#allocation25_spill] sm:$0xff] }
  0xa3   : > { %6105 = vst [vmem:[#allocation68_spill] sm:$0xff] %v3666_v59  ;;  %6106 = vst [vmem:[#allocation72_spill] sm:$0xff] %v3669_v23  ;;  %v3705_v2 = vadd.f32 %v859_v31, %v6123_v48  ;;  %v3708_v53 = vadd.f32 %v860_v37, %v6125_v32  ;;  %v3711_v41 = vadd.f32 %v861_v18, %v6127_v42  ;;  %v6131_v60 = vld [vmem:[#allocation29_spill] sm:$0xff]  ;;  %v6133_v35 = vld [vmem:[#allocation12_spill] sm:$0xff] }
  0xa4   : > { %6107 = vst [vmem:[#allocation73_spill] sm:$0xff] %v3672_v14  ;;  %6108 = vst [vmem:[#allocation77_spill] sm:$0xff] %v3675_v20  ;;  %v3714_v33 = vadd.f32 %v862_v61, %v6129_v56  ;;  %v3717_v4 = vadd.f32 %v863_v52, %v6131_v60  ;;  %v901_v13 = vmul.f32 %v2258_v49, %v6133_v35  ;;  %v6134_v21 = vld [vmem:[#allocation13_spill] sm:$0xff]  ;;  %v6136_v31 = vld [vmem:[#allocation15_spill] sm:$0xff] }
  0xa5   : > { %6109 = vst [vmem:[#allocation78_spill] sm:$0xff] %v3678_v5  ;;  %6110 = vst [vmem:[#allocation80_spill] sm:$0xff] %v3681_v15  ;;  %v902_v39 = vmul.f32 %v2258_v49, %v6134_v21  ;;  %v903_v62 = vmul.f32 %v2258_v49, %v6135_v11  ;;  %v904_v40 = vmul.f32 %v2258_v49, %v6136_v31  ;;  %v6137_v57 = vld [vmem:[#allocation16_spill] sm:$0xff]  ;;  %v6138_v26 = vld [vmem:[#allocation17_spill] sm:$0xff] }
  0xa6   : > { %6112 = vst [vmem:[#allocation81_spill] sm:$0xff] %v3684_v22  ;;  %6114 = vst [vmem:[#allocation65_spill] sm:$0xff] %v3687_v19  ;;  %v905_v37 = vmul.f32 %v2258_v49, %v6137_v57  ;;  %v906_v27 = vmul.f32 %v2258_v49, %v6138_v26  ;;  %v6139_v18 = vld [vmem:[#allocation18_spill] sm:$0xff]  ;;  %v6140_v58 = vld [vmem:[#allocation19_spill] sm:$0xff] }
  0xa7   : > { %6116 = vst [vmem:[#allocation71_spill] sm:$0xff] %v3690_v28  ;;  %6118 = vst [vmem:[#allocation9_spill] sm:$0xff] %v3696_v29  ;;  %v907_v55 = vmul.f32 %v2258_v49, %v6139_v18  ;;  %v908_v61 = vmul.f32 %v2258_v49, %v6140_v58  ;;  %v6141_v8 = vld [vmem:[#allocation20_spill] sm:$0xff]  ;;  %v6142_v52 = vld [vmem:[#allocation22_spill] sm:$0xff]  ;;  %v998_v47 = vrot.slane %v902_v39, 1  ;;  %v1000_v7 = vrot.slane %v903_v62, 1 }
  0xa8   : > { %6120 = vst [vmem:[#allocation10_spill] sm:$0xff] %v3699_v51  ;;  %6122 = vst [vmem:[#allocation11_spill] sm:$0xff] %v3702_v6  ;;  %v909_v9 = vmul.f32 %v2258_v49, %v6141_v8  ;;  %v910_v50 = vmul.f32 %v2258_v49, %v6142_v52  ;;  %v6143_v63 = vld [vmem:[#allocation23_spill] sm:$0xff]  ;;  %v6144_v48 = vld [vmem:[#allocation26_spill] sm:$0xff]  ;;  %v1003_v3 = vrot.slane %v905_v37, 1  ;;  %v1005_v46 = vrot.slane %v906_v27, 1 }
  0xa9   : > { %6124 = vst [vmem:[#allocation84_spill] sm:$0xff] %v3705_v2  ;;  %6126 = vst [vmem:[#allocation85_spill] sm:$0xff] %v3708_v53  ;;  %v3730_v45 = vmul.f32 %v2258_v49, %v6143_v63  ;;  %v3733_v32 = vmul.f32 %v2258_v49, %v6144_v48  ;;  %v6145_v42 = vld [vmem:[#allocation27_spill] sm:$0xff]  ;;  %v6146_v60 = vld [vmem:[#allocation28_spill] sm:$0xff]  ;;  %v1008_v38 = vrot.slane %v908_v61, 1 }
  0xaa   : > { %6128 = vst [vmem:[#allocation86_spill] sm:$0xff] %v3711_v41  ;;  %6130 = vst [vmem:[#allocation87_spill] sm:$0xff] %v3714_v33  ;;  %v3736_v56 = vmul.f32 %v2258_v49, %v6145_v42  ;;  %v3739_v35 = vmul.f32 %v2258_v49, %v6146_v60  ;;  %v6147_v21 = vld [vmem:[#allocation31_spill] sm:$0xff]  ;;  %v6148_v31 = vld [vmem:[#allocation32_spill] sm:$0xff]  ;;  %v1010_v36 = vrot.slane %v909_v9, 1 }
  0xab   : > { %6132 = vst [vmem:[#allocation21_spill] sm:$0xff] %v3717_v4  ;;  %v3742_v11 = vmul.f32 %v2258_v49, %v6147_v21  ;;  %v3745_v57 = vmul.f32 %v2258_v49, %v6148_v31  ;;  %v6149_v26 = vld [vmem:[#allocation33_spill] sm:$0xff]  ;;  %v6150_v58 = vld [vmem:[#allocation40_spill] sm:$0xff]  ;;  %v6155_v31 = vld [vmem:[#allocation42_spill] sm:$0xff]  ;;  %v1013_v39 = vrot.slane %v3730_v45, 1 }
  0xac   : > { %v3748_v18 = vmul.f32 %v2258_v49, %v6149_v26  ;;  %v3751_v8 = vmul.f32 %v2258_v49, %v6150_v58  ;;  %v6151_v52 = vld [vmem:[#allocation36_spill] sm:$0xff]  ;;  %v6152_v48 = vld [vmem:[#allocation37_spill] sm:$0xff]  ;;  %v3766_v41 = vmul.f32 %v2258_v49, %v6155_v31  ;;  %v6156_v26 = vld [vmem:[#allocation54_spill] sm:$0xff]  ;;  %v3863_v62 = vsel %vm436_vm0, %v1008_v38, %v1010_v36 }
  0xad   : > { %v3754_v63 = vmul.f32 %v2258_v49, %v6151_v52  ;;  %v3757_v42 = vmul.f32 %v2258_v49, %v6152_v48  ;;  %v6153_v60 = vld [vmem:[#allocation45_spill] sm:$0xff]  ;;  %v3769_v53 = vmul.f32 %v2258_v49, %v6156_v26  ;;  %v6157_v58 = vld [vmem:[#allocation46_spill] sm:$0xff]  ;;  %v6158_v52 = vld [vmem:[#allocation47_spill] sm:$0xff] }
  0xae   : > { %v3760_v4 = vmul.f32 %v2258_v49, %v6153_v60  ;;  %v6154_v21 = vld [vmem:[#allocation41_spill] sm:$0xff]  ;;  %v3772_v2 = vmul.f32 %v2258_v49, %v6157_v58  ;;  %v3775_v6 = vmul.f32 %v2258_v49, %v6158_v52  ;;  %v6159_v48 = vld [vmem:[#allocation59_spill] sm:$0xff]  ;;  %v6160_v60 = vld [vmem:[#allocation50_spill] sm:$0xff]  ;;  %v1023_v27 = vrot.slane %v3748_v18, 1 }
  0xaf   : > { %v3763_v33 = vmul.f32 %v2258_v49, %v6154_v21  ;;  %v3778_v51 = vmul.f32 %v2258_v49, %v6159_v48  ;;  %v3781_v29 = vmul.f32 %v2258_v49, %v6160_v60  ;;  %v6161_v21 = vld [vmem:[#allocation51_spill] sm:$0xff]  ;;  %v6162_v31 = vld [vmem:[#allocation64_spill] sm:$0xff]  ;;  %v3796_v52 = vld [vmem:[%s2590_s9 + $0x190] sm:$0x3]  ;;  %v1025_v36 = vrot.slane %v3751_v8, 1 }
  0xb0   : > { %v3784_v28 = vmul.f32 %v2258_v49, %v6161_v21  ;;  %v3787_v19 = vmul.f32 %v2258_v49, %v6162_v31  ;;  %v6163_v26 = vld [vmem:[#allocation55_spill] sm:$0xff]  ;;  %v6164_v58 = vld [vmem:[#allocation56_spill] sm:$0xff]  ;;  %6165 = vst [vmem:[#allocation24_spill] sm:$0xff] %v3796_v52  ;;  %v6166_v5 = vld [vmem:[#allocation69_spill] sm:$0xff]  ;;  %v1027_v61 = vrot.slane %v3754_v63, 1  ;;  %v1030_v45 = vrot.slane %v3760_v4, 1 }
  0xb1   : > { %v3790_v22 = vmul.f32 %v2258_v49, %v6163_v26  ;;  %v3793_v15 = vmul.f32 %v2258_v49, %v6164_v58  ;;  %v3799_v48 = vmul.f32 %v2258_v49, %v6166_v5  ;;  %v6167_v20 = vld [vmem:[#allocation60_spill] sm:$0xff]  ;;  %v6168_v14 = vld [vmem:[#allocation61_spill] sm:$0xff]  ;;  %v6169_v23 = vld [vmem:[#allocation74_spill] sm:$0xff]  ;;  %v3811_v26 = vmul.f32 %v2258_v49, %v6085_v1 }
  0xb2   : > { %v3802_v60 = vmul.f32 %v2258_v49, %v6167_v20  ;;  %v3805_v21 = vmul.f32 %v2258_v49, %v6168_v14  ;;  %v3808_v31 = vmul.f32 %v2258_v49, %v6169_v23  ;;  %v6170_v59 = vld [vmem:[#allocation66_spill] sm:$0xff]  ;;  %v6171_v12 = vld [vmem:[#allocation79_spill] sm:$0xff]  ;;  %v3823_v20 = vmul.f32 %v2258_v49, %v6088_v54  ;;  %v6175_v1 = vld [vmem:[#allocation76_spill] sm:$0xff] }
  0xb3   : > { %v3814_v58 = vmul.f32 %v2258_v49, %v6170_v59  ;;  %v3817_v43 = vmul.f32 %v2258_v49, %v6171_v12  ;;  %v6172_v5 = vld [vmem:[#allocation70_spill] sm:$0xff]  ;;  %v6174_v23 = vld [vmem:[#allocation75_spill] sm:$0xff]  ;;  %v3832_v16 = vmul.f32 %v2258_v49, %v6175_v1  ;;  %v3838_v12 = vmul.f32 %v2258_v49, %v3599_v10 }
  0xb4   : > { %v3820_v44 = vmul.f32 %v2258_v49, %v6172_v5  ;;  %v6173_v14 = vld [vmem:[#allocation82_spill] sm:$0xff]  ;;  %v3829_v0 = vmul.f32 %v2258_v49, %v6174_v23  ;;  %v6176_v59 = vld [vmem:[#allocation83_spill] sm:$0xff]  ;;  %v3841_v5 = vmul.f32 %v2258_v49, %v3602_v34  ;;  %v3844_v54 = vmul.f32 %v2258_v49, %v3796_v52 }
  0xb5   : > { %v3826_v25 = vmul.f32 %v2258_v49, %v6173_v14  ;;  %v3835_v24 = vmul.f32 %v2258_v49, %v6176_v59  ;;  %v997_v14 = vrot.slane %v901_v13, 1  ;;  %v1002_v23 = vrot.slane %v904_v40, 1 }
  0xb6   : > { %v1007_v1 = vrot.slane %v907_v55, 1  ;;  %v3850_v10 = vsel %vm436_vm0, %v998_v47, %v1000_v7  ;;  %v1012_v34 = vrot.slane %v910_v50, 1  ;;  %v3856_v49 = vsel %vm436_vm0, %v1003_v3, %v1005_v46 }
  0xb7   : > { %v3847_v59 = vsel %vm436_vm0, %v997_v14, %v998_v47  ;;  %v3853_v30 = vsel %vm436_vm0, %v1002_v23, %v1003_v3  ;;  %v1015_v40 = vrot.slane %v3733_v32, 1  ;;  %v1017_v7 = vrot.slane %v3736_v56, 1 }
  0xb8   : > { %v3859_v13 = vsel %vm436_vm0, %v1007_v1, %v1008_v38  ;;  %v1018_v47 = vrot.slane %v3739_v35, 1  ;;  %v3869_v37 = vsel %vm436_vm0, %v1012_v34, %v1013_v39  ;;  %v1020_v3 = vrot.slane %v3742_v11, 1 }
  0xb9   : > { %v1022_v46 = vrot.slane %v3745_v57, 1  ;;  %v3875_v55 = vsel %vm436_vm0, %v1013_v39, %v1015_v40  ;;  %v1028_v50 = vrot.slane %v3757_v42, 1  ;;  %v1026_v32 = vsel %vm436_vm0, %v1023_v27, %v1025_v36 }
  0xba   : > { %v3878_v38 = vsel %vm436_vm0, %v1017_v7, %v1018_v47  ;;  %v1021_v9 = vsel %vm436_vm0, %v1018_v47, %v1020_v3  ;;  %v1032_v56 = vrot.slane %v3763_v33, 1  ;;  %v1033_v35 = vrot.slane %v3766_v41, 1 }
  0xbb   : > { %v1024_v34 = vsel %vm436_vm0, %v1022_v46, %v1023_v27  ;;  %v1035_v11 = vrot.slane %v3769_v53, 1  ;;  %v1029_v57 = vsel %vm436_vm0, %v1027_v61, %v1028_v50  ;;  %v1031_v18 = vsel %vm436_vm0, %v1028_v50, %v1030_v45 }
  0xbc   : > { %v1037_v8 = vrot.slane %v3772_v2, 1  ;;  %v1038_v63 = vrot.slane %v3775_v6, 1  ;;  %v1034_v42 = vsel %vm436_vm0, %v1032_v56, %v1033_v35  ;;  %v1040_v14 = vrot.slane %v3778_v51, 1 }
  0xbd   : > { %v1036_v4 = vsel %vm436_vm0, %v1033_v35, %v1035_v11  ;;  %v1042_v33 = vrot.slane %v3781_v29, 1  ;;  %v1043_v53 = vrot.slane %v3784_v28, 1  ;;  %v1045_v23 = vrot.slane %v3787_v19, 1  ;;  %v6178_v11 = vld [vmem:[#allocation38_spill] sm:$0xff] }
  0xbe   : > { %v1039_v41 = vsel %vm436_vm0, %v1037_v8, %v1038_v63  ;;  %v1047_v1 = vrot.slane %v3790_v22, 1  ;;  %v1041_v2 = vsel %vm436_vm0, %v1038_v63, %v1040_v14  ;;  %v1048_v6 = vrot.slane %v3793_v15, 1  ;;  %v6180_v63 = vld [vmem:[#allocation43_spill] sm:$0xff]  ;;  %v6183_v14 = vld [vmem:[#allocation48_spill] sm:$0xff] }
  0xbf   : > { %v1050_v39 = vrot.slane %v3799_v48, 1  ;;  %v1052_v40 = vrot.slane %v3802_v60, 1  ;;  %v1044_v51 = vsel %vm436_vm0, %v1042_v33, %v1043_v53  ;;  %v1046_v29 = vsel %vm436_vm0, %v1043_v53, %v1045_v23  ;;  %v6185_v53 = vld [vmem:[#allocation49_spill] sm:$0xff]  ;;  %v6187_v23 = vld [vmem:[#allocation52_spill] sm:$0xff] }
  0xc0   : > { %v1053_v7 = vrot.slane %v3805_v21, 1  ;;  %v1055_v28 = vrot.slane %v3808_v31, 1  ;;  %v1049_v19 = vsel %vm436_vm0, %v1047_v1, %v1048_v6  ;;  %v1057_v47 = vrot.slane %v3811_v26, 1  ;;  %v6189_v1 = vld [vmem:[#allocation53_spill] sm:$0xff] }
  0xc1   : > { %v1051_v22 = vsel %vm436_vm0, %v1048_v6, %v1050_v39  ;;  %v1058_v15 = vrot.slane %v3814_v58, 1  ;;  %v1060_v3 = vrot.slane %v3817_v43, 1  ;;  %v1062_v46 = vrot.slane %v3820_v44, 1 }
  0xc2   : > { %v1054_v48 = vsel %vm436_vm0, %v1052_v40, %v1053_v7  ;;  %v1056_v60 = vsel %vm436_vm0, %v1053_v7, %v1055_v28  ;;  %v1063_v31 = vrot.slane %v3823_v20, 1  ;;  %v1065_v27 = vrot.slane %v3826_v25, 1  ;;  %v6195_v7 = vld [vmem:[#allocation62_spill] sm:$0xff]  ;;  %v6197_v28 = vld [vmem:[#allocation63_spill] sm:$0xff] }
  0xc3   : > { %v1059_v21 = vsel %vm436_vm0, %v1057_v47, %v1058_v15  ;;  %v1067_v36 = vrot.slane %v3829_v0, 1  ;;  %v1061_v26 = vsel %vm436_vm0, %v1058_v15, %v1060_v3  ;;  %v1068_v58 = vrot.slane %v3832_v16, 1  ;;  %v6177_v16 = vld [vmem:[#allocation35_spill] sm:$0xff] }
  0xc4   : > { %v1070_v61 = vrot.slane %v3835_v24, 1  ;;  %v1072_v50 = vrot.slane %v3838_v12, 1  ;;  %v1064_v43 = vsel %vm436_vm0, %v1062_v46, %v1063_v31  ;;  %v1066_v44 = vsel %vm436_vm0, %v1063_v31, %v1065_v27 }
  0xc5   : > { %v1073_v45 = vrot.slane %v3841_v5, 1  ;;  %v1075_v20 = vrot.slane %v3844_v54, 1  ;;  %v1069_v25 = vsel %vm436_vm0, %v1067_v36, %v1068_v58  ;;  %v3934_v56 = vadd.f32 %v3847_v59, %v3621_v17  ;;  %v6179_v54 = vld [vmem:[#allocation39_spill] sm:$0xff]  ;;  %v6181_v59 = vld [vmem:[#allocation44_spill] sm:$0xff] }
  0xc6   : > { %v1071_v0 = vsel %vm436_vm0, %v1068_v58, %v1070_v61  ;;  %v3938_v24 = vadd.f32 %v3850_v10, %v6177_v16  ;;  %v3944_v5 = vadd.f32 %v3853_v30, %v6178_v11  ;;  %v3948_v8 = vadd.f32 %v3856_v49, %v6179_v54  ;;  %v6213_v58 = vld [vmem:[#allocation81_spill] sm:$0xff] }
  0xc7   : > { %v1074_v12 = vsel %vm436_vm0, %v1072_v50, %v1073_v45  ;;  %v1076_v35 = vsel %vm436_vm0, %v1073_v45, %v1075_v20  ;;  %v3952_v17 = vadd.f32 %v3859_v13, %v6180_v63  ;;  %v3956_v10 = vadd.f32 %v3863_v62, %v6181_v59  ;;  %v6191_v13 = vld [vmem:[#allocation57_spill] sm:$0xff]  ;;  %v6193_v62 = vld [vmem:[#allocation58_spill] sm:$0xff]  ;;  %v6223_v20 = vld [vmem:[#allocation11_spill] sm:$0xff] }
  0xc8   : > { %v3960_v33 = vadd.f32 %v3869_v37, %v6183_v14  ;;  %v3964_v30 = vadd.f32 %v3875_v55, %v6185_v53  ;;  %v3968_v49 = vadd.f32 %v3878_v38, %v6187_v23  ;;  %v3971_v6 = vadd.f32 %v1021_v9, %v6189_v1  ;;  %v6199_v55 = vld [vmem:[#allocation67_spill] sm:$0xff]  ;;  %v6201_v38 = vld [vmem:[#allocation68_spill] sm:$0xff]  ;;  %v6215_v61 = vld [vmem:[#allocation65_spill] sm:$0xff] }
  0xc9   : > { %6182 = vst [vmem:[#allocation25_spill] sm:$0xff] %v3956_v10  ;;  %v3974_v39 = vadd.f32 %v1024_v34, %v6191_v13  ;;  %v3977_v40 = vadd.f32 %v1026_v32, %v6193_v62  ;;  %v3980_v37 = vadd.f32 %v1029_v57, %v6195_v7  ;;  %v3983_v47 = vadd.f32 %v1031_v18, %v6197_v28  ;;  %v6203_v9 = vld [vmem:[#allocation72_spill] sm:$0xff]  ;;  %v6205_v34 = vld [vmem:[#allocation73_spill] sm:$0xff]  ;;  %v6209_v57 = vld [vmem:[#allocation78_spill] sm:$0xff] }
  0xca   : > { %6184 = vst [vmem:[#allocation29_spill] sm:$0xff] %v3960_v33  ;;  %6186 = vst [vmem:[#allocation12_spill] sm:$0xff] %v3964_v30  ;;  %v3986_v15 = vadd.f32 %v1034_v42, %v6199_v55  ;;  %v3989_v3 = vadd.f32 %v1036_v4, %v6201_v38  ;;  %v3992_v46 = vadd.f32 %v1039_v41, %v6203_v9  ;;  %v6207_v32 = vld [vmem:[#allocation77_spill] sm:$0xff]  ;;  %v6211_v18 = vld [vmem:[#allocation80_spill] sm:$0xff] }
  0xcb   : > { %6188 = vst [vmem:[#allocation13_spill] sm:$0xff] %v3968_v49  ;;  %6190 = vst [vmem:[#allocation14_spill] sm:$0xff] %v3971_v6  ;;  %v3995_v31 = vadd.f32 %v1041_v2, %v6205_v34  ;;  %v3998_v27 = vadd.f32 %v1044_v51, %v6207_v32  ;;  %v4001_v36 = vadd.f32 %v1046_v29, %v6209_v57  ;;  %v6217_v2 = vld [vmem:[#allocation71_spill] sm:$0xff]  ;;  %v4018_v51 = vld [vmem:[%s5646_s1 + $0x5] ss:$0 sm:$0xff] }
  0xcc   : > { %6192 = vst [vmem:[#allocation15_spill] sm:$0xff] %v3974_v39  ;;  %6194 = vst [vmem:[#allocation16_spill] sm:$0xff] %v3977_v40  ;;  %v4004_v42 = vadd.f32 %v1049_v19, %v6211_v18  ;;  %v4007_v4 = vadd.f32 %v1051_v22, %v6213_v58  ;;  %v4010_v41 = vadd.f32 %v1054_v48, %v6215_v61  ;;  %v6219_v29 = vld [vmem:[#allocation9_spill] sm:$0xff]  ;;  %v6221_v19 = vld [vmem:[#allocation10_spill] sm:$0xff] }
  0xcd   : > { %6196 = vst [vmem:[#allocation17_spill] sm:$0xff] %v3980_v37  ;;  %6198 = vst [vmem:[#allocation18_spill] sm:$0xff] %v3983_v47  ;;  %v4013_v50 = vadd.f32 %v1056_v60, %v6217_v2  ;;  %v4021_v45 = vadd.f32 %v1059_v21, %v6219_v29  ;;  %v4024_v22 = vadd.f32 %v1061_v26, %v6221_v19  ;;  %v6225_v48 = vld [vmem:[#allocation84_spill] sm:$0xff]  ;;  %v6227_v11 = vld [vmem:[#allocation85_spill] sm:$0xff] }
  0xce   : > { %6200 = vst [vmem:[#allocation19_spill] sm:$0xff] %v3986_v15  ;;  %6202 = vst [vmem:[#allocation20_spill] sm:$0xff] %v3989_v3  ;;  %v4027_v16 = vadd.f32 %v1064_v43, %v6223_v20  ;;  %v4030_v60 = vadd.f32 %v1066_v44, %v6225_v48  ;;  %v4033_v54 = vadd.f32 %v1069_v25, %v6227_v11  ;;  %v6229_v63 = vld [vmem:[#allocation86_spill] sm:$0xff]  ;;  %v6231_v21 = vld [vmem:[#allocation87_spill] sm:$0xff] }
  0xcf   : > { %6204 = vst [vmem:[#allocation22_spill] sm:$0xff] %v3992_v46  ;;  %6206 = vst [vmem:[#allocation23_spill] sm:$0xff] %v3995_v31  ;;  %v4036_v59 = vadd.f32 %v1071_v0, %v6229_v63  ;;  %v4039_v14 = vadd.f32 %v1074_v12, %v6231_v21  ;;  %v6233_v53 = vld [vmem:[#allocation21_spill] sm:$0xff]  ;;  %v2323_v43 = vld [vmem:[%s2590_s9 + $0x18] sm:$0xff]  ;;  %v4360_v39 = vmul.f32 %v4018_v51, %v3796_v52 }
  0xd0   : > { %6208 = vst [vmem:[#allocation26_spill] sm:$0xff] %v3998_v27  ;;  %6210 = vst [vmem:[#allocation27_spill] sm:$0xff] %v4001_v36  ;;  %v4042_v26 = vadd.f32 %v1076_v35, %v6233_v53  ;;  %v4046_v23 = vmul.f32 %v2323_v43, %v4018_v51  ;;  %v2324_v44 = vld [vmem:[%s2590_s9 + $0x20] sm:$0xff]  ;;  %v2325_v1 = vld [vmem:[%s2590_s9 + $0x28] sm:$0x3] }
  0xd1   : > { %6212 = vst [vmem:[#allocation28_spill] sm:$0xff] %v4004_v42  ;;  %6214 = vst [vmem:[#allocation31_spill] sm:$0xff] %v4007_v4  ;;  %v4050_v25 = vmul.f32 %v2324_v44, %v4018_v51  ;;  %v4054_v0 = vmul.f32 %v2325_v1, %v4018_v51  ;;  %v4057_v12 = vld [vmem:[%s2590_s9 + $0x30] sm:$0xff]  ;;  %v4064_v13 = vld [vmem:[%s2590_s9 + $0x38] sm:$0xff] }
  0xd2   : > { %6216 = vst [vmem:[#allocation32_spill] sm:$0xff] %v4010_v41  ;;  %6218 = vst [vmem:[#allocation33_spill] sm:$0xff] %v4013_v50  ;;  %v4061_v35 = vmul.f32 %v4057_v12, %v4018_v51  ;;  %v4068_v62 = vmul.f32 %v4064_v13, %v4018_v51  ;;  %v4071_v7 = vld [vmem:[%s2590_s9 + $0x40] sm:$0x3]  ;;  %v4078_v55 = vld [vmem:[%s2590_s9 + $0x48] sm:$0xff] }
  0xd3   : > { %6220 = vst [vmem:[#allocation40_spill] sm:$0xff] %v4021_v45  ;;  %6222 = vst [vmem:[#allocation36_spill] sm:$0xff] %v4024_v22  ;;  %v4075_v28 = vmul.f32 %v4071_v7, %v4018_v51  ;;  %v4082_v38 = vmul.f32 %v4078_v55, %v4018_v51  ;;  %v4085_v9 = vld [vmem:[%s2590_s9 + $0x50] sm:$0xff]  ;;  %v4092_v32 = vld [vmem:[%s2590_s9 + $0x58] sm:$0x3]  ;;  %v1243_v6 = vrot.slane %v4050_v25, 2 }
  0xd4   : > { %6224 = vst [vmem:[#allocation37_spill] sm:$0xff] %v4027_v16  ;;  %6226 = vst [vmem:[#allocation45_spill] sm:$0xff] %v4030_v60  ;;  %v4089_v34 = vmul.f32 %v4085_v9, %v4018_v51  ;;  %v4096_v57 = vmul.f32 %v4092_v32, %v4018_v51  ;;  %v4099_v18 = vld [vmem:[%s2590_s9 + $0x60] sm:$0xff]  ;;  %v4106_v61 = vld [vmem:[%s2590_s9 + $0x68] sm:$0xff]  ;;  %v1245_v49 = vrot.slane %v4054_v0, 2  ;;  %v1248_v30 = vrot.slane %v4068_v62, 2 }
  0xd5   : > { %6228 = vst [vmem:[#allocation41_spill] sm:$0xff] %v4033_v54  ;;  %6230 = vst [vmem:[#allocation42_spill] sm:$0xff] %v4036_v59  ;;  %v4103_v58 = vmul.f32 %v4099_v18, %v4018_v51  ;;  %v4110_v2 = vmul.f32 %v4106_v61, %v4018_v51  ;;  %v4113_v29 = vld [vmem:[%s2590_s9 + $0x70] sm:$0x3]  ;;  %v4120_v20 = vld [vmem:[%s2590_s9 + $0x78] sm:$0xff]  ;;  %v1252_v33 = vrot.slane %v4082_v38, 2 }
  0xd6   : > { %6232 = vst [vmem:[#allocation54_spill] sm:$0xff] %v4039_v14  ;;  %6234 = vst [vmem:[#allocation46_spill] sm:$0xff] %v4042_v26  ;;  %v4117_v19 = vmul.f32 %v4113_v29, %v4018_v51  ;;  %v4124_v48 = vmul.f32 %v4120_v20, %v4018_v51  ;;  %v4127_v11 = vld [vmem:[%s2590_s9 + $0x80] sm:$0xff]  ;;  %v4134_v21 = vld [vmem:[%s2590_s9 + $0x88] sm:$0x3] }
  0xd7   : > { %6235 = vst [vmem:[#allocation47_spill] sm:$0xff] %v4057_v12  ;;  %6236 = vst [vmem:[#allocation59_spill] sm:$0xff] %v4064_v13  ;;  %v4131_v63 = vmul.f32 %v4127_v11, %v4018_v51  ;;  %v4138_v53 = vmul.f32 %v4134_v21, %v4018_v51  ;;  %v4141_v43 = vld [vmem:[%s2590_s9 + $0x90] sm:$0xff]  ;;  %v4148_v1 = vld [vmem:[%s2590_s9 + $0x98] sm:$0xff]  ;;  %v1257_v25 = vrot.slane %v4103_v58, 2 }
  0xd8   : > { %6237 = vst [vmem:[#allocation50_spill] sm:$0xff] %v4071_v7  ;;  %6238 = vst [vmem:[#allocation51_spill] sm:$0xff] %v4078_v55  ;;  %v4145_v44 = vmul.f32 %v4141_v43, %v4018_v51  ;;  %v4162_v7 = vld [vmem:[%s2590_s9 + $0xa8] sm:$0xff]  ;;  %v4204_v55 = vld [vmem:[%s2590_s9 + $0xd8] sm:$0xff] }
  0xd9   : > { %6239 = vst [vmem:[#allocation64_spill] sm:$0xff] %v4085_v9  ;;  %6240 = vst [vmem:[#allocation55_spill] sm:$0xff] %v4092_v32  ;;  %v4155_v32 = vld [vmem:[%s2590_s9 + $0xa0] sm:$0x3]  ;;  %v4197_v9 = vld [vmem:[%s2590_s9 + $0xd0] sm:$0x3] }
  0xda   : > { %6241 = vst [vmem:[#allocation56_spill] sm:$0xff] %v4099_v18  ;;  %6242 = vst [vmem:[#allocation69_spill] sm:$0xff] %v4106_v61  ;;  %v4183_v61 = vld [vmem:[%s2590_s9 + $0xc0] sm:$0xff]  ;;  %v4190_v18 = vld [vmem:[%s2590_s9 + $0xc8] sm:$0xff]  ;;  %v1263_v38 = vrot.slane %v4131_v63, 2 }
  0xdb   : > { %6243 = vst [vmem:[#allocation60_spill] sm:$0xff] %v4113_v29  ;;  %6244 = vst [vmem:[#allocation61_spill] sm:$0xff] %v4120_v20  ;;  %v4152_v29 = vmul.f32 %v4148_v1, %v4018_v51  ;;  %v4176_v20 = vld [vmem:[%s2590_s9 + $0xb8] sm:$0x3]  ;;  %v4211_v13 = vld [vmem:[%s2590_s9 + $0xe0] sm:$0xff] }
  0xdc   : > { %6245 = vst [vmem:[#allocation74_spill] sm:$0xff] %v4127_v11  ;;  %6246 = vst [vmem:[#allocation66_spill] sm:$0xff] %v4134_v21  ;;  %v4159_v21 = vmul.f32 %v4155_v32, %v4018_v51  ;;  %v4169_v11 = vld [vmem:[%s2590_s9 + $0xb0] sm:$0xff]  ;;  %v4218_v12 = vld [vmem:[%s2590_s9 + $0xe8] sm:$0x3] }
  0xdd   : > { %6247 = vst [vmem:[#allocation79_spill] sm:$0xff] %v4141_v43  ;;  %6248 = vst [vmem:[#allocation70_spill] sm:$0xff] %v4148_v1  ;;  %v4166_v43 = vmul.f32 %v4162_v7, %v4018_v51  ;;  %v4173_v1 = vmul.f32 %v4169_v11, %v4018_v51  ;;  %v4225_v26 = vld [vmem:[%s2590_s9 + $0xf0] sm:$0xff]  ;;  %v4232_v14 = vld [vmem:[%s2590_s9 + $0xf8] sm:$0xff] }
  0xde   : > { %6249 = vst [vmem:[#allocation82_spill] sm:$0xff] %v4155_v32  ;;  %6250 = vst [vmem:[#allocation75_spill] sm:$0xff] %v4162_v7  ;;  %v4180_v32 = vmul.f32 %v4176_v20, %v4018_v51  ;;  %v4187_v7 = vmul.f32 %v4183_v61, %v4018_v51  ;;  %v4239_v59 = vld [vmem:[%s2590_s9 + $0x100] sm:$0x3]  ;;  %v4246_v54 = vld [vmem:[%s2590_s9 + $0x108] sm:$0xff] }
  0xdf   : > { %6251 = vst [vmem:[#allocation76_spill] sm:$0xff] %v4169_v11  ;;  %6252 = vst [vmem:[#allocation83_spill] sm:$0xff] %v4176_v20  ;;  %v4194_v11 = vmul.f32 %v4190_v18, %v4018_v51  ;;  %v4201_v20 = vmul.f32 %v4197_v9, %v4018_v51  ;;  %v4253_v60 = vld [vmem:[%s2590_s9 + $0x110] sm:$0xff]  ;;  %v4260_v16 = vld [vmem:[%s2590_s9 + $0x118] sm:$0x3]  ;;  %v1272_v58 = vrot.slane %v4166_v43, 2 }
  0xe0   : > { %6253 = vst [vmem:[#allocation35_spill] sm:$0xff] %v4183_v61  ;;  %6254 = vst [vmem:[#allocation38_spill] sm:$0xff] %v4190_v18  ;;  %v4208_v61 = vmul.f32 %v4204_v55, %v4018_v51  ;;  %v4215_v18 = vmul.f32 %v4211_v13, %v4018_v51  ;;  %v4267_v22 = vld [vmem:[%s2590_s9 + $0x120] sm:$0xff]  ;;  %v4274_v45 = vld [vmem:[%s2590_s9 + $0x128] sm:$0xff]  ;;  %v1275_v63 = vrot.slane %v4180_v32, 2 }
  0xe1   : > { %6255 = vst [vmem:[#allocation39_spill] sm:$0xff] %v4197_v9  ;;  %6256 = vst [vmem:[#allocation43_spill] sm:$0xff] %v4204_v55  ;;  %v4222_v9 = vmul.f32 %v4218_v12, %v4018_v51  ;;  %v4229_v55 = vmul.f32 %v4225_v26, %v4018_v51  ;;  %v4281_v50 = vld [vmem:[%s2590_s9 + $0x130] sm:$0x3]  ;;  %v4288_v41 = vld [vmem:[%s2590_s9 + $0x138] sm:$0xff] }
  0xe2   : > { %6257 = vst [vmem:[#allocation44_spill] sm:$0xff] %v4211_v13  ;;  %6258 = vst [vmem:[#allocation48_spill] sm:$0xff] %v4218_v12  ;;  %v4236_v13 = vmul.f32 %v4232_v14, %v4018_v51  ;;  %v4243_v12 = vmul.f32 %v4239_v59, %v4018_v51  ;;  %v4295_v4 = vld [vmem:[%s2590_s9 + $0x140] sm:$0xff]  ;;  %v4302_v42 = vld [vmem:[%s2590_s9 + $0x148] sm:$0x3] }
  0xe3   : > { %6259 = vst [vmem:[#allocation49_spill] sm:$0xff] %v4225_v26  ;;  %6260 = vst [vmem:[#allocation52_spill] sm:$0xff] %v4232_v14  ;;  %v4250_v26 = vmul.f32 %v4246_v54, %v4018_v51  ;;  %v4257_v14 = vmul.f32 %v4253_v60, %v4018_v51  ;;  %v4306_v36 = vmul.f32 %v4302_v42, %v4018_v51  ;;  %v6278_v40 = vld [vmem:[#allocation34_spill] sm:$0xff] }
  0xe4   : > { %6261 = vst [vmem:[#allocation53_spill] sm:$0xff] %v4239_v59  ;;  %6262 = vst [vmem:[#allocation57_spill] sm:$0xff] %v4246_v54  ;;  %v4264_v59 = vmul.f32 %v4260_v16, %v4018_v51  ;;  %v4271_v54 = vmul.f32 %v4267_v22, %v4018_v51 }
  0xe5   : > { %6263 = vst [vmem:[#allocation58_spill] sm:$0xff] %v4253_v60  ;;  %6264 = vst [vmem:[#allocation62_spill] sm:$0xff] %v4260_v16  ;;  %v4278_v60 = vmul.f32 %v4274_v45, %v4018_v51  ;;  %v4285_v16 = vmul.f32 %v4281_v50, %v4018_v51 }
  0xe6   : > { %6265 = vst [vmem:[#allocation63_spill] sm:$0xff] %v4267_v22  ;;  %6266 = vst [vmem:[#allocation67_spill] sm:$0xff] %v4274_v45  ;;  %v4292_v22 = vmul.f32 %v4288_v41, %v4018_v51  ;;  %v4299_v45 = vmul.f32 %v4295_v4, %v4018_v51 }
  0xe7   : > { %6267 = vst [vmem:[#allocation68_spill] sm:$0xff] %v4281_v50  ;;  %6268 = vst [vmem:[#allocation72_spill] sm:$0xff] %v4288_v41  ;;  %v4309_v50 = vld [vmem:[%s2590_s9 + $0x150] sm:$0xff]  ;;  %v4316_v41 = vld [vmem:[%s2590_s9 + $0x158] sm:$0xff] }
  0xe8   : > { %6269 = vst [vmem:[#allocation73_spill] sm:$0xff] %v4295_v4  ;;  %6270 = vst [vmem:[#allocation77_spill] sm:$0xff] %v4302_v42  ;;  %v4313_v27 = vmul.f32 %v4309_v50, %v4018_v51  ;;  %v4320_v31 = vmul.f32 %v4316_v41, %v4018_v51  ;;  %v4323_v4 = vld [vmem:[%s2590_s9 + $0x160] sm:$0x3]  ;;  %v4330_v42 = vld [vmem:[%s2590_s9 + $0x168] sm:$0xff] }
  0xe9   : > { %6271 = vst [vmem:[#allocation78_spill] sm:$0xff] %v4309_v50  ;;  %6272 = vst [vmem:[#allocation80_spill] sm:$0xff] %v4316_v41  ;;  %v4327_v46 = vmul.f32 %v4323_v4, %v4018_v51  ;;  %v4334_v3 = vmul.f32 %v4330_v42, %v4018_v51  ;;  %v4337_v50 = vld [vmem:[%s2590_s9 + $0x170] sm:$0xff]  ;;  %v4344_v41 = vld [vmem:[%s2590_s9 + $0x178] sm:$0x3] }
  0xea   : > { %6273 = vst [vmem:[#allocation81_spill] sm:$0xff] %v4323_v4  ;;  %6274 = vst [vmem:[#allocation65_spill] sm:$0xff] %v4330_v42  ;;  %v4341_v15 = vmul.f32 %v4337_v50, %v4018_v51  ;;  %v4348_v47 = vmul.f32 %v4344_v41, %v4018_v51  ;;  %v6277_v4 = vld [vmem:[#allocation30_spill] sm:$0xff]  ;;  %v4356_v42 = vmul.f32 %v4018_v51, %v6278_v40  ;;  %v1253_v40 = vrot.slane %v4089_v34, 2  ;;  %v6332_v52 = vld [vmem:[#allocation44_spill] sm:$0xff] }
  0xeb   : > { %6275 = vst [vmem:[#allocation71_spill] sm:$0xff] %v4337_v50  ;;  %6276 = vst [vmem:[#allocation9_spill] sm:$0xff] %v4344_v41  ;;  %v4352_v37 = vmul.f32 %v4018_v51, %v6277_v4  ;;  %v1242_v50 = vrot.slane %v4046_v23, 2  ;;  %v1247_v41 = vrot.slane %v4061_v35, 2  ;;  %v1250_v4 = vrot.slane %v4075_v28, 2 }
  0xec   : > { %v4374_v51 = vsel %vm682_vm1, %v1243_v6, %v1245_v49  ;;  %v1255_v23 = vrot.slane %v4096_v57, 2  ;;  %v4385_v62 = vsel %vm682_vm1, %v1252_v33, %v1253_v40  ;;  %v1258_v28 = vrot.slane %v4110_v2, 2 }
  0xed   : > { %v4371_v10 = vsel %vm682_vm1, %v1242_v50, %v1243_v6  ;;  %v4379_v0 = vsel %vm682_vm1, %v1247_v41, %v1248_v30  ;;  %v4382_v35 = vsel %vm682_vm1, %v1248_v30, %v1250_v4  ;;  %v1260_v49 = vrot.slane %v4117_v19, 2 }
  0xee   : > { %v4389_v50 = vsel %vm682_vm1, %v1253_v40, %v1255_v23  ;;  %v1262_v6 = vrot.slane %v4124_v48, 2  ;;  %v4395_v41 = vsel %vm682_vm1, %v1257_v25, %v1258_v28  ;;  %v1265_v30 = vrot.slane %v4138_v53, 2 }
  0xef   : > { %v1267_v4 = vrot.slane %v4145_v44, 2  ;;  %v1268_v33 = vrot.slane %v4152_v29, 2  ;;  %v4401_v34 = vsel %vm682_vm1, %v1258_v28, %v1260_v49  ;;  %v1270_v57 = vrot.slane %v4159_v21, 2 }
  0xf0   : > { %v4404_v40 = vsel %vm682_vm1, %v1262_v6, %v1263_v38  ;;  %v1266_v2 = vsel %vm682_vm1, %v1263_v38, %v1265_v30  ;;  %v1273_v48 = vrot.slane %v4173_v1, 2  ;;  %v1277_v53 = vrot.slane %v4187_v7, 2 }
  0xf1   : > { %v1269_v19 = vsel %vm682_vm1, %v1267_v4, %v1268_v33  ;;  %v1271_v29 = vsel %vm682_vm1, %v1268_v33, %v1270_v57  ;;  %v1278_v44 = vrot.slane %v4194_v11, 2  ;;  %v1280_v23 = vrot.slane %v4201_v20, 2 }
  0xf2   : > { %v1274_v21 = vsel %vm682_vm1, %v1272_v58, %v1273_v48  ;;  %v1276_v43 = vsel %vm682_vm1, %v1273_v48, %v1275_v63  ;;  %v1282_v25 = vrot.slane %v4208_v61, 2  ;;  %v1283_v28 = vrot.slane %v4215_v18, 2 }
  0xf3   : > { %v1279_v1 = vsel %vm682_vm1, %v1277_v53, %v1278_v44  ;;  %v1281_v32 = vsel %vm682_vm1, %v1278_v44, %v1280_v23  ;;  %v1285_v49 = vrot.slane %v4222_v9, 2  ;;  %v1287_v7 = vrot.slane %v4229_v55, 2 }
  0xf4   : > { %v1284_v11 = vsel %vm682_vm1, %v1282_v25, %v1283_v28  ;;  %v1288_v20 = vrot.slane %v4236_v13, 2  ;;  %v1290_v6 = vrot.slane %v4243_v12, 2  ;;  %v1292_v38 = vrot.slane %v4250_v26, 2 }
  0xf5   : > { %v1286_v61 = vsel %vm682_vm1, %v1283_v28, %v1285_v49  ;;  %v1293_v18 = vrot.slane %v4257_v14, 2  ;;  %v1295_v30 = vrot.slane %v4264_v59, 2  ;;  %v1297_v4 = vrot.slane %v4271_v54, 2 }
  0xf6   : > { %v1289_v9 = vsel %vm682_vm1, %v1287_v7, %v1288_v20  ;;  %v1291_v55 = vsel %vm682_vm1, %v1288_v20, %v1290_v6  ;;  %v1298_v33 = vrot.slane %v4278_v60, 2  ;;  %v1300_v13 = vrot.slane %v4285_v16, 2  ;;  %v6281_v7 = vld [vmem:[#allocation12_spill] sm:$0xff] }
  0xf7   : > { %v1294_v12 = vsel %vm682_vm1, %v1292_v38, %v1293_v18  ;;  %v1296_v26 = vsel %vm682_vm1, %v1293_v18, %v1295_v30  ;;  %v1302_v57 = vrot.slane %v4292_v22, 2  ;;  %v1303_v14 = vrot.slane %v4299_v45, 2  ;;  %v6286_v38 = vld [vmem:[#allocation17_spill] sm:$0xff]  ;;  %v6287_v18 = vld [vmem:[#allocation18_spill] sm:$0xff] }
  0xf8   : > { %v1299_v59 = vsel %vm682_vm1, %v1297_v4, %v1298_v33  ;;  %v1301_v54 = vsel %vm682_vm1, %v1298_v33, %v1300_v13  ;;  %v1305_v58 = vrot.slane %v4306_v36, 2  ;;  %v1307_v48 = vrot.slane %v4313_v27, 2 }
  0xf9   : > { %v1304_v60 = vsel %vm682_vm1, %v1302_v57, %v1303_v14  ;;  %v1308_v16 = vrot.slane %v4320_v31, 2  ;;  %v1310_v63 = vrot.slane %v4327_v46, 2  ;;  %v1312_v53 = vrot.slane %v4334_v3, 2 }
  0xfa   : > { %v1306_v22 = vsel %vm682_vm1, %v1303_v14, %v1305_v58  ;;  %v1313_v45 = vrot.slane %v4341_v15, 2  ;;  %v1315_v44 = vrot.slane %v4348_v47, 2  ;;  %v1317_v23 = vrot.slane %v4352_v37, 2 }
  0xfb   : > { %v1309_v36 = vsel %vm682_vm1, %v1307_v48, %v1308_v16  ;;  %v1311_v27 = vsel %vm682_vm1, %v1308_v16, %v1310_v63  ;;  %v1318_v25 = vrot.slane %v4356_v42, 2  ;;  %v1320_v31 = vrot.slane %v4360_v39, 2 }
  0xfc   : > { %v1314_v46 = vsel %vm682_vm1, %v1312_v53, %v1313_v45  ;;  %v1316_v3 = vsel %vm682_vm1, %v1313_v45, %v1315_v44  ;;  %v4460_v28 = vadd.f32 %v4371_v10, %v3934_v56  ;;  %v4464_v47 = vadd.f32 %v4374_v51, %v3938_v24  ;;  %v6279_v10 = vld [vmem:[#allocation25_spill] sm:$0xff] }
  0xfd   : > { %v1319_v37 = vsel %vm682_vm1, %v1317_v23, %v1318_v25  ;;  %v1321_v15 = vsel %vm682_vm1, %v1318_v25, %v1320_v31  ;;  %v4470_v42 = vadd.f32 %v4379_v0, %v3944_v5  ;;  %v4474_v39 = vadd.f32 %v4382_v35, %v3948_v8  ;;  %v6280_v51 = vld [vmem:[#allocation29_spill] sm:$0xff]  ;;  %v6283_v35 = vld [vmem:[#allocation14_spill] sm:$0xff] }
  0xfe   : > { %v4478_v56 = vadd.f32 %v4385_v62, %v3952_v17  ;;  %v4482_v24 = vadd.f32 %v4389_v50, %v6279_v10  ;;  %v4486_v49 = vadd.f32 %v4395_v41, %v6280_v51  ;;  %v4490_v5 = vadd.f32 %v4401_v34, %v6281_v7  ;;  %v6282_v0 = vld [vmem:[#allocation13_spill] sm:$0xff]  ;;  %v6284_v17 = vld [vmem:[#allocation15_spill] sm:$0xff]  ;;  %v6285_v50 = vld [vmem:[#allocation16_spill] sm:$0xff] }
  0xff   : > { %v4494_v8 = vadd.f32 %v4404_v40, %v6282_v0  ;;  %v4497_v20 = vadd.f32 %v1266_v2, %v6283_v35  ;;  %v4500_v62 = vadd.f32 %v1269_v19, %v6284_v17  ;;  %v4503_v6 = vadd.f32 %v1271_v29, %v6285_v50  ;;  %v6288_v34 = vld [vmem:[#allocation19_spill] sm:$0xff]  ;;  %v6289_v40 = vld [vmem:[#allocation20_spill] sm:$0xff]  ;;  %v6290_v2 = vld [vmem:[#allocation22_spill] sm:$0xff] }
 0x100   : > { %v4506_v41 = vadd.f32 %v1274_v21, %v6286_v38  ;;  %v4509_v30 = vadd.f32 %v1276_v43, %v6287_v18  ;;  %v4512_v4 = vadd.f32 %v1279_v1, %v6288_v34  ;;  %v4515_v33 = vadd.f32 %v1281_v32, %v6289_v40  ;;  %v6291_v19 = vld [vmem:[#allocation23_spill] sm:$0xff]  ;;  %v6292_v29 = vld [vmem:[#allocation26_spill] sm:$0xff]  ;;  %v6294_v43 = vld [vmem:[#allocation28_spill] sm:$0xff] }
 0x101   : > { %v4518_v13 = vadd.f32 %v1284_v11, %v6290_v2  ;;  %v4521_v57 = vadd.f32 %v1286_v61, %v6291_v19  ;;  %v4524_v14 = vadd.f32 %v1289_v9, %v6292_v29  ;;  %v6293_v21 = vld [vmem:[#allocation27_spill] sm:$0xff]  ;;  %v4530_v48 = vadd.f32 %v1294_v12, %v6294_v43  ;;  %v6297_v32 = vld [vmem:[#allocation32_spill] sm:$0xff]  ;;  %v6299_v11 = vld [vmem:[#allocation33_spill] sm:$0xff] }
 0x102   : > { %v4527_v58 = vadd.f32 %v1291_v55, %v6293_v21  ;;  %v6295_v1 = vld [vmem:[#allocation31_spill] sm:$0xff]  ;;  %v4536_v63 = vadd.f32 %v1299_v59, %v6297_v32  ;;  %v4539_v53 = vadd.f32 %v1301_v54, %v6299_v11  ;;  %v2260_v61 = vld [vmem:[%s5646_s1 + $0x6] ss:$0 sm:$0xff]  ;;  %v6301_v9 = vld [vmem:[#allocation40_spill] sm:$0xff] }
 0x103   : > { %v4533_v16 = vadd.f32 %v1296_v26, %v6295_v1  ;;  %v4545_v45 = vadd.f32 %v1304_v60, %v6301_v9  ;;  %v6303_v55 = vld [vmem:[#allocation36_spill] sm:$0xff]  ;;  %v6305_v12 = vld [vmem:[#allocation37_spill] sm:$0xff]  ;;  %v6311_v54 = vld [vmem:[#allocation42_spill] sm:$0xff] }
 0x104   : > { %6298 = vst [vmem:[#allocation11_spill] sm:$0xff] %v4536_v63  ;;  %6300 = vst [vmem:[#allocation84_spill] sm:$0xff] %v4539_v53  ;;  %v4548_v44 = vadd.f32 %v1306_v22, %v6303_v55  ;;  %v4551_v23 = vadd.f32 %v1309_v36, %v6305_v12  ;;  %v6307_v26 = vld [vmem:[#allocation45_spill] sm:$0xff]  ;;  %v4560_v10 = vadd.f32 %v1316_v3, %v6311_v54  ;;  %v6313_v51 = vld [vmem:[#allocation54_spill] sm:$0xff] }
 0x105   : > { %6296 = vst [vmem:[#allocation10_spill] sm:$0xff] %v4533_v16  ;;  %6302 = vst [vmem:[#allocation85_spill] sm:$0xff] %v4545_v45  ;;  %v4554_v25 = vadd.f32 %v1311_v27, %v6307_v26  ;;  %v6309_v59 = vld [vmem:[#allocation41_spill] sm:$0xff]  ;;  %v4563_v7 = vadd.f32 %v1319_v37, %v6313_v51  ;;  %v6315_v60 = vld [vmem:[#allocation46_spill] sm:$0xff] }
 0x106   : > { %6304 = vst [vmem:[#allocation86_spill] sm:$0xff] %v4548_v44  ;;  %6306 = vst [vmem:[#allocation87_spill] sm:$0xff] %v4551_v23  ;;  %v4557_v31 = vadd.f32 %v1314_v46, %v6309_v59  ;;  %v4566_v0 = vadd.f32 %v1321_v15, %v6315_v60  ;;  %v6317_v22 = vld [vmem:[#allocation47_spill] sm:$0xff]  ;;  %v6320_v38 = vld [vmem:[#allocation64_spill] sm:$0xff] }
 0x107   : > { %6308 = vst [vmem:[#allocation21_spill] sm:$0xff] %v4554_v25  ;;  %6312 = vst [vmem:[#allocation29_spill] sm:$0xff] %v4560_v10  ;;  %v1391_v35 = vmul.f32 %v6317_v22, %v2260_v61  ;;  %v6318_v17 = vld [vmem:[#allocation59_spill] sm:$0xff]  ;;  %v1394_v46 = vmul.f32 %v6320_v38, %v2260_v61  ;;  %v6321_v18 = vld [vmem:[#allocation56_spill] sm:$0xff] }
 0x108   : > { %6310 = vst [vmem:[#allocation25_spill] sm:$0xff] %v4557_v31  ;;  %6314 = vst [vmem:[#allocation12_spill] sm:$0xff] %v4563_v7  ;;  %v1392_v36 = vmul.f32 %v6318_v17, %v2260_v61  ;;  %v6319_v50 = vld [vmem:[#allocation51_spill] sm:$0xff]  ;;  %v1395_v34 = vmul.f32 %v6321_v18, %v2260_v61  ;;  %v6322_v3 = vld [vmem:[#allocation69_spill] sm:$0xff] }
 0x109   : > { %6316 = vst [vmem:[#allocation13_spill] sm:$0xff] %v4566_v0  ;;  %v1393_v27 = vmul.f32 %v6319_v50, %v2260_v61  ;;  %v1396_v40 = vmul.f32 %v6322_v3, %v2260_v61  ;;  %v6323_v2 = vld [vmem:[#allocation61_spill] sm:$0xff]  ;;  %v6324_v19 = vld [vmem:[#allocation74_spill] sm:$0xff]  ;;  %v6325_v15 = vld [vmem:[#allocation79_spill] sm:$0xff]  ;;  %v1406_v3 = vmul.f32 %v6332_v52, %v2260_v61 }
 0x10a   : > { %v1397_v37 = vmul.f32 %v6323_v2, %v2260_v61  ;;  %v1398_v29 = vmul.f32 %v6324_v19, %v2260_v61  ;;  %v1399_v21 = vmul.f32 %v6325_v15, %v2260_v61  ;;  %v6326_v43 = vld [vmem:[#allocation70_spill] sm:$0xff]  ;;  %v6327_v32 = vld [vmem:[#allocation75_spill] sm:$0xff]  ;;  %v6328_v9 = vld [vmem:[#allocation76_spill] sm:$0xff] }
 0x10b   : > { %v1400_v1 = vmul.f32 %v6326_v43, %v2260_v61  ;;  %v1401_v11 = vmul.f32 %v6327_v32, %v2260_v61  ;;  %v1402_v55 = vmul.f32 %v6328_v9, %v2260_v61  ;;  %v6329_v12 = vld [vmem:[#allocation35_spill] sm:$0xff]  ;;  %v6330_v59 = vld [vmem:[#allocation38_spill] sm:$0xff]  ;;  %v4588_v2 = vld [vmem:[%s2590_s9 + $0x1a0] sm:$0xff] }
 0x10c   : > { %v1403_v26 = vmul.f32 %v6329_v12, %v2260_v61  ;;  %v1404_v54 = vmul.f32 %v6330_v59, %v2260_v61  ;;  %v6331_v51 = vld [vmem:[#allocation43_spill] sm:$0xff]  ;;  %6334 = vst [vmem:[#allocation15_spill] sm:$0xff] %v4588_v2  ;;  %v6335_v19 = vld [vmem:[#allocation49_spill] sm:$0xff]  ;;  %v6336_v38 = vld [vmem:[#allocation52_spill] sm:$0xff] }
 0x10d   : > { %v1405_v60 = vmul.f32 %v6331_v51, %v2260_v61  ;;  %v4585_v18 = vld [vmem:[%s2590_s9 + $0x198] sm:$0xff]  ;;  %v1407_v15 = vmul.f32 %v6335_v19, %v2260_v61  ;;  %v1408_v43 = vmul.f32 %v6336_v38, %v2260_v61  ;;  %v6337_v50 = vld [vmem:[#allocation57_spill] sm:$0xff]  ;;  %v6338_v17 = vld [vmem:[#allocation58_spill] sm:$0xff] }
 0x10e   : > { %6333 = vst [vmem:[#allocation14_spill] sm:$0xff] %v4585_v18  ;;  %v1409_v32 = vmul.f32 %v6337_v50, %v2260_v61  ;;  %v1410_v9 = vmul.f32 %v6338_v17, %v2260_v61  ;;  %v6339_v22 = vld [vmem:[#allocation63_spill] sm:$0xff]  ;;  %v6341_v7 = vld [vmem:[#allocation72_spill] sm:$0xff]  ;;  %v6342_v10 = vld [vmem:[#allocation73_spill] sm:$0xff] }
 0x10f   : > { %v1411_v12 = vmul.f32 %v6339_v22, %v2260_v61  ;;  %v6340_v0 = vld [vmem:[#allocation67_spill] sm:$0xff]  ;;  %v1413_v51 = vmul.f32 %v6341_v7, %v2260_v61  ;;  %v1414_v52 = vmul.f32 %v6342_v10, %v2260_v61  ;;  %v6343_v31 = vld [vmem:[#allocation78_spill] sm:$0xff]  ;;  %v6344_v23 = vld [vmem:[#allocation80_spill] sm:$0xff]  ;;  %v1421_v22 = vmul.f32 %v2260_v61, %v4585_v18 }
 0x110   : > { %v1412_v59 = vmul.f32 %v6340_v0, %v2260_v61  ;;  %v1415_v25 = vmul.f32 %v6343_v31, %v2260_v61  ;;  %v1416_v44 = vmul.f32 %v6344_v23, %v2260_v61  ;;  %v6345_v45 = vld [vmem:[#allocation65_spill] sm:$0xff]  ;;  %v6346_v53 = vld [vmem:[#allocation71_spill] sm:$0xff]  ;;  %v6347_v63 = vld [vmem:[#allocation30_spill] sm:$0xff]  ;;  %v1422_v0 = vmul.f32 %v2260_v61, %v4588_v2 }
 0x111   : > { %v1417_v19 = vmul.f32 %v6345_v45, %v2260_v61  ;;  %v1418_v38 = vmul.f32 %v6346_v53, %v2260_v61  ;;  %v1419_v50 = vmul.f32 %v2260_v61, %v6347_v63  ;;  %v6348_v16 = vld [vmem:[#allocation34_spill] sm:$0xff]  ;;  %v4607_v7 = vadd.f32 %v1391_v35, %v4460_v28 }
 0x112   : > { %v1420_v17 = vmul.f32 %v2260_v61, %v6348_v16  ;;  %v4610_v10 = vadd.f32 %v1392_v36, %v4464_v47  ;;  %v4613_v23 = vadd.f32 %v1393_v27, %v4470_v42  ;;  %v4616_v45 = vadd.f32 %v1394_v46, %v4474_v39 }
 0x113   : > { %v4619_v63 = vadd.f32 %v1395_v34, %v4478_v56  ;;  %v4622_v16 = vadd.f32 %v1396_v40, %v4482_v24  ;;  %v4625_v61 = vadd.f32 %v1397_v37, %v4486_v49  ;;  %v4628_v28 = vadd.f32 %v1398_v29, %v4490_v5  ;;  %v6381_v40 = vld [vmem:[#allocation21_spill] sm:$0xff] }
 0x114   : > { %6349 = vst [vmem:[#allocation16_spill] sm:$0xff] %v4610_v10  ;;  %6350 = vst [vmem:[#allocation17_spill] sm:$0xff] %v4613_v23  ;;  %v4631_v47 = vadd.f32 %v1399_v21, %v4494_v8  ;;  %v4634_v42 = vadd.f32 %v1400_v1, %v4497_v20  ;;  %v4637_v39 = vadd.f32 %v1401_v11, %v4500_v62  ;;  %v6383_v29 = vld [vmem:[#allocation25_spill] sm:$0xff] }
 0x115   : > { %6351 = vst [vmem:[#allocation18_spill] sm:$0xff] %v4616_v45  ;;  %6352 = vst [vmem:[#allocation19_spill] sm:$0xff] %v4619_v63  ;;  %v4640_v56 = vadd.f32 %v1402_v55, %v4503_v6  ;;  %v4643_v24 = vadd.f32 %v1403_v26, %v4506_v41  ;;  %v4646_v49 = vadd.f32 %v1404_v54, %v4509_v30  ;;  %v6393_v55 = vld [vmem:[#allocation50_spill] sm:$0xff]  ;;  %v6396_v54 = vld [vmem:[#allocation55_spill] sm:$0xff] }
 0x116   : > { %6353 = vst [vmem:[#allocation20_spill] sm:$0xff] %v4622_v16  ;;  %6354 = vst [vmem:[#allocation22_spill] sm:$0xff] %v4625_v61  ;;  %v4649_v5 = vadd.f32 %v1405_v60, %v4512_v4  ;;  %v4652_v8 = vadd.f32 %v1406_v3, %v4515_v33  ;;  %v4655_v20 = vadd.f32 %v1407_v15, %v4518_v13  ;;  %v6369_v4 = vld [vmem:[#allocation10_spill] sm:$0xff]  ;;  %v6371_v33 = vld [vmem:[#allocation11_spill] sm:$0xff] }
 0x117   : > { %6355 = vst [vmem:[#allocation23_spill] sm:$0xff] %v4628_v28  ;;  %6356 = vst [vmem:[#allocation26_spill] sm:$0xff] %v4631_v47  ;;  %v4658_v62 = vadd.f32 %v1408_v43, %v4521_v57  ;;  %v4661_v6 = vadd.f32 %v1409_v32, %v4524_v14  ;;  %v4664_v41 = vadd.f32 %v1410_v9, %v4527_v58  ;;  %v6373_v13 = vld [vmem:[#allocation84_spill] sm:$0xff]  ;;  %v2261_v57 = vld [vmem:[%s5646_s1 + $0x7] ss:$0 sm:$0xff] }
 0x118   : > { %6357 = vst [vmem:[#allocation27_spill] sm:$0xff] %v4634_v42  ;;  %6358 = vst [vmem:[#allocation28_spill] sm:$0xff] %v4637_v39  ;;  %v4667_v30 = vadd.f32 %v1411_v12, %v4530_v48  ;;  %v4670_v35 = vadd.f32 %v1412_v59, %v6369_v4  ;;  %v4673_v36 = vadd.f32 %v1413_v51, %v6371_v33  ;;  %v6375_v14 = vld [vmem:[#allocation85_spill] sm:$0xff]  ;;  %v6377_v58 = vld [vmem:[#allocation86_spill] sm:$0xff] }
 0x119   : > { %6359 = vst [vmem:[#allocation31_spill] sm:$0xff] %v4640_v56  ;;  %6360 = vst [vmem:[#allocation32_spill] sm:$0xff] %v4643_v24  ;;  %v4676_v27 = vadd.f32 %v1414_v52, %v6373_v13  ;;  %v4682_v46 = vadd.f32 %v1415_v25, %v6375_v14  ;;  %v4685_v34 = vadd.f32 %v1416_v44, %v6377_v58  ;;  %v6379_v48 = vld [vmem:[#allocation87_spill] sm:$0xff]  ;;  %v6385_v52 = vld [vmem:[#allocation29_spill] sm:$0xff] }
 0x11a   : > { %6361 = vst [vmem:[#allocation33_spill] sm:$0xff] %v4646_v49  ;;  %6362 = vst [vmem:[#allocation40_spill] sm:$0xff] %v4649_v5  ;;  %v4688_v3 = vadd.f32 %v1417_v19, %v6379_v48  ;;  %v4691_v37 = vadd.f32 %v1418_v38, %v6381_v40  ;;  %v4694_v15 = vadd.f32 %v1419_v50, %v6383_v29  ;;  %v6387_v43 = vld [vmem:[#allocation12_spill] sm:$0xff]  ;;  %v6389_v25 = vld [vmem:[#allocation13_spill] sm:$0xff] }
 0x11b   : > { %6363 = vst [vmem:[#allocation36_spill] sm:$0xff] %v4652_v8  ;;  %6364 = vst [vmem:[#allocation37_spill] sm:$0xff] %v4655_v20  ;;  %v4697_v21 = vadd.f32 %v1420_v17, %v6385_v52  ;;  %v4700_v1 = vadd.f32 %v1421_v22, %v6387_v43  ;;  %v4703_v32 = vadd.f32 %v1422_v0, %v6389_v25  ;;  %v6391_v44 = vld [vmem:[#allocation47_spill] sm:$0xff]  ;;  %v6395_v59 = vld [vmem:[#allocation64_spill] sm:$0xff] }
 0x11c   : > { %6365 = vst [vmem:[#allocation45_spill] sm:$0xff] %v4658_v62  ;;  %6366 = vst [vmem:[#allocation41_spill] sm:$0xff] %v4661_v6  ;;  %v1460_v11 = vmul.f32 %v6391_v44, %v2261_v57  ;;  %v6392_v9 = vld [vmem:[#allocation59_spill] sm:$0xff]  ;;  %v1462_v12 = vmul.f32 %v6393_v55, %v2261_v57  ;;  %v1464_v50 = vmul.f32 %v6395_v59, %v2261_v57  ;;  %v6397_v17 = vld [vmem:[#allocation56_spill] sm:$0xff] }
 0x11d   : > { %6367 = vst [vmem:[#allocation42_spill] sm:$0xff] %v4664_v41  ;;  %6368 = vst [vmem:[#allocation54_spill] sm:$0xff] %v4667_v30  ;;  %v1461_v19 = vmul.f32 %v6392_v9, %v2261_v57  ;;  %v6394_v38 = vld [vmem:[#allocation51_spill] sm:$0xff]  ;;  %v1465_v51 = vmul.f32 %v6396_v54, %v2261_v57  ;;  %v1466_v60 = vmul.f32 %v6397_v17, %v2261_v57  ;;  %v6398_v4 = vld [vmem:[#allocation69_spill] sm:$0xff] }
 0x11e   : > { %6370 = vst [vmem:[#allocation46_spill] sm:$0xff] %v4670_v35  ;;  %6372 = vst [vmem:[#allocation10_spill] sm:$0xff] %v4673_v36  ;;  %v1463_v26 = vmul.f32 %v6394_v38, %v2261_v57  ;;  %v1467_v22 = vmul.f32 %v6398_v4, %v2261_v57  ;;  %v6399_v33 = vld [vmem:[#allocation60_spill] sm:$0xff]  ;;  %v6400_v0 = vld [vmem:[#allocation61_spill] sm:$0xff]  ;;  %v1559_v61 = vrot.slane %v1462_v12, 1  ;;  %v1562_v16 = vrot.slane %v1464_v50, 1 }
 0x11f   : > { %6374 = vst [vmem:[#allocation11_spill] sm:$0xff] %v4676_v27  ;;  %6376 = vst [vmem:[#allocation84_spill] sm:$0xff] %v4682_v46  ;;  %v1468_v13 = vmul.f32 %v6399_v33, %v2261_v57  ;;  %v1469_v14 = vmul.f32 %v6400_v0, %v2261_v57  ;;  %v6401_v58 = vld [vmem:[#allocation74_spill] sm:$0xff]  ;;  %v6403_v52 = vld [vmem:[#allocation79_spill] sm:$0xff]  ;;  %v1557_v28 = vrot.slane %v1461_v19, 1  ;;  %v1564_v63 = vrot.slane %v1465_v51, 1 }
 0x120   : > { %6378 = vst [vmem:[#allocation85_spill] sm:$0xff] %v4685_v34  ;;  %6380 = vst [vmem:[#allocation86_spill] sm:$0xff] %v4688_v3  ;;  %v4716_v48 = vmul.f32 %v6401_v58, %v2261_v57  ;;  %v6402_v40 = vld [vmem:[#allocation66_spill] sm:$0xff]  ;;  %v4722_v43 = vmul.f32 %v6403_v52, %v2261_v57  ;;  %v6406_v4 = vld [vmem:[#allocation75_spill] sm:$0xff]  ;;  %v1567_v45 = vrot.slane %v1467_v22, 1 }
 0x121   : > { %6382 = vst [vmem:[#allocation87_spill] sm:$0xff] %v4691_v37  ;;  %6384 = vst [vmem:[#allocation21_spill] sm:$0xff] %v4694_v15  ;;  %v4719_v29 = vmul.f32 %v6402_v40, %v2261_v57  ;;  %v6404_v25 = vld [vmem:[#allocation70_spill] sm:$0xff]  ;;  %v4731_v38 = vmul.f32 %v6406_v4, %v2261_v57  ;;  %v6407_v33 = vld [vmem:[#allocation76_spill] sm:$0xff]  ;;  %v1569_v23 = vrot.slane %v1468_v13, 1 }
 0x122   : > { %6386 = vst [vmem:[#allocation25_spill] sm:$0xff] %v4697_v21  ;;  %6388 = vst [vmem:[#allocation29_spill] sm:$0xff] %v4700_v1  ;;  %v4725_v59 = vmul.f32 %v6404_v25, %v2261_v57  ;;  %v6405_v54 = vld [vmem:[#allocation82_spill] sm:$0xff]  ;;  %v4734_v0 = vmul.f32 %v6407_v33, %v2261_v57  ;;  %v6408_v58 = vld [vmem:[#allocation83_spill] sm:$0xff]  ;;  %v1572_v19 = vrot.slane %v4716_v48, 1 }
 0x123   : > { %6390 = vst [vmem:[#allocation12_spill] sm:$0xff] %v4703_v32  ;;  %v4728_v17 = vmul.f32 %v6405_v54, %v2261_v57  ;;  %v4737_v55 = vmul.f32 %v6408_v58, %v2261_v57  ;;  %v6409_v40 = vld [vmem:[#allocation35_spill] sm:$0xff]  ;;  %v6410_v52 = vld [vmem:[#allocation38_spill] sm:$0xff]  ;;  %v6413_v4 = vld [vmem:[#allocation44_spill] sm:$0xff]  ;;  %v4849_v12 = vsel %vm436_vm0, %v1567_v45, %v1569_v23 }
 0x124   : > { %v4740_v9 = vmul.f32 %v6409_v40, %v2261_v57  ;;  %v4743_v44 = vmul.f32 %v6410_v52, %v2261_v57  ;;  %v6411_v25 = vld [vmem:[#allocation39_spill] sm:$0xff]  ;;  %v4752_v21 = vmul.f32 %v6413_v4, %v2261_v57  ;;  %v6414_v33 = vld [vmem:[#allocation48_spill] sm:$0xff]  ;;  %v6415_v58 = vld [vmem:[#allocation49_spill] sm:$0xff]  ;;  %v1582_v50 = vrot.slane %v4734_v0, 1 }
 0x125   : > { %v4746_v32 = vmul.f32 %v6411_v25, %v2261_v57  ;;  %v6412_v54 = vld [vmem:[#allocation43_spill] sm:$0xff]  ;;  %v4755_v15 = vmul.f32 %v6414_v33, %v2261_v57  ;;  %v4758_v37 = vmul.f32 %v6415_v58, %v2261_v57  ;;  %v6416_v40 = vld [vmem:[#allocation52_spill] sm:$0xff]  ;;  %v6417_v52 = vld [vmem:[#allocation53_spill] sm:$0xff]  ;;  %v1584_v23 = vrot.slane %v4737_v55, 1 }
 0x126   : > { %v4749_v1 = vmul.f32 %v6412_v54, %v2261_v57  ;;  %v4761_v3 = vmul.f32 %v6416_v40, %v2261_v57  ;;  %v4764_v34 = vmul.f32 %v6417_v52, %v2261_v57  ;;  %v6418_v25 = vld [vmem:[#allocation57_spill] sm:$0xff]  ;;  %v6419_v54 = vld [vmem:[#allocation58_spill] sm:$0xff]  ;;  %v6421_v33 = vld [vmem:[#allocation63_spill] sm:$0xff]  ;;  %v1592_v0 = vrot.slane %v4752_v21, 1 }
 0x127   : > { %v4767_v46 = vmul.f32 %v6418_v25, %v2261_v57  ;;  %v4770_v27 = vmul.f32 %v6419_v54, %v2261_v57  ;;  %v6420_v4 = vld [vmem:[#allocation62_spill] sm:$0xff]  ;;  %v4776_v35 = vmul.f32 %v6421_v33, %v2261_v57  ;;  %v6422_v58 = vld [vmem:[#allocation67_spill] sm:$0xff]  ;;  %v4782_v40 = vld [vmem:[%s2590_s9 + $0x1a8] sm:$0x3]  ;;  %v4797_v33 = vmul.f32 %v6343_v31, %v2261_v57 }
 0x128   : > { %v4773_v36 = vmul.f32 %v6420_v4, %v2261_v57  ;;  %v4779_v30 = vmul.f32 %v6422_v58, %v2261_v57  ;;  %v6423_v41 = vld [vmem:[#allocation68_spill] sm:$0xff]  ;;  %v6425_v62 = vld [vmem:[#allocation73_spill] sm:$0xff]  ;;  %v6432_v31 = vld [vmem:[#allocation34_spill] sm:$0xff]  ;;  %v1585_v22 = vsel %vm436_vm0, %v1582_v50, %v1584_v23  ;;  %v1591_v13 = vrot.slane %v4749_v1, 1 }
 0x129   : > { %v4785_v52 = vmul.f32 %v6423_v41, %v2261_v57  ;;  %v6424_v6 = vld [vmem:[#allocation72_spill] sm:$0xff]  ;;  %v4791_v54 = vmul.f32 %v6425_v62, %v2261_v57  ;;  %v6426_v20 = vld [vmem:[#allocation77_spill] sm:$0xff]  ;;  %v4818_v42 = vmul.f32 %v2261_v57, %v6432_v31  ;;  %v1566_v31 = vrot.slane %v1466_v60, 1 }
 0x12a   : > { %v4788_v25 = vmul.f32 %v6424_v6, %v2261_v57  ;;  %v4794_v4 = vmul.f32 %v6426_v20, %v2261_v57  ;;  %v6427_v8 = vld [vmem:[#allocation80_spill] sm:$0xff]  ;;  %v6428_v5 = vld [vmem:[#allocation81_spill] sm:$0xff]  ;;  %v4809_v6 = vmul.f32 %v6346_v53, %v2261_v57  ;;  %v6431_v20 = vld [vmem:[#allocation30_spill] sm:$0xff]  ;;  %v4830_v53 = vmul.f32 %v2261_v57, %v4782_v40 }
 0x12b   : > { %v4800_v58 = vmul.f32 %v6427_v8, %v2261_v57  ;;  %v4803_v49 = vmul.f32 %v6428_v5, %v2261_v57  ;;  %v6429_v41 = vld [vmem:[#allocation65_spill] sm:$0xff]  ;;  %v4815_v39 = vmul.f32 %v2261_v57, %v6431_v20  ;;  %v6433_v8 = vld [vmem:[#allocation24_spill] sm:$0xff]  ;;  %v4824_v5 = vmul.f32 %v2261_v57, %v4585_v18 }
 0x12c   : > { %v4806_v24 = vmul.f32 %v6429_v41, %v2261_v57  ;;  %v6430_v62 = vld [vmem:[#allocation9_spill] sm:$0xff]  ;;  %v4821_v47 = vmul.f32 %v2261_v57, %v6433_v8  ;;  %v4827_v41 = vmul.f32 %v2261_v57, %v4588_v2  ;;  %v1561_v20 = vrot.slane %v1463_v26, 1 }
 0x12d   : > { %v4812_v56 = vmul.f32 %v6430_v62, %v2261_v57  ;;  %v1556_v62 = vrot.slane %v1460_v11, 1  ;;  %v4836_v18 = vsel %vm436_vm0, %v1557_v28, %v1559_v61  ;;  %v1571_v2 = vrot.slane %v1469_v14, 1 }
 0x12e   : > { %v4839_v10 = vsel %vm436_vm0, %v1561_v20, %v1562_v16  ;;  %v4842_v57 = vsel %vm436_vm0, %v1562_v16, %v1564_v63  ;;  %v4845_v11 = vsel %vm436_vm0, %v1566_v31, %v1567_v45  ;;  %v1576_v61 = vrot.slane %v4722_v43, 1 }
 0x12f   : > { %v4833_v8 = vsel %vm436_vm0, %v1556_v62, %v1557_v28  ;;  %v1574_v62 = vrot.slane %v4719_v29, 1  ;;  %v1577_v28 = vrot.slane %v4725_v59, 1  ;;  %v4855_v26 = vsel %vm436_vm0, %v1571_v2, %v1572_v19 }
 0x130   : > { %v1579_v16 = vrot.slane %v4728_v17, 1  ;;  %v1581_v63 = vrot.slane %v4731_v38, 1  ;;  %v1586_v60 = vrot.slane %v4740_v9, 1  ;;  %v1587_v17 = vrot.slane %v4743_v44, 1 }
 0x131   : > { %v4861_v51 = vsel %vm436_vm0, %v1572_v19, %v1574_v62  ;;  %v4864_v45 = vsel %vm436_vm0, %v1576_v61, %v1577_v28  ;;  %v1589_v38 = vrot.slane %v4746_v32, 1  ;;  %v1594_v14 = vrot.slane %v4755_v15, 1 }
 0x132   : > { %v1580_v59 = vsel %vm436_vm0, %v1577_v28, %v1579_v16  ;;  %v1583_v2 = vsel %vm436_vm0, %v1581_v63, %v1582_v50  ;;  %v1588_v55 = vsel %vm436_vm0, %v1586_v60, %v1587_v17  ;;  %v1596_v48 = vrot.slane %v4758_v37, 1 }
 0x133   : > { %v1590_v9 = vsel %vm436_vm0, %v1587_v17, %v1589_v38  ;;  %v1597_v29 = vrot.slane %v4761_v3, 1  ;;  %v1593_v44 = vsel %vm436_vm0, %v1591_v13, %v1592_v0  ;;  %v1595_v32 = vsel %vm436_vm0, %v1592_v0, %v1594_v14  ;;  %v6435_v14 = vld [vmem:[#allocation17_spill] sm:$0xff] }
 0x134   : > { %v1599_v43 = vrot.slane %v4764_v34, 1  ;;  %v1601_v1 = vrot.slane %v4767_v46, 1  ;;  %v1602_v15 = vrot.slane %v4770_v27, 1  ;;  %v1604_v20 = vrot.slane %v4773_v36, 1 }
 0x135   : > { %v1598_v21 = vsel %vm436_vm0, %v1596_v48, %v1597_v29  ;;  %v1606_v31 = vrot.slane %v4776_v35, 1  ;;  %v1607_v3 = vrot.slane %v4779_v30, 1  ;;  %v1609_v19 = vrot.slane %v4785_v52, 1 }
 0x136   : > { %v1600_v37 = vsel %vm436_vm0, %v1597_v29, %v1599_v43  ;;  %v1611_v62 = vrot.slane %v4788_v25, 1  ;;  %v1603_v34 = vsel %vm436_vm0, %v1601_v1, %v1602_v15  ;;  %v1605_v46 = vsel %vm436_vm0, %v1602_v15, %v1604_v20  ;;  %v6439_v29 = vld [vmem:[#allocation19_spill] sm:$0xff]  ;;  %v6443_v43 = vld [vmem:[#allocation22_spill] sm:$0xff] }
 0x137   : > { %v1612_v61 = vrot.slane %v4791_v54, 1  ;;  %v1614_v27 = vrot.slane %v4794_v4, 1  ;;  %v1608_v36 = vsel %vm436_vm0, %v1606_v31, %v1607_v3  ;;  %v1610_v35 = vsel %vm436_vm0, %v1607_v3, %v1609_v19  ;;  %v6445_v15 = vld [vmem:[#allocation23_spill] sm:$0xff]  ;;  %v6447_v20 = vld [vmem:[#allocation26_spill] sm:$0xff] }
 0x138   : > { %v1616_v28 = vrot.slane %v4797_v33, 1  ;;  %v1617_v30 = vrot.slane %v4800_v58, 1  ;;  %v1619_v16 = vrot.slane %v4803_v49, 1  ;;  %v1621_v63 = vrot.slane %v4806_v24, 1  ;;  %v6449_v31 = vld [vmem:[#allocation27_spill] sm:$0xff] }
 0x139   : > { %v1613_v52 = vsel %vm436_vm0, %v1611_v62, %v1612_v61  ;;  %v1615_v25 = vsel %vm436_vm0, %v1612_v61, %v1614_v27  ;;  %v1622_v4 = vrot.slane %v4809_v6, 1  ;;  %v1624_v50 = vrot.slane %v4812_v56, 1  ;;  %v6455_v61 = vld [vmem:[#allocation32_spill] sm:$0xff]  ;;  %v6457_v27 = vld [vmem:[#allocation33_spill] sm:$0xff] }
 0x13a   : > { %v1618_v54 = vsel %vm436_vm0, %v1616_v28, %v1617_v30  ;;  %v1626_v23 = vrot.slane %v4815_v39, 1  ;;  %v1620_v33 = vsel %vm436_vm0, %v1617_v30, %v1619_v16  ;;  %v1627_v58 = vrot.slane %v4818_v42, 1  ;;  %v6434_v42 = vld [vmem:[#allocation16_spill] sm:$0xff] }
 0x13b   : > { %v1629_v60 = vrot.slane %v4821_v47, 1  ;;  %v1631_v17 = vrot.slane %v4824_v5, 1  ;;  %v1623_v49 = vsel %vm436_vm0, %v1621_v63, %v1622_v4  ;;  %v1625_v24 = vsel %vm436_vm0, %v1622_v4, %v1624_v50 }
 0x13c   : > { %v1632_v38 = vrot.slane %v4827_v41, 1  ;;  %v1634_v6 = vrot.slane %v4830_v53, 1  ;;  %v1628_v56 = vsel %vm436_vm0, %v1626_v23, %v1627_v58  ;;  %v4920_v13 = vadd.f32 %v4833_v8, %v4607_v7  ;;  %v6437_v53 = vld [vmem:[#allocation18_spill] sm:$0xff]  ;;  %v6441_v8 = vld [vmem:[#allocation20_spill] sm:$0xff] }
 0x13d   : > { %v1630_v39 = vsel %vm436_vm0, %v1627_v58, %v1629_v60  ;;  %v4924_v47 = vadd.f32 %v4836_v18, %v6434_v42  ;;  %v4930_v41 = vadd.f32 %v4839_v10, %v6435_v14  ;;  %v4934_v48 = vadd.f32 %v4842_v57, %v6437_v53 }
 0x13e   : > { %v1633_v5 = vsel %vm436_vm0, %v1631_v17, %v1632_v38  ;;  %v1635_v0 = vsel %vm436_vm0, %v1632_v38, %v1634_v6  ;;  %v4938_v7 = vadd.f32 %v4845_v11, %v6439_v29  ;;  %v4942_v18 = vadd.f32 %v4849_v12, %v6441_v8  ;;  %v6451_v11 = vld [vmem:[#allocation28_spill] sm:$0xff]  ;;  %v6453_v12 = vld [vmem:[#allocation31_spill] sm:$0xff] }
 0x13f   : > { %6436 = vst [vmem:[#allocation13_spill] sm:$0xff] %v4930_v41  ;;  %6438 = vst [vmem:[#allocation30_spill] sm:$0xff] %v4934_v48  ;;  %v4946_v1 = vadd.f32 %v4855_v26, %v6443_v43  ;;  %v4950_v10 = vadd.f32 %v4861_v51, %v6445_v15  ;;  %v4954_v57 = vadd.f32 %v4864_v45, %v6447_v20  ;;  %v6459_v51 = vld [vmem:[#allocation40_spill] sm:$0xff]  ;;  %v6491_v43 = vld [vmem:[#allocation29_spill] sm:$0xff] }
 0x140   : > { %6440 = vst [vmem:[#allocation34_spill] sm:$0xff] %v4938_v7  ;;  %6442 = vst [vmem:[#allocation24_spill] sm:$0xff] %v4942_v18  ;;  %v4957_v3 = vadd.f32 %v1580_v59, %v6449_v31  ;;  %v4960_v19 = vadd.f32 %v1583_v2, %v6451_v11  ;;  %v4963_v62 = vadd.f32 %v1585_v22, %v6453_v12  ;;  %v6461_v45 = vld [vmem:[#allocation36_spill] sm:$0xff]  ;;  %v6463_v59 = vld [vmem:[#allocation37_spill] sm:$0xff] }
 0x141   : > { %6444 = vst [vmem:[#allocation16_spill] sm:$0xff] %v4946_v1  ;;  %6446 = vst [vmem:[#allocation17_spill] sm:$0xff] %v4950_v10  ;;  %v4966_v26 = vadd.f32 %v1588_v55, %v6455_v61  ;;  %v4969_v28 = vadd.f32 %v1590_v9, %v6457_v27  ;;  %v4972_v30 = vadd.f32 %v1593_v44, %v6459_v51  ;;  %v6465_v2 = vld [vmem:[#allocation45_spill] sm:$0xff]  ;;  %v6469_v55 = vld [vmem:[#allocation42_spill] sm:$0xff] }
 0x142   : > { %6448 = vst [vmem:[#allocation18_spill] sm:$0xff] %v4954_v57  ;;  %6450 = vst [vmem:[#allocation19_spill] sm:$0xff] %v4957_v3  ;;  %v4975_v16 = vadd.f32 %v1595_v32, %v6461_v45  ;;  %v4978_v63 = vadd.f32 %v1598_v21, %v6463_v59  ;;  %v4981_v4 = vadd.f32 %v1600_v37, %v6465_v2  ;;  %v6467_v22 = vld [vmem:[#allocation41_spill] sm:$0xff]  ;;  %v6471_v9 = vld [vmem:[#allocation54_spill] sm:$0xff] }
 0x143   : > { %6452 = vst [vmem:[#allocation20_spill] sm:$0xff] %v4960_v19  ;;  %6454 = vst [vmem:[#allocation22_spill] sm:$0xff] %v4963_v62  ;;  %v4984_v50 = vadd.f32 %v1603_v34, %v6467_v22  ;;  %v4987_v23 = vadd.f32 %v1605_v46, %v6469_v55  ;;  %v4990_v58 = vadd.f32 %v1608_v36, %v6471_v9  ;;  %v6473_v44 = vld [vmem:[#allocation46_spill] sm:$0xff]  ;;  %v6477_v21 = vld [vmem:[#allocation11_spill] sm:$0xff] }
 0x144   : > { %6456 = vst [vmem:[#allocation23_spill] sm:$0xff] %v4966_v26  ;;  %6458 = vst [vmem:[#allocation26_spill] sm:$0xff] %v4969_v28  ;;  %v4993_v60 = vadd.f32 %v1610_v35, %v6473_v44  ;;  %v6475_v32 = vld [vmem:[#allocation10_spill] sm:$0xff]  ;;  %v4999_v38 = vadd.f32 %v1615_v25, %v6477_v21  ;;  %v2262_v37 = vld [vmem:[%s5646_s1 + $0x8] ss:$0 sm:$0xff]  ;;  %v5023_v15 = vadd.f32 %v1633_v5, %v6491_v43 }
 0x145   : > { %6460 = vst [vmem:[#allocation27_spill] sm:$0xff] %v4972_v30  ;;  %6462 = vst [vmem:[#allocation28_spill] sm:$0xff] %v4975_v16  ;;  %v4996_v17 = vadd.f32 %v1613_v52, %v6475_v32  ;;  %v6479_v34 = vld [vmem:[#allocation84_spill] sm:$0xff]  ;;  %v6481_v46 = vld [vmem:[#allocation85_spill] sm:$0xff] }
 0x146   : > { %6464 = vst [vmem:[#allocation31_spill] sm:$0xff] %v4978_v63  ;;  %6466 = vst [vmem:[#allocation32_spill] sm:$0xff] %v4981_v4  ;;  %v5005_v6 = vadd.f32 %v1618_v54, %v6479_v34  ;;  %v5008_v42 = vadd.f32 %v1620_v33, %v6481_v46  ;;  %v6483_v36 = vld [vmem:[#allocation86_spill] sm:$0xff]  ;;  %v6485_v35 = vld [vmem:[#allocation87_spill] sm:$0xff] }
 0x147   : > { %6468 = vst [vmem:[#allocation33_spill] sm:$0xff] %v4984_v50  ;;  %6470 = vst [vmem:[#allocation40_spill] sm:$0xff] %v4987_v23  ;;  %v5011_v14 = vadd.f32 %v1623_v49, %v6483_v36  ;;  %v5014_v53 = vadd.f32 %v1625_v24, %v6485_v35  ;;  %v6487_v52 = vld [vmem:[#allocation21_spill] sm:$0xff]  ;;  %v6493_v54 = vld [vmem:[#allocation12_spill] sm:$0xff] }
 0x148   : > { %6472 = vst [vmem:[#allocation36_spill] sm:$0xff] %v4990_v58  ;;  %6474 = vst [vmem:[#allocation37_spill] sm:$0xff] %v4993_v60  ;;  %v5017_v29 = vadd.f32 %v1628_v56, %v6487_v52  ;;  %v6489_v25 = vld [vmem:[#allocation25_spill] sm:$0xff]  ;;  %v5026_v20 = vadd.f32 %v1635_v0, %v6493_v54  ;;  %v6495_v33 = vld [vmem:[#allocation47_spill] sm:$0xff] }
 0x149   : > { %6476 = vst [vmem:[#allocation45_spill] sm:$0xff] %v4996_v17  ;;  %6478 = vst [vmem:[#allocation41_spill] sm:$0xff] %v4999_v38  ;;  %v5020_v8 = vadd.f32 %v1630_v39, %v6489_v25  ;;  %v1705_v31 = vmul.f32 %v6495_v33, %v2262_v37  ;;  %v6496_v11 = vld [vmem:[#allocation59_spill] sm:$0xff]  ;;  %v6497_v12 = vld [vmem:[#allocation50_spill] sm:$0xff] }
 0x14a   : > { %6480 = vst [vmem:[#allocation42_spill] sm:$0xff] %v5005_v6  ;;  %6482 = vst [vmem:[#allocation54_spill] sm:$0xff] %v5008_v42  ;;  %v1706_v49 = vmul.f32 %v6496_v11, %v2262_v37  ;;  %v1707_v61 = vmul.f32 %v6497_v12, %v2262_v37  ;;  %v6498_v24 = vld [vmem:[#allocation51_spill] sm:$0xff]  ;;  %v6499_v51 = vld [vmem:[#allocation64_spill] sm:$0xff] }
 0x14b   : > { %6484 = vst [vmem:[#allocation46_spill] sm:$0xff] %v5011_v14  ;;  %6486 = vst [vmem:[#allocation10_spill] sm:$0xff] %v5014_v53  ;;  %v1708_v27 = vmul.f32 %v6498_v24, %v2262_v37  ;;  %v1709_v56 = vmul.f32 %v6499_v51, %v2262_v37  ;;  %v6500_v45 = vld [vmem:[#allocation55_spill] sm:$0xff]  ;;  %v6501_v39 = vld [vmem:[#allocation56_spill] sm:$0xff] }
 0x14c   : > { %6488 = vst [vmem:[#allocation11_spill] sm:$0xff] %v5017_v29  ;;  %6490 = vst [vmem:[#allocation84_spill] sm:$0xff] %v5020_v8  ;;  %v1710_v59 = vmul.f32 %v6500_v45, %v2262_v37  ;;  %v1711_v2 = vmul.f32 %v6501_v39, %v2262_v37  ;;  %v6502_v22 = vld [vmem:[#allocation69_spill] sm:$0xff]  ;;  %v6503_v55 = vld [vmem:[#allocation60_spill] sm:$0xff]  ;;  %v1802_v10 = vrot.slane %v1706_v49, 2  ;;  %v1804_v1 = vrot.slane %v1707_v61, 2 }
 0x14d   : > { %6492 = vst [vmem:[#allocation85_spill] sm:$0xff] %v5023_v15  ;;  %6494 = vst [vmem:[#allocation86_spill] sm:$0xff] %v5026_v20  ;;  %v1712_v5 = vmul.f32 %v6502_v22, %v2262_v37  ;;  %v1713_v9 = vmul.f32 %v6503_v55, %v2262_v37  ;;  %v6504_v0 = vld [vmem:[#allocation61_spill] sm:$0xff]  ;;  %v6505_v32 = vld [vmem:[#allocation74_spill] sm:$0xff]  ;;  %v1807_v18 = vrot.slane %v1709_v56, 2 }
 0x14e   : > { %v5038_v44 = vmul.f32 %v6504_v0, %v2262_v37  ;;  %v5041_v21 = vmul.f32 %v6505_v32, %v2262_v37  ;;  %v6506_v34 = vld [vmem:[#allocation66_spill] sm:$0xff]  ;;  %v6507_v36 = vld [vmem:[#allocation79_spill] sm:$0xff]  ;;  %v6511_v12 = vld [vmem:[#allocation76_spill] sm:$0xff]  ;;  %v1809_v7 = vrot.slane %v1710_v59, 2 }
 0x14f   : > { %v5044_v46 = vmul.f32 %v6506_v34, %v2262_v37  ;;  %v5047_v35 = vmul.f32 %v6507_v36, %v2262_v37  ;;  %v6508_v52 = vld [vmem:[#allocation70_spill] sm:$0xff]  ;;  %v6510_v33 = vld [vmem:[#allocation75_spill] sm:$0xff]  ;;  %v5059_v24 = vmul.f32 %v6511_v12, %v2262_v37  ;;  %v6518_v12 = vld [vmem:[#allocation48_spill] sm:$0xff]  ;;  %v1812_v48 = vrot.slane %v1712_v5, 2 }
 0x150   : > { %v5050_v25 = vmul.f32 %v6508_v52, %v2262_v37  ;;  %v6509_v43 = vld [vmem:[#allocation82_spill] sm:$0xff]  ;;  %v5056_v11 = vmul.f32 %v6510_v33, %v2262_v37  ;;  %v6512_v51 = vld [vmem:[#allocation83_spill] sm:$0xff]  ;;  %v5080_v20 = vmul.f32 %v6518_v12, %v2262_v37  ;;  %v6528_v17 = vld [vmem:[#allocation72_spill] sm:$0xff]  ;;  %v1814_v41 = vrot.slane %v1713_v9, 2 }
 0x151   : > { %v5053_v54 = vmul.f32 %v6509_v43, %v2262_v37  ;;  %v5062_v45 = vmul.f32 %v6512_v51, %v2262_v37  ;;  %v6513_v39 = vld [vmem:[#allocation35_spill] sm:$0xff]  ;;  %v6514_v55 = vld [vmem:[#allocation38_spill] sm:$0xff]  ;;  %v6517_v43 = vld [vmem:[#allocation44_spill] sm:$0xff]  ;;  %v1817_v49 = vrot.slane %v5041_v21, 2  ;;  %v1827_v59 = vrot.slane %v5059_v24, 2 }
 0x152   : > { %v5065_v22 = vmul.f32 %v6513_v39, %v2262_v37  ;;  %v5068_v0 = vmul.f32 %v6514_v55, %v2262_v37  ;;  %v6515_v32 = vld [vmem:[#allocation39_spill] sm:$0xff]  ;;  %v5077_v33 = vmul.f32 %v6517_v43, %v2262_v37  ;;  %v6519_v51 = vld [vmem:[#allocation49_spill] sm:$0xff]  ;;  %v6520_v39 = vld [vmem:[#allocation52_spill] sm:$0xff]  ;;  %v5172_v61 = vsel %vm682_vm1, %v1812_v48, %v1814_v41 }
 0x153   : > { %v5071_v34 = vmul.f32 %v6515_v32, %v2262_v37  ;;  %v6516_v36 = vld [vmem:[#allocation43_spill] sm:$0xff]  ;;  %v5083_v15 = vmul.f32 %v6519_v51, %v2262_v37  ;;  %v5086_v8 = vmul.f32 %v6520_v39, %v2262_v37  ;;  %v6521_v55 = vld [vmem:[#allocation53_spill] sm:$0xff]  ;;  %v6524_v43 = vld [vmem:[#allocation62_spill] sm:$0xff] }
 0x154   : > { %v5074_v52 = vmul.f32 %v6516_v36, %v2262_v37  ;;  %v5089_v29 = vmul.f32 %v6521_v55, %v2262_v37  ;;  %v6522_v32 = vld [vmem:[#allocation57_spill] sm:$0xff]  ;;  %v6523_v36 = vld [vmem:[#allocation58_spill] sm:$0xff]  ;;  %v5098_v12 = vmul.f32 %v6524_v43, %v2262_v37  ;;  %v6525_v42 = vld [vmem:[#allocation63_spill] sm:$0xff]  ;;  %v1831_v5 = vrot.slane %v5065_v22, 2 }
 0x155   : > { %v5092_v53 = vmul.f32 %v6522_v32, %v2262_v37  ;;  %v5095_v14 = vmul.f32 %v6523_v36, %v2262_v37  ;;  %v5101_v51 = vmul.f32 %v6525_v42, %v2262_v37  ;;  %v6526_v6 = vld [vmem:[#allocation67_spill] sm:$0xff]  ;;  %v6527_v55 = vld [vmem:[#allocation68_spill] sm:$0xff]  ;;  %v5110_v32 = vmul.f32 %v6528_v17, %v2262_v37  ;;  %v6529_v60 = vld [vmem:[#allocation73_spill] sm:$0xff] }
 0x156   : > { %v5104_v39 = vmul.f32 %v6526_v6, %v2262_v37  ;;  %v5107_v38 = vmul.f32 %v6527_v55, %v2262_v37  ;;  %v5113_v36 = vmul.f32 %v6529_v60, %v2262_v37  ;;  %v6530_v58 = vld [vmem:[#allocation77_spill] sm:$0xff]  ;;  %v6531_v43 = vld [vmem:[#allocation78_spill] sm:$0xff]  ;;  %v6532_v42 = vld [vmem:[#allocation80_spill] sm:$0xff]  ;;  %v1832_v21 = vrot.slane %v5068_v0, 2 }
 0x157   : > { %v5116_v23 = vmul.f32 %v6530_v58, %v2262_v37  ;;  %v5119_v50 = vmul.f32 %v6531_v43, %v2262_v37  ;;  %v5122_v4 = vmul.f32 %v6532_v42, %v2262_v37  ;;  %v6533_v6 = vld [vmem:[#allocation81_spill] sm:$0xff]  ;;  %v6535_v17 = vld [vmem:[#allocation71_spill] sm:$0xff]  ;;  %v2370_v42 = vld [vmem:[%s2590_s9 + $0x190] sm:$0x3]  ;;  %v1841_v22 = vrot.slane %v5083_v15, 2 }
 0x158   : > { %v5125_v63 = vmul.f32 %v6533_v6, %v2262_v37  ;;  %v6534_v55 = vld [vmem:[#allocation65_spill] sm:$0xff]  ;;  %v5131_v30 = vmul.f32 %v6535_v17, %v2262_v37  ;;  %v5143_v19 = vmul.f32 %v2370_v42, %v2262_v37  ;;  %v6537_v6 = vld [vmem:[#allocation14_spill] sm:$0xff]  ;;  %v5152_v17 = vmul.f32 %v2262_v37, %v4782_v40 }
 0x159   : > { %v5128_v16 = vmul.f32 %v6534_v55, %v2262_v37  ;;  %v6536_v60 = vld [vmem:[#allocation9_spill] sm:$0xff]  ;;  %v5146_v3 = vmul.f32 %v2262_v37, %v6537_v6  ;;  %v6538_v55 = vld [vmem:[#allocation15_spill] sm:$0xff]  ;;  %v5158_v6 = vsel %vm682_vm1, %v1802_v10, %v1804_v1  ;;  %v1819_v1 = vrot.slane %v5044_v46, 2 }
 0x15a   : > { %v5134_v28 = vmul.f32 %v6536_v60, %v2262_v37  ;;  %v2368_v58 = vld [vmem:[%s2590_s9 + $0x180] sm:$0xff]  ;;  %v2369_v43 = vld [vmem:[%s2590_s9 + $0x188] sm:$0xff]  ;;  %v5149_v57 = vmul.f32 %v2262_v37, %v6538_v55  ;;  %v1801_v60 = vrot.slane %v1705_v31, 2  ;;  %v1816_v55 = vrot.slane %v5038_v44, 2  ;;  %s2252_s9 = sshll.u32 %s5224_s8, 8 }
 0x15b   : > { %v5137_v26 = vmul.f32 %v2368_v58, %v2262_v37  ;;  %v5140_v62 = vmul.f32 %v2369_v43, %v2262_v37  ;;  %v1806_v58 = vrot.slane %v1708_v27, 2  ;;  %v1811_v43 = vrot.slane %v1711_v2, 2  ;;  %s5291_s10 = scalar_lea.vmem [#allocation2], %s2252_s9 }
 0x15c   : > { %v5155_v42 = vsel %vm682_vm1, %v1801_v60, %v1802_v10  ;;  %v5165_v37 = vsel %vm682_vm1, %v1807_v18, %v1809_v7  ;;  %v1821_v10 = vrot.slane %v5047_v35, 2  ;;  %v1822_v27 = vrot.slane %v5050_v25, 2  ;;  %s2107_s12 = sshll.u32 %s5291_s10, 4  ;;  %s5407_s12 = int_to_ptr.vmem [resolvable:$true] %s2107_s12 }
 0x15d   : > { %v5162_v40 = vsel %vm682_vm1, %v1806_v58, %v1807_v18  ;;  %v5168_v31 = vsel %vm682_vm1, %v1811_v43, %v1812_v48  ;;  %v5178_v56 = vsel %vm682_vm1, %v1816_v55, %v1817_v49  ;;  %v1824_v7 = vrot.slane %v5053_v54, 2  ;;  %s2371_s27 = scalar_lea.vmem %s5407_s12, 4096  ;;  %p2378_p0 = scmp.lt.s32.totalorder %s5407_s12, %s2376_s29 }
 0x15e   : > { %v1826_v18 = vrot.slane %v5056_v11, 2  ;;  %v5184_v2 = vsel %vm682_vm1, %v1817_v49, %v1819_v1  ;;  %v5187_v41 = vsel %vm682_vm1, %v1821_v10, %v1822_v27  ;;  %v1829_v48 = vrot.slane %v5062_v45, 2  ;;  %p2372_p11 = scmp.ne.s32.totalorder %s5407_s12, %s2371_s27  ;;  %p2379_p1 = scmp.lt.s32.totalorder %s2377_s30, %s2371_s27 }
 0x15f   : > { %v5192_v9 = vsel %vm682_vm1, %v1822_v27, %v1824_v7  ;;  %v1834_v46 = vrot.slane %v5071_v34, 2  ;;  %v1836_v25 = vrot.slane %v5074_v52, 2  ;;  %v1837_v54 = vrot.slane %v5077_v33, 2 }
 0x160   : > { %v5195_v44 = vsel %vm682_vm1, %v1826_v18, %v1827_v59  ;;  %v5200_v35 = vsel %vm682_vm1, %v1827_v59, %v1829_v48  ;;  %v1839_v11 = vrot.slane %v5080_v20, 2  ;;  %v5206_v24 = vsel %vm682_vm1, %v1831_v5, %v1832_v21  ;;  %p2373_p12 = pnand %p2372_p11, %p2565_p5  ;;  %p2380_p2 = por %p2379_p1, %p2378_p0 }
 0x161   : > { %v5209_v45 = vsel %vm682_vm1, %v1832_v21, %v1834_v46  ;;  %v1842_v0 = vrot.slane %v5086_v8, 2  ;;  %v1838_v34 = vsel %vm682_vm1, %v1836_v25, %v1837_v54  ;;  %v1844_v52 = vrot.slane %v5089_v29, 2 }
 0x162   : > { %v1840_v60 = vsel %vm682_vm1, %v1837_v54, %v1839_v11  ;;  %v1846_v33 = vrot.slane %v5092_v53, 2  ;;  %v1847_v58 = vrot.slane %v5095_v14, 2  ;;  %v1849_v43 = vrot.slane %v5098_v12, 2  ;;  %v6539_v54 = vld [vmem:[#allocation13_spill] sm:$0xff]  ;;  %p2374_p13 = pneg %p2373_p12 }
 0x163   : > { %v5218_v20 = vsel %vm682_vm1, %v1841_v22, %v1842_v0  ;;  %v1851_v55 = vrot.slane %v5101_v51, 2  ;;  %v1845_v8 = vsel %vm682_vm1, %v1842_v0, %v1844_v52  ;;  %v1852_v15 = vrot.slane %v5104_v39, 2  ;;  %v6541_v22 = vld [vmem:[#allocation34_spill] sm:$0xff]  ;;  %v6544_v52 = vld [vmem:[#allocation17_spill] sm:$0xff] }
 0x164   : > { %v1854_v29 = vrot.slane %v5107_v38, 2  ;;  %v1856_v53 = vrot.slane %v5110_v32, 2  ;;  %v1848_v49 = vsel %vm682_vm1, %v1846_v33, %v1847_v58  ;;  %v1850_v1 = vsel %vm682_vm1, %v1847_v58, %v1849_v43  ;;  %v6548_v58 = vld [vmem:[#allocation22_spill] sm:$0xff]  ;;  %p2381_p3 = pnand %p2380_p2, %p2374_p13 }
 0x165   : > { %v1857_v14 = vrot.slane %v5113_v36, 2  ;;  %v1859_v12 = vrot.slane %v5116_v23, 2  ;;  %v1853_v51 = vsel %vm682_vm1, %v1851_v55, %v1852_v15  ;;  %v1861_v27 = vrot.slane %v5119_v50, 2  ;;  %v6549_v55 = vld [vmem:[#allocation23_spill] sm:$0xff] }
 0x166   : > { %v1855_v10 = vsel %vm682_vm1, %v1852_v15, %v1854_v29  ;;  %v1862_v39 = vrot.slane %v5122_v4, 2  ;;  %v1864_v7 = vrot.slane %v5125_v63, 2  ;;  %v1866_v18 = vrot.slane %v5128_v16, 2 }
 0x167   : > { %v1858_v38 = vsel %vm682_vm1, %v1856_v53, %v1857_v14  ;;  %v1860_v32 = vsel %vm682_vm1, %v1857_v14, %v1859_v12  ;;  %v1867_v23 = vrot.slane %v5131_v30, 2  ;;  %v1869_v59 = vrot.slane %v5134_v28, 2  ;;  %v6555_v14 = vld [vmem:[#allocation33_spill] sm:$0xff] }
 0x168   : > { %v1863_v36 = vsel %vm682_vm1, %v1861_v27, %v1862_v39  ;;  %v1871_v48 = vrot.slane %v5137_v26, 2  ;;  %v1865_v50 = vsel %vm682_vm1, %v1862_v39, %v1864_v7  ;;  %v1872_v4 = vrot.slane %v5140_v62, 2  ;;  %v6556_v27 = vld [vmem:[#allocation40_spill] sm:$0xff] }
 0x169   : > { %v1874_v5 = vrot.slane %v5143_v19, 2  ;;  %v1876_v21 = vrot.slane %v5146_v3, 2  ;;  %v1868_v63 = vsel %vm682_vm1, %v1866_v18, %v1867_v23  ;;  %v1870_v16 = vsel %vm682_vm1, %v1867_v23, %v1869_v59  ;;  %v6560_v23 = vld [vmem:[#allocation41_spill] sm:$0xff] }
 0x16a   : > { %v1877_v46 = vrot.slane %v5149_v57, 2  ;;  %v1879_v30 = vrot.slane %v5152_v17, 2  ;;  %v1873_v28 = vsel %vm682_vm1, %v1871_v48, %v1872_v4  ;;  %v5259_v25 = vadd.f32 %v5155_v42, %v4920_v13  ;;  %v6540_v17 = vld [vmem:[#allocation30_spill] sm:$0xff]  ;;  %v6542_v42 = vld [vmem:[#allocation24_spill] sm:$0xff] }
 0x16b   : > { %v1875_v26 = vsel %vm682_vm1, %v1872_v4, %v1874_v5  ;;  %v5263_v19 = vadd.f32 %v5158_v6, %v4924_v47  ;;  %v5269_v57 = vadd.f32 %v5162_v40, %v6539_v54  ;;  %v5273_v11 = vadd.f32 %v5165_v37, %v6540_v17  ;;  %v6543_v6 = vld [vmem:[#allocation16_spill] sm:$0xff]  ;;  %v6545_v37 = vld [vmem:[#allocation18_spill] sm:$0xff] }
 0x16c   : > { %v1878_v3 = vsel %vm682_vm1, %v1876_v21, %v1877_v46  ;;  %v1880_v62 = vsel %vm682_vm1, %v1877_v46, %v1879_v30  ;;  %v5277_v13 = vadd.f32 %v5168_v31, %v6541_v22  ;;  %v5281_v47 = vadd.f32 %v5172_v61, %v6542_v42  ;;  %1945 = vst [vmem:[%s5291_s10] sm:$0xff] %v5259_v25  ;;  %v6546_v61 = vld [vmem:[#allocation19_spill] sm:$0xff]  ;;  %v6563_v4 = vld [vmem:[#allocation46_spill] sm:$0xff]  ;;  %v6567_v46 = vld [vmem:[#allocation85_spill] sm:$0xff] }
 0x16d   : > { %v5285_v0 = vadd.f32 %v5178_v56, %v6543_v6  ;;  %v5289_v40 = vadd.f32 %v5184_v2, %v6544_v52  ;;  %1946 = vst [vmem:[%s5291_s10 + $0x8] sm:$0xff] %v5263_v19  ;;  %v5299_v31 = vadd.f32 %v5187_v41, %v6545_v37  ;;  %v5303_v56 = vadd.f32 %v5192_v9, %v6546_v61  ;;  %v6547_v2 = vld [vmem:[#allocation20_spill] sm:$0xff]  ;;  %v6550_v9 = vld [vmem:[#allocation26_spill] sm:$0xff] }
 0x16e   : > { %v5307_v33 = vadd.f32 %v5195_v44, %v6547_v2  ;;  %v5311_v43 = vadd.f32 %v5200_v35, %v6548_v58  ;;  %1947 = vst [vmem:[%s5291_s10 + $0x10] sm:$0xff] %v5269_v57  ;;  %1948 = vst [vmem:[%s5291_s10 + $0x18] sm:$0xff] %v5273_v11  ;;  %v5319_v41 = vadd.f32 %v5206_v24, %v6549_v55  ;;  %v6551_v44 = vld [vmem:[#allocation27_spill] sm:$0xff]  ;;  %v6552_v35 = vld [vmem:[#allocation28_spill] sm:$0xff] }
 0x16f   : > { %v5323_v15 = vadd.f32 %v5209_v45, %v6550_v9  ;;  %v5326_v29 = vadd.f32 %v1838_v34, %v6551_v44  ;;  %v5329_v53 = vadd.f32 %v1840_v60, %v6552_v35  ;;  %1949 = vst [vmem:[%s5291_s10 + $0x20] sm:$0xff] %v5277_v13  ;;  %1950 = vst [vmem:[%s5291_s10 + $0x28] sm:$0xff] %v5281_v47  ;;  %v6553_v24 = vld [vmem:[#allocation31_spill] sm:$0xff]  ;;  %v6554_v34 = vld [vmem:[#allocation32_spill] sm:$0xff] }
 0x170   : > { %1951 = vst [vmem:[%s5291_s10 + $0x30] sm:$0xff] %v5285_v0  ;;  %1952 = vst [vmem:[%s5291_s10 + $0x38] sm:$0xff] %v5289_v40  ;;  %v5343_v45 = vadd.f32 %v5218_v20, %v6553_v24  ;;  %v5346_v60 = vadd.f32 %v1845_v8, %v6554_v34  ;;  %v5349_v12 = vadd.f32 %v1848_v49, %v6555_v14  ;;  %v6557_v20 = vld [vmem:[#allocation36_spill] sm:$0xff]  ;;  %v6558_v49 = vld [vmem:[#allocation37_spill] sm:$0xff] }
 0x171   : > { %v5352_v39 = vadd.f32 %v1850_v1, %v6556_v27  ;;  %1953 = vst [vmem:[%s5291_s10 + $0x40] sm:$0xff] %v5299_v31  ;;  %1954 = vst [vmem:[%s5291_s10 + $0x48] sm:$0xff] %v5303_v56  ;;  %v5363_v8 = vadd.f32 %v1853_v51, %v6557_v20  ;;  %v5366_v7 = vadd.f32 %v1855_v10, %v6558_v49  ;;  %v6559_v1 = vld [vmem:[#allocation45_spill] sm:$0xff]  ;;  %v6561_v51 = vld [vmem:[#allocation42_spill] sm:$0xff] }
 0x172   : > { %1955 = vst [vmem:[%s5291_s10 + $0x50] sm:$0xff] %v5307_v33  ;;  %1956 = vst [vmem:[%s5291_s10 + $0x58] sm:$0xff] %v5311_v43  ;;  %v5369_v18 = vadd.f32 %v1858_v38, %v6559_v1  ;;  %v5372_v59 = vadd.f32 %v1860_v32, %v6560_v23  ;;  %v5383_v48 = vadd.f32 %v1863_v36, %v6561_v51  ;;  %v6562_v10 = vld [vmem:[#allocation54_spill] sm:$0xff]  ;;  %v6565_v36 = vld [vmem:[#allocation11_spill] sm:$0xff] }
 0x173   : > { %1957 = vst [vmem:[%s5291_s10 + $0x60] sm:$0xff] %v5319_v41  ;;  %1958 = vst [vmem:[%s5291_s10 + $0x68] sm:$0xff] %v5323_v15  ;;  %v5386_v38 = vadd.f32 %v1865_v50, %v6562_v10  ;;  %v5389_v32 = vadd.f32 %v1868_v63, %v6563_v4  ;;  %v6564_v5 = vld [vmem:[#allocation10_spill] sm:$0xff]  ;;  %v5410_v50 = vadd.f32 %v1873_v28, %v6565_v36  ;;  %v6566_v63 = vld [vmem:[#allocation84_spill] sm:$0xff] }
 0x174   : > { %1959 = vst [vmem:[%s5291_s10 + $0x70] sm:$0xff] %v5326_v29  ;;  %1960 = vst [vmem:[%s5291_s10 + $0x78] sm:$0xff] %v5329_v53  ;;  %v5392_v21 = vadd.f32 %v1870_v16, %v6564_v5  ;;  %v5413_v16 = vadd.f32 %v1875_v26, %v6566_v63  ;;  %v5416_v30 = vadd.f32 %v1878_v3, %v6567_v46  ;;  %v6568_v54 = vld [vmem:[#allocation86_spill] sm:$0xff] }
 0x175   : > { %1961 = vst [vmem:[%s5291_s10 + $0x80] sm:$0xff] %v5343_v45  ;;  %1962 = vst [vmem:[%s5291_s10 + $0x88] sm:$0xff] %v5346_v60  ;;  %v5419_v17 = vadd.f32 %v1880_v62, %v6568_v54  ;;  %v1977_v28 = vadd.f32 %v5269_v57, %v5259_v25  ;;  %v1992_v26 = vadd.f32 %v5273_v11, %v5263_v19 }
 0x176   : > { %1963 = vst [vmem:[%s5291_s10 + $0x90] sm:$0xff] %v5349_v12  ;;  %1964 = vst [vmem:[%s5291_s10 + $0x98] sm:$0xff] %v5352_v39 }
 0x177   : > { %1965 = vst [vmem:[%s5291_s10 + $0xa0] sm:$0xff] %v5363_v8  ;;  %1966 = vst [vmem:[%s5291_s10 + $0xa8] sm:$0xff] %v5366_v7  ;;  %v1978_v3 = vadd.f32 %v1977_v28, %v5277_v13  ;;  %v1993_v62 = vadd.f32 %v1992_v26, %v5281_v47 }
 0x178   : > { %1967 = vst [vmem:[%s5291_s10 + $0xb0] sm:$0xff] %v5369_v18  ;;  %1968 = vst [vmem:[%s5291_s10 + $0xb8] sm:$0xff] %v5372_v59 }
 0x179   : > { %1969 = vst [vmem:[%s5291_s10 + $0xc0] sm:$0xff] %v5383_v48  ;;  %1970 = vst [vmem:[%s5291_s10 + $0xc8] sm:$0xff] %v5386_v38 }
 0x17a   : > { %1971 = vst [vmem:[%s5291_s10 + $0xd0] sm:$0xff] %v5389_v32  ;;  %1972 = vst [vmem:[%s5291_s10 + $0xd8] sm:$0xff] %v5392_v21 }
 0x17b   : > { %1973 = vst [vmem:[%s5291_s10 + $0xe0] sm:$0xff] %v5410_v50  ;;  %1974 = vst [vmem:[%s5291_s10 + $0xe8] sm:$0xff] %v5413_v16 }
 0x17c   : > { %1975 = vst [vmem:[%s5291_s10 + $0xf0] sm:$0xff] %v5416_v30  ;;  %1976 = vst [vmem:[%s5291_s10 + $0xf8] sm:$0xff] %v5419_v17 }
 0x17d   : > { %2384 = shalt.err (!%p2381_p3)
}
 0x17e   : > { %s2385_s5 = scalar_lea.hbm %s5405_s22, 4096  ;;  %s2389_s9 = scalar_lea.hbm %s5647_s2, 8192 }
 0x17f   : > { %p2386_p4 = scmp.ne.s32.totalorder %s5405_s22, %s2385_s5  ;;  %p2390_p9 = scmp.lt.u32.totalorder %s5405_s22, %s5647_s2 }
 0x180   : > { %p2391_p10 = scmp.lt.u32.totalorder %s2389_s9, %s2385_s5  ;;  %p2393_p12 = scmp.lt.u32.totalorder %s2385_s5, %s5405_s22 }
 0x181   : > { %p2387_p7 = pnand %p2386_p4, %p2565_p5 }
 0x182   : > { %p2392_p11 = por %p2391_p10, %p2390_p9 }
 0x183   : > { %p2388_p8 = pneg %p2387_p7 }
 0x184   : > { %p2394_p13 = por %p2393_p12, %p2392_p11 }
 0x186   : > { %p2395_p0 = pnand %p2394_p13, %p2388_p8 }
 0x188   : > { %2398 = shalt.err (!%p2395_p0)
}
 0x189   : > { %s2496_s13 = smov 128   ;;  %s2497_s14 = smov 8   ;;  %v1979_v22 = vadd.f32 %v1978_v3, %v5285_v0  ;;  %v1994_v42 = vadd.f32 %v1993_v62, %v5289_v40  ;;  %v2015_v37 = vmul.f32 %v5259_v25, %v5259_v25  ;;  %v2016_v61 = vmul.f32 %v5263_v19, %v5263_v19 }
 0x18a   : > { %2272 = dma.vmem_to_hbm [thread:$0]  (%p2565_p5), %s5407_s12, 4096, %s5405_s22, %s2086_s23, %s2496_s13, %s2496_s13, %s2497_s14   ;;  %v2017_v2 = vmul.f32 %v5269_v57, %v5269_v57  ;;  %v2018_v58 = vmul.f32 %v5273_v11, %v5273_v11  ;;  %v2019_v44 = vmul.f32 %v5277_v13, %v5277_v13  ;;  %v2020_v35 = vmul.f32 %v5281_v47, %v5281_v47 }
 0x18b   : > { %v1980_v6 = vadd.f32 %v1979_v22, %v5299_v31  ;;  %v1995_v52 = vadd.f32 %v1994_v42, %v5303_v56  ;;  %v2021_v57 = vmul.f32 %v5285_v0, %v5285_v0  ;;  %v2022_v11 = vmul.f32 %v5289_v40, %v5289_v40  ;;  %s200_s12 = scalar_lea.vmem [#allocation4], %s5224_s8  ;;  %s2090_s23 = sand.u32 1, %s2546_s19  }
 0x18c   : > { %v2047_v24 = vadd.f32 %v2017_v2, %v2015_v37  ;;  %v2062_v34 = vadd.f32 %v2018_v58, %v2016_v61  ;;  %v2023_v13 = vmul.f32 %v5299_v31, %v5299_v31  ;;  %v2024_v47 = vmul.f32 %v5303_v56, %v5303_v56  ;;  %s2123_s22 = sshll.u32 %s200_s12, 4  ;;  %s2266_s27 = sshll.u32 %s2546_s19, 4  ;;  %s5568_s22 = int_to_ptr.vmem [resolvable:$true] %s2123_s22 }
 0x18d   : > { %v1981_v55 = vadd.f32 %v1980_v6, %v5307_v33  ;;  %v1996_v9 = vadd.f32 %v1995_v52, %v5311_v43  ;;  %v2025_v40 = vmul.f32 %v5307_v33, %v5307_v33  ;;  %v2026_v23 = vmul.f32 %v5311_v43, %v5311_v43  ;;  %s5575_s30 = scalar_lea.hbm %s5648_s3, %s2266_s27  ;;  %s5577_s5 = scalar_lea.sflag [#allocation5], %s2090_s23 }
 0x18e   : > { %v2048_v20 = vadd.f32 %v2047_v24, %v2019_v44  ;;  %v2063_v49 = vadd.f32 %v2062_v34, %v2020_v35  ;;  %v2027_v56 = vmul.f32 %v5319_v41, %v5319_v41  ;;  %v2028_v5 = vmul.f32 %v5323_v15, %v5323_v15  ;;  %s2399_s6 = scalar_lea.vmem %s5568_s22, 16  ;;  %s2498_s7 = smov [#allocation4]  }
 0x18f   : > { %v1982_v25 = vadd.f32 %v1981_v55, %v5319_v41  ;;  %v1997_v19 = vadd.f32 %v1996_v9, %v5323_v15  ;;  %v2029_v43 = vmul.f32 %v5326_v29, %v5326_v29  ;;  %v2030_v54 = vmul.f32 %v5329_v53, %v5329_v53  ;;  %p2400_p1 = scmp.ne.s32.totalorder %s5568_s22, %s2399_s6  ;;  %s2403_s9 = sshll.u32 %s2498_s7, 4  ;;  %s2404_s9 = int_to_ptr.vmem [resolvable:$false] %s2403_s9 }
 0x190   : > { %v2049_v51 = vadd.f32 %v2048_v20, %v2021_v57  ;;  %v2064_v10 = vadd.f32 %v2063_v49, %v2022_v11  ;;  %v2031_v15 = vmul.f32 %v5343_v45, %v5343_v45  ;;  %v2032_v62 = vmul.f32 %v5346_v60, %v5346_v60  ;;  %s2405_s10 = scalar_lea.vmem %s2404_s9, 32  ;;  %p2406_p4 = scmp.lt.s32.totalorder %s5568_s22, %s2404_s9 }
 0x191   : > { %v1983_v14 = vadd.f32 %v1982_v25, %v5326_v29  ;;  %v1998_v27 = vadd.f32 %v1997_v19, %v5329_v53  ;;  %v2033_v53 = vmul.f32 %v5349_v12, %v5349_v12  ;;  %v2034_v52 = vmul.f32 %v5352_v39, %v5352_v39  ;;  %p2401_p2 = pnand %p2400_p1, %p2565_p5  ;;  %p2407_p7 = scmp.lt.s32.totalorder %s2405_s10, %s2399_s6 }
 0x192   : > { %v2050_v36 = vadd.f32 %v2049_v51, %v2023_v13  ;;  %v2065_v63 = vadd.f32 %v2064_v10, %v2024_v47  ;;  %v2036_v58 = vmul.f32 %v5366_v7, %v5366_v7  ;;  %v2038_v35 = vmul.f32 %v5372_v59, %v5372_v59 }
 0x193   : > { %v1984_v1 = vadd.f32 %v1983_v14, %v5343_v45  ;;  %v1999_v0 = vadd.f32 %v1998_v27, %v5346_v60  ;;  %v2035_v60 = vmul.f32 %v5363_v8, %v5363_v8  ;;  %v2040_v11 = vmul.f32 %v5386_v38, %v5386_v38  ;;  %p2402_p3 = pneg %p2401_p2  ;;  %p2408_p8 = por %p2407_p7, %p2406_p4 }
 0x194   : > { %v2051_v28 = vadd.f32 %v2050_v36, %v2025_v40  ;;  %v2066_v26 = vadd.f32 %v2065_v63, %v2026_v23  ;;  %v2043_v20 = vmul.f32 %v5410_v50, %v5410_v50 }
 0x195   : > { %v1985_v4 = vadd.f32 %v1984_v1, %v5349_v12  ;;  %v2000_v31 = vadd.f32 %v1999_v0, %v5352_v39  ;;  %v2037_v39 = vmul.f32 %v5369_v18, %v5369_v18  ;;  %p2409_p9 = pnand %p2408_p8, %p2402_p3 }
 0x196   : > { %v2052_v22 = vadd.f32 %v2051_v28, %v2027_v56  ;;  %v2067_v42 = vadd.f32 %v2066_v26, %v2028_v5 }
 0x197   : > { %v1986_v46 = vadd.f32 %v1985_v4, %v5363_v8  ;;  %v2001_v33 = vadd.f32 %v2000_v31, %v5366_v7  ;;  %v2039_v7 = vmul.f32 %v5383_v48, %v5383_v48 }
 0x198   : > { %v2053_v37 = vadd.f32 %v2052_v22, %v2029_v43  ;;  %v2068_v61 = vadd.f32 %v2067_v42, %v2030_v54 }
 0x199   : > { %v1987_v3 = vadd.f32 %v1986_v46, %v5369_v18  ;;  %v2002_v41 = vadd.f32 %v2001_v33, %v5372_v59  ;;  %v2041_v18 = vmul.f32 %v5389_v32, %v5389_v32  ;;  %v2042_v59 = vmul.f32 %v5392_v21, %v5392_v21 }
 0x19a   : > { %v2054_v55 = vadd.f32 %v2053_v37, %v2031_v15  ;;  %v2069_v9 = vadd.f32 %v2068_v61, %v2032_v62 }
 0x19b   : > { %v1988_v6 = vadd.f32 %v1987_v3, %v5383_v48  ;;  %v2003_v29 = vadd.f32 %v2002_v41, %v5386_v38  ;;  %v2044_v48 = vmul.f32 %v5413_v16, %v5413_v16 }
 0x19c   : > { %v2055_v25 = vadd.f32 %v2054_v55, %v2033_v53  ;;  %v2070_v19 = vadd.f32 %v2069_v9, %v2034_v52 }
 0x19d   : > { %v1989_v2 = vadd.f32 %v1988_v6, %v5389_v32  ;;  %v2004_v45 = vadd.f32 %v2003_v29, %v5392_v21  ;;  %v2045_v32 = vmul.f32 %v5416_v30, %v5416_v30  ;;  %v2046_v21 = vmul.f32 %v5419_v17, %v5419_v17 }
 0x19e   : > { %v2056_v24 = vadd.f32 %v2055_v25, %v2035_v60  ;;  %v2071_v34 = vadd.f32 %v2070_v19, %v2036_v58 }
 0x19f   : > { %v1990_v44 = vadd.f32 %v1989_v2, %v5410_v50  ;;  %v2005_v12 = vadd.f32 %v2004_v45, %v5413_v16 }
 0x1a0   : > { %v2057_v27 = vadd.f32 %v2056_v24, %v2037_v39  ;;  %v2072_v13 = vadd.f32 %v2071_v34, %v2038_v35 }
 0x1a1   : > { %v1991_v57 = vadd.f32 %v1990_v44, %v5416_v30  ;;  %v2006_v8 = vadd.f32 %v2005_v12, %v5419_v17 }
 0x1a2   : > { %v2058_v38 = vadd.f32 %v2057_v27, %v2039_v7  ;;  %v2073_v49 = vadd.f32 %v2072_v13, %v2040_v11 }
 0x1a3   : > { %v2007_v14 = vadd.f32 %v2006_v8, %v1991_v57 }
 0x1a4   : > { %v2059_v0 = vadd.f32 %v2058_v38, %v2041_v18  ;;  %v2074_v40 = vadd.f32 %v2073_v49, %v2042_v59 }
 0x1a5   : > { %v2008_v47 = vrot.slane %v2007_v14, 4 }
 0x1a6   : > { %v2060_v51 = vadd.f32 %v2059_v0, %v2043_v20  ;;  %v2075_v50 = vadd.f32 %v2074_v40, %v2044_v48 }
 0x1a7   : > { %v2009_v1 = vadd.f32 %v2008_v47, %v2007_v14 }
 0x1a8   : > { %v2061_v16 = vadd.f32 %v2060_v51, %v2045_v32  ;;  %v2076_v4 = vadd.f32 %v2075_v50, %v2046_v21 }
 0x1a9   : > { %v2010_v23 = vrot.slane %v2009_v1, 2 }
 0x1aa   : > { %v2077_v30 = vadd.f32 %v2076_v4, %v2061_v16 }
 0x1ab   : > { %v2011_v10 = vadd.f32 %v2010_v23, %v2009_v1 }
 0x1ac   : > { %v2078_v56 = vrot.slane %v2077_v30, 4 }
 0x1ad   : > { %v2012_v31 = vrot.slane %v2011_v10, 1 }
 0x1ae   : > { %v2079_v5 = vadd.f32 %v2078_v56, %v2077_v30 }
 0x1af   : > { %v2013_v17 = vadd.f32 %v2012_v31, %v2011_v10 }
 0x1b1   : > { %2014 = vst [vmem:[%s200_s12] sm:$0x1] %v2013_v17 }
 0x1b2   : > { %2412 = shalt.err (!%p2409_p9)
}
 0x1b3   : > { %s2413_s11 = scalar_lea.hbm %s5575_s30, 16  ;;  %s2417_s12 = scalar_lea.hbm %s5648_s3, 32 }
 0x1b4   : > { %p2414_p10 = scmp.ne.s32.totalorder %s5575_s30, %s2413_s11  ;;  %p2418_p13 = scmp.lt.u32.totalorder %s5575_s30, %s5648_s3 }
 0x1b5   : > { %p2419_p0 = scmp.lt.u32.totalorder %s2417_s12, %s2413_s11  ;;  %p2421_p2 = scmp.lt.u32.totalorder %s2413_s11, %s5575_s30 }
 0x1b6   : > { %p2415_p11 = pnand %p2414_p10, %p2565_p5 }
 0x1b7   : > { %p2420_p1 = por %p2419_p0, %p2418_p13 }
 0x1b8   : > { %p2416_p12 = pneg %p2415_p11 }
 0x1b9   : > { %p2422_p3 = por %p2421_p2, %p2420_p1 }
 0x1bb   : > { %p2423_p4 = pnand %p2422_p3, %p2416_p12 }
 0x1bd   : > { %2426 = shalt.err (!%p2423_p4)
}
 0x1be   : > { %2273 = dma.vmem_to_hbm [thread:$0]  (%p2565_p5), %s5568_s22, 16, %s5575_s30, %s5577_s5   ;;  %v2080_v36 = vrot.slane %v2079_v5, 2 }
 0x1bf   : > { %s206_s29 = scalar_lea.vmem [#allocation6], %s5224_s8  ;;  %s2134_s10 = scalar_lea.hbm %s5649_s4, %s2266_s27 }
 0x1c0   : > { %v2081_v63 = vadd.f32 %v2080_v36, %v2079_v5  ;;  %s2136_s6 = sshll.u32 %s206_s29, 4  ;;  %s2499_s8 = smov [#allocation6]   ;;  %s5602_s6 = int_to_ptr.vmem [resolvable:$true] %s2136_s6 }
 0x1c1   : > { %s2427_s11 = scalar_lea.vmem %s5602_s6, 16  ;;  %s2431_s22 = sshll.u32 %s2499_s8, 4  ;;  %s2432_s22 = int_to_ptr.vmem [resolvable:$false] %s2431_s22 }
 0x1c2   : > { %v2082_v46 = vrot.slane %v2081_v63, 1  ;;  %p2428_p7 = scmp.ne.s32.totalorder %s5602_s6, %s2427_s11  ;;  %s2433_s30 = scalar_lea.vmem %s2432_s22, 32 }
 0x1c3   : > { %p2434_p10 = scmp.lt.s32.totalorder %s5602_s6, %s2432_s22  ;;  %p2435_p11 = scmp.lt.s32.totalorder %s2433_s30, %s2427_s11 }
 0x1c4   : > { %v2083_v33 = vadd.f32 %v2082_v46, %v2081_v63  ;;  %p2429_p8 = pnand %p2428_p7, %p2565_p5 }
 0x1c5   : > { %p2436_p12 = por %p2435_p11, %p2434_p10 }
 0x1c6   : > { %2084 = vst [vmem:[%s206_s29] sm:$0x1] %v2083_v33  ;;  %p2430_p9 = pneg %p2429_p8 }
 0x1c8   : > { %p2437_p13 = pnand %p2436_p12, %p2430_p9 }
 0x1ca   : > { %2440 = shalt.err (!%p2437_p13)
}
 0x1cb   : > { %s2441_s19 = scalar_lea.hbm %s2134_s10, 16  ;;  %s2445_s14 = scalar_lea.hbm %s5649_s4, 32 }
 0x1cc   : > { %p2442_p0 = scmp.ne.s32.totalorder %s2134_s10, %s2441_s19  ;;  %p2446_p3 = scmp.lt.u32.totalorder %s2134_s10, %s5649_s4 }
 0x1cd   : > { %p2447_p4 = scmp.lt.u32.totalorder %s2445_s14, %s2441_s19  ;;  %p2449_p8 = scmp.lt.u32.totalorder %s2441_s19, %s2134_s10 }
 0x1ce   : > { %p2443_p1 = pnand %p2442_p0, %p2565_p5 }
 0x1cf   : > { %p2448_p7 = por %p2447_p4, %p2446_p3 }
 0x1d0   : > { %p2444_p2 = pneg %p2443_p1 }
 0x1d1   : > { %p2450_p10 = por %p2449_p8, %p2448_p7 }
 0x1d3   : > { %p2451_p9 = pnand %p2450_p10, %p2444_p2 }
 0x1d5   : > { %2454 = shalt.err (!%p2451_p9)
}
 0x1d6   : > { %2274 = dma.vmem_to_hbm [thread:$0]  (%p2565_p5), %s5602_s6, 16, %s2134_s10, %s5577_s5  }
 0x1d7 PF: > { %p2288_p11 = scmp.ge.s32.totalorder %s2493_s18, 2  ;;  %s2148_s28 = sand.u32 1, %s2481_s15  }
 0x1d8   : > { %s2149_s29 = scalar_lea.sflag [#allocation3], %s2148_s28 }
 0x1d9   : > { %p2279_p12 = pnand %p2288_p11, %p2569_p6 }
 0x1db   : > { %2472 = dma.done.wait (!%p2279_p12), %s2149_s29, 4096  }
 0x1dc   : > { %2474 = vsyncadd (!%p2279_p12), %s2149_s29, 4294963200  ;;  %s2157_s7 = sand.u32 1, %s2248_s20  }
 0x1dd   : > { %s2158_s9 = scalar_lea.sflag [#allocation5], %s2157_s7 }
 0x1de   : > { %2476 = dma.done.wait (!%p2279_p12), %s2158_s9, 32  }
 0x1df   : > { %2478 = vsyncadd (!%p2279_p12), %s2158_s9, 4294967264  ;;  %p18_p5 = scmp.ge.s32.totalorder %s2550_s21, 4   ;;  %s6569_s15 = smov %s2485_s16 }
 0x1e0   : > { %s6570_s16 = smov %s2489_s17  ;;  %s6571_s17 = smov %s2563_s24 }
 0x1e1   : > { %s6572_s18 = smov %s2550_s21  ;;  %20 = sbr.rel (!%p18_p5) target bundleno = 5 (0x5), region = 95 }
 0x1e8   :  { %2170 = vsyncpa [#allocation3], 1 }
 0x1e9   :  { %2172 = vsyncpa [#allocation3 + $0x1], 1 }
 0x1ea   :  { %2173 = vsyncpa [#allocation5], 1 }
 0x1eb   :  { %2175 = vsyncpa [#allocation5 + $0x1], 1 }

</bundles_post_ra>
